<compile_context>
chip_gen: v5e
topology: v5e:2x2
jax: 0.10.0
libtpu: 0.0.40
codegen_flags: <defaults>
</compile_context>

<pallas_src>
import functools

import jax
import jax.numpy as jnp
from jax.experimental import pallas as pl
from jax.experimental.pallas import tpu as pltpu

PAD_ID = 0


# ----------------------------------------------------------------------------
# Tile pickers (demo shapes fall back to "full"; production sizes get real tiles)
# ----------------------------------------------------------------------------
def _pick_row_tile(n, requested=None, target=512):
    if requested is not None:
        assert n % requested == 0, (n, requested)
        return requested
    if n <= target:
        return n
    for d in range(target, 7, -1):
        if n % d == 0 and d % 8 == 0:
            return d
    return n        # fall back: full residency (correct, just large)


def _pick_time_chunk(t, requested=None, target=32):
    if requested is not None:
        assert t % requested == 0, (t, requested)
        return requested
    if t <= target:
        return t
    for d in range(target, 0, -1):
        if t % d == 0:
            return d
    return t


def _pick_vocab_tile(v, requested=None, max_tile=1024):
    if requested is not None:
        assert v % requested == 0, (v, requested)
        return requested
    if v % 128 != 0:
        return v
    best = 128
    for cand in range(128, min(v, max_tile) + 1, 128):
        if v % cand == 0:
            best = cand
    return best


# ----------------------------------------------------------------------------
# Kernel 1: per-gate hoisted input projection  g = x @ W + b
# grid = (row_tiles, gates); x tile resident across the (inner) gate axis.
# ----------------------------------------------------------------------------
def gate_linear_kernel(x_ref, w_ref, b_ref, o_ref):
    o_ref[...] = (jnp.dot(x_ref[...].astype(jnp.bfloat16), w_ref[...],
                          preferred_element_type=jnp.float32) + b_ref[...])


def run_gates(x, w, b, row_tile=None):
    # x: (N, E) bf16; w: (G, E, H) bf16; b: (G, 1, H) f32  ->  (G, N, H) f32
    N, E = x.shape
    G, _, H = w.shape
    rt = _pick_row_tile(N, row_tile)
    nr = N // rt
    return pl.pallas_call(
        gate_linear_kernel,
        out_shape=jax.ShapeDtypeStruct((G, N, H), jnp.float32),
        grid=(nr, G),
        in_specs=[
            pl.BlockSpec((rt, E), lambda r, g: (r, 0)),
            pl.BlockSpec((None, E, H), lambda r, g: (g, 0, 0)),
            pl.BlockSpec((None, 1, H), lambda r, g: (g, 0, 0)),
        ],
        out_specs=pl.BlockSpec((None, rt, H), lambda r, g: (g, r, 0)),
        compiler_params=pltpu.CompilerParams(
            dimension_semantics=("parallel", "parallel")),
    )(x, w, b)


# ----------------------------------------------------------------------------
# Kernel 2: dual Linear + Tanh :  o = tanh(a @ Wa + b @ Wb + bias)
# Used for ctx2dec (2H->H split over [fwd|bwd]) and attention combine (mix|dec).
# Row-tiled; weights resident.
# ----------------------------------------------------------------------------
def dual_linear_tanh_kernel(a_ref, b_ref, wa_ref, wb_ref, bias_ref, o_ref):
    o_ref[...] = jnp.tanh(
        jnp.dot(a_ref[...].astype(jnp.bfloat16), wa_ref[...],
                preferred_element_type=jnp.float32)
        + jnp.dot(b_ref[...].astype(jnp.bfloat16), wb_ref[...],
                  preferred_element_type=jnp.float32)
        + bias_ref[...])


def run_dual_linear_tanh(a, b, wa, wb, bias, row_tile=None):
    N, Hin = a.shape
    Hout = wa.shape[1]
    rt = _pick_row_tile(N, row_tile)
    nr = N // rt
    return pl.pallas_call(
        dual_linear_tanh_kernel,
        out_shape=jax.ShapeDtypeStruct((N, Hout), jnp.float32),
        grid=(nr,),
        in_specs=[pl.BlockSpec((rt, Hin), lambda r: (r, 0)),
                  pl.BlockSpec((rt, Hin), lambda r: (r, 0)),
                  pl.BlockSpec((Hin, Hout), lambda r: (0, 0)),
                  pl.BlockSpec((Hin, Hout), lambda r: (0, 0)),
                  pl.BlockSpec((1, Hout), lambda r: (0, 0))],
        out_specs=pl.BlockSpec((rt, Hout), lambda r: (r, 0)),
        compiler_params=pltpu.CompilerParams(dimension_semantics=("parallel",)),
    )(a, b, wa, wb, bias)


# ----------------------------------------------------------------------------
# Kernel 3: bidirectional, length-masked GRU encoder.
# One kernel body: forward & backward chains interleaved per step (two independent
# dependency chains -> latency hiding on single-TC chips). Time axis chunked via the
# grid ("arbitrary"); hidden state carried in VMEM scratch across chunks.
# Packed-sequence semantics: state held (not updated) and outputs zeroed past length.
# ----------------------------------------------------------------------------
def _gru_step(h, gr, gz, gn, wr, wz, wn, br, bz, bn):
    hb = h.astype(jnp.bfloat16)
    r = jax.nn.sigmoid(gr + jnp.dot(hb, wr, preferred_element_type=jnp.float32) + br)
    z = jax.nn.sigmoid(gz + jnp.dot(hb, wz, preferred_element_type=jnp.float32) + bz)
    n = jnp.tanh(gn + r * (jnp.dot(hb, wn, preferred_element_type=jnp.float32) + bn))
    return n + z * (h - n)                     # == (1-z)*n + z*h


def enc_bigru_kernel(lens_ref, gf_ref, gb_ref, whh_ref, bhh_ref,
                     hidsf_ref, hidsb_ref, hfin_ref, hf_scr, hb_scr):
    c = pl.program_id(0)
    C = pl.num_programs(0)
    Tc = hidsf_ref.shape[0]

    @pl.when(c == 0)
    def _():
        hf_scr[...] = jnp.zeros_like(hf_scr)
        hb_scr[...] = jnp.zeros_like(hb_scr)

    lens = lens_ref[...]                       # (B, 1) int32, resident
    base_f = c * Tc                            # absolute time of this fwd chunk
    base_b = (C - 1 - c) * Tc                  # absolute time of this bwd chunk

    wfr, wfz, wfn = whh_ref[0, 0], whh_ref[0, 1], whh_ref[0, 2]
    wbr, wbz, wbn = whh_ref[1, 0], whh_ref[1, 1], whh_ref[1, 2]
    bfr, bfz, bfn = bhh_ref[0, 0], bhh_ref[0, 1], bhh_ref[0, 2]
    bbr, bbz, bbn = bhh_ref[1, 0], bhh_ref[1, 1], bhh_ref[1, 2]

    def step(s, carry):
        hf, hb = carry
        # ---- forward chain (absolute time base_f + s) ----
        mf = ((base_f + s) < lens).astype(jnp.float32)             # (B, 1)
        hf_new = _gru_step(hf, gf_ref[0, s], gf_ref[1, s], gf_ref[2, s],
                           wfr, wfz, wfn, bfr, bfz, bfn)
        hf_out = hf + mf * (hf_new - hf)                           # hold past length
        hidsf_ref[s] = mf * hf_out                                 # zero-pad outputs
        # ---- backward chain (absolute time base_b + sb, reversed in chunk) ----
        sb = Tc - 1 - s
        mb = ((base_b + sb) < lens).astype(jnp.float32)
        hb_new = _gru_step(hb, gb_ref[0, sb], gb_ref[1, sb], gb_ref[2, sb],
                           wbr, wbz, wbn, bbr, bbz, bbn)
        hb_out = hb + mb * (hb_new - hb)
        hidsb_ref[sb] = mb * hb_out
        return hf_out, hb_out

    hf_fin, hb_fin = jax.lax.fori_loop(0, Tc, step, (hf_scr[...], hb_scr[...]))
    hf_scr[...] = hf_fin
    hb_scr[...] = hb_fin

    @pl.when(c == C - 1)
    def _():
        hfin_ref[0] = hf_scr[...]
        hfin_ref[1] = hb_scr[...]


def run_enc_bigru(gates, lens_col, whh, bhh, time_chunk=None):
    # gates: (2, 3, T, B, H) f32 ; lens_col: (B,1) i32 ; whh: (2,3,H,H) bf16 ; bhh f32
    _, _, T, B, H = gates.shape
    Tc = _pick_time_chunk(T, time_chunk)
    C = T // Tc
    return pl.pallas_call(
        enc_bigru_kernel,
        out_shape=(jax.ShapeDtypeStruct((T, B, H), jnp.float32),
                   jax.ShapeDtypeStruct((T, B, H), jnp.float32),
                   jax.ShapeDtypeStruct((2, B, H), jnp.float32)),
        grid=(C,),
        in_specs=[
            pl.BlockSpec((B, 1), lambda c: (0, 0)),
            pl.BlockSpec((None, 3, Tc, B, H), lambda c: (0, 0, c, 0, 0)),
            pl.BlockSpec((None, 3, Tc, B, H), lambda c: (1, 0, C - 1 - c, 0, 0)),
            pl.BlockSpec((2, 3, H, H), lambda c: (0, 0, 0, 0)),
            pl.BlockSpec((2, 3, 1, H), lambda c: (0, 0, 0, 0)),
        ],
        out_specs=(pl.BlockSpec((Tc, B, H), lambda c: (c, 0, 0)),
                   pl.BlockSpec((Tc, B, H), lambda c: (C - 1 - c, 0, 0)),
                   pl.BlockSpec((2, B, H), lambda c: (0, 0, 0))),
        scratch_shapes=[pltpu.VMEM((B, H), jnp.float32),
                        pltpu.VMEM((B, H), jnp.float32)],
        compiler_params=pltpu.CompilerParams(dimension_semantics=("arbitrary",)),
    )(lens_col, gates, gates, whh, bhh)


# ----------------------------------------------------------------------------
# Kernel 4: decoder GRU (unmasked fast path), time-chunked, h carried in scratch.
# ----------------------------------------------------------------------------
def dec_gru_kernel(g_ref, h0_ref, whh_ref, bhh_ref, hids_ref, h_scr):
    c = pl.program_id(0)
    Lc = hids_ref.shape[0]

    @pl.when(c == 0)
    def _():
        h_scr[...] = h0_ref[...]

    wr, wz, wn = whh_ref[0], whh_ref[1], whh_ref[2]
    br, bz, bn = bhh_ref[0], bhh_ref[1], bhh_ref[2]

    def step(s, h):
        h_new = _gru_step(h, g_ref[0, s], g_ref[1, s], g_ref[2, s],
                          wr, wz, wn, br, bz, bn)
        hids_ref[s] = h_new
        return h_new

    h_scr[...] = jax.lax.fori_loop(0, Lc, step, h_scr[...])


def run_dec_gru(gates, h0, whh, bhh, time_chunk=None):
    _, L, B, H = gates.shape
    Lc = _pick_time_chunk(L, time_chunk)
    C = L // Lc
    return pl.pallas_call(
        dec_gru_kernel,
        out_shape=jax.ShapeDtypeStruct((L, B, H), jnp.float32),
        grid=(C,),
        in_specs=[
            pl.BlockSpec((3, Lc, B, H), lambda c: (0, c, 0, 0)),
            pl.BlockSpec((B, H), lambda c: (0, 0)),
            pl.BlockSpec((3, H, H), lambda c: (0, 0, 0)),
            pl.BlockSpec((3, 1, H), lambda c: (0, 0, 0)),
        ],
        out_specs=pl.BlockSpec((Lc, B, H), lambda c: (c, 0, 0)),
        scratch_shapes=[pltpu.VMEM((B, H), jnp.float32)],
        compiler_params=pltpu.CompilerParams(dimension_semantics=("arbitrary",)),
    )(gates, h0, whh, bhh)


# ----------------------------------------------------------------------------
# Kernel 5: dot-product attention with src PAD mask, tiled per batch row.
# ----------------------------------------------------------------------------
def attn_kernel(dec_ref, enc_ref, pm_ref, mix_ref):
    dec = dec_ref[...]                          # (L, H)
    enc = enc_ref[...]                          # (T, H)
    pm = pm_ref[...]                            # (1, T): 1.0 where src is PAD
    scores = jax.lax.dot_general(dec, enc, (((1,), (1,)), ((), ())),
                                 preferred_element_type=jnp.float32)     # (L, T)
    scores = jnp.where(jnp.broadcast_to(pm, scores.shape) > 0.5,
                       jnp.float32(-1e30), scores)
    smax = jnp.max(scores, axis=-1, keepdims=True)
    e = jnp.exp(scores - smax)
    denom = jnp.sum(e, axis=-1, keepdims=True)
    attn = e * pl.reciprocal(denom, approx=True)
    mix_ref[...] = jnp.dot(attn, enc, preferred_element_type=jnp.float32)


def run_attn(dec_blh, enc_bth, pad_mask_b1t):
    B, L, H = dec_blh.shape
    T = enc_bth.shape[1]
    return pl.pallas_call(
        attn_kernel,
        out_shape=jax.ShapeDtypeStruct((B, L, H), jnp.float32),
        grid=(B,),
        in_specs=[pl.BlockSpec((None, L, H), lambda b: (b, 0, 0)),
                  pl.BlockSpec((None, T, H), lambda b: (b, 0, 0)),
                  pl.BlockSpec((None, 1, T), lambda b: (b, 0, 0))],
        out_specs=pl.BlockSpec((None, L, H), lambda b: (b, 0, 0)),
        compiler_params=pltpu.CompilerParams(dimension_semantics=("parallel",)),
    )(dec_blh, enc_bth, pad_mask_b1t)


# ----------------------------------------------------------------------------
# Kernel 6: fused vocab projection + masked temperature cross-entropy.
# grid = (row_tiles, vocab_tiles); online logsumexp + target-logit accumulators in
# VMEM scratch sized per row tile; (N, V) logits never touch HBM. Emits per-row
# masked NLL; the final scalar mean is a trivial XLA reduce.
# ----------------------------------------------------------------------------
def make_vocab_ce_kernel(inv_temp, tv):
    def kernel(comb_ref, tgt_ref, wo_ref, bo_ref, nll_ref, m_scr, s_scr, tl_scr):
        v = pl.program_id(1)
        nv = pl.num_programs(1)

        @pl.when(v == 0)
        def _():
            m_scr[...] = jnp.full(m_scr.shape, -1e30, jnp.float32)
            s_scr[...] = jnp.zeros(s_scr.shape, jnp.float32)
            tl_scr[...] = jnp.zeros(tl_scr.shape, jnp.float32)

        logits = (jnp.dot(comb_ref[...].astype(jnp.bfloat16), wo_ref[...],
                          preferred_element_type=jnp.float32)
                  + bo_ref[...]) * jnp.float32(inv_temp)             # (rt, tv)

        tgt = tgt_ref[...]                                           # (rt, 1) int32
        col = jax.lax.broadcasted_iota(jnp.int32, logits.shape, 1) + v * tv
        hit = (col == tgt).astype(jnp.float32)
        tl_scr[...] += jnp.sum(hit * logits, axis=-1, keepdims=True)

        m_prev = m_scr[...]
        m_new = jnp.maximum(m_prev, jnp.max(logits, axis=-1, keepdims=True))
        s_scr[...] = (s_scr[...] * jnp.exp(m_prev - m_new)
                      + jnp.sum(jnp.exp(logits - m_new), axis=-1, keepdims=True))
        m_scr[...] = m_new

        @pl.when(v == nv - 1)
        def _():
            valid = (tgt_ref[...] > PAD_ID).astype(jnp.float32)
            nll_ref[...] = (m_scr[...] + jnp.log(s_scr[...]) - tl_scr[...]) * valid
    return kernel


def run_vocab_ce(comb, tgt, wo, bo, temp, vocab_tile=None, row_tile=None):
    N, H = comb.shape
    V = wo.shape[1]
    tv = _pick_vocab_tile(V, vocab_tile)
    nv = V // tv
    rt = _pick_row_tile(N, row_tile)
    nr = N // rt
    return pl.pallas_call(
        make_vocab_ce_kernel(1.0 / float(temp), tv),
        out_shape=jax.ShapeDtypeStruct((N, 1), jnp.float32),
        grid=(nr, nv),
        in_specs=[
            pl.BlockSpec((rt, H), lambda r, v: (r, 0)),
            pl.BlockSpec((rt, 1), lambda r, v: (r, 0)),
            pl.BlockSpec((H, tv), lambda r, v: (0, v)),      # vocab-tiled weight
            pl.BlockSpec((1, tv), lambda r, v: (0, v)),
        ],
        out_specs=pl.BlockSpec((rt, 1), lambda r, v: (r, 0)),
        scratch_shapes=[pltpu.VMEM((rt, 1), jnp.float32),    # running max
                        pltpu.VMEM((rt, 1), jnp.float32),    # running sum-exp
                        pltpu.VMEM((rt, 1), jnp.float32)],   # target logit
        compiler_params=pltpu.CompilerParams(
            dimension_semantics=("parallel", "arbitrary")),
    )(comb, tgt, wo, bo)


# ----------------------------------------------------------------------------
# Parameters (deterministic synthetic init; bf16 matmul weights, f32 biases)
# ----------------------------------------------------------------------------
def init_params(key, V, E, H):
    ks = jax.random.split(key, 17)

    def u(k, shape, s=0.08, dtype=jnp.bfloat16):
        return jax.random.uniform(k, shape, jnp.float32, -s, s).astype(dtype)

    p = {}
    p["emb_desc"] = u(ks[0], (V, E), 0.1).at[PAD_ID].set(0.0)   # padding_idx=PAD
    p["emb_api"] = u(ks[1], (V, E), 0.1).at[PAD_ID].set(0.0)
    # bidirectional GRU encoder: weights stacked (direction, gate[r,z,n], ...)
    p["enc_wih"] = u(ks[2], (2, 3, E, H))
    p["enc_whh"] = u(ks[3], (2, 3, H, H))
    p["enc_bih"] = u(ks[4], (2, 3, 1, H), dtype=jnp.float32)
    p["enc_bhh"] = u(ks[5], (2, 3, 1, H), dtype=jnp.float32)
    # ctx2dec Linear(2H, H)+Tanh: weight split into [fwd | bwd] halves, bias 0
    p["ctx2dec_wf"] = u(ks[6], (H, H))
    p["ctx2dec_wb"] = u(ks[7], (H, H))
    p["ctx2dec_b"] = jnp.zeros((1, H), jnp.float32)
    # decoder GRU (1 layer), gate-major
    p["dec_wih"] = u(ks[8], (3, E, H))
    p["dec_whh"] = u(ks[9], (3, H, H))
    p["dec_bih"] = u(ks[10], (3, 1, H), dtype=jnp.float32)
    p["dec_bhh"] = u(ks[11], (3, 1, H), dtype=jnp.float32)
    # attention linear_out Linear(2H, H) split into [mix | dec] halves
    p["attn_wmix"] = u(ks[12], (H, H))
    p["attn_wdec"] = u(ks[13], (H, H))
    p["attn_b"] = u(ks[14], (1, H), dtype=jnp.float32)
    # output projection Linear(H, V)
    p["out_w"] = u(ks[15], (H, V))
    p["out_b"] = u(ks[16], (1, V), dtype=jnp.float32)
    return p


# ----------------------------------------------------------------------------
# Full forward (all matmuls / recurrences / softmax / CE in Pallas kernels)
# ----------------------------------------------------------------------------
def rnn_seq2seq_forward(params, src_seqs, src_lens, target, tar_lens, temp,
                        enc_time_chunk=None, dec_time_chunk=None,
                        vocab_tile=None, row_tile=None):
    B, T = src_seqs.shape
    L = target.shape[1] - 1
    H = params["dec_whh"].shape[1]
    E = params["emb_desc"].shape[1]

    # ---- encoder: embeddings gathered time-major, per-gate input projection ----
    src_emb = jnp.take(params["emb_desc"], src_seqs.T, axis=0)          # (T,B,E) bf16
    enc_gates = run_gates(src_emb.reshape(T * B, E),
                          params["enc_wih"].reshape(6, E, H),
                          params["enc_bih"].reshape(6, 1, H), row_tile)
    enc_gates = enc_gates.reshape(2, 3, T, B, H)                        # f32

    lens_col = src_lens.astype(jnp.int32)[:, None]                      # (B,1)
    hids_f, hids_b, hfin = run_enc_bigru(enc_gates, lens_col,
                                         params["enc_whh"], params["enc_bhh"],
                                         enc_time_chunk)

    # ---- ctx2dec on final hiddens and all encoder hiddens (split 2H weight) ----
    init_h = run_dual_linear_tanh(hfin[0], hfin[1],
                                  params["ctx2dec_wf"], params["ctx2dec_wb"],
                                  params["ctx2dec_b"], row_tile)        # (B,H)
    hids_proj = run_dual_linear_tanh(hids_f.reshape(T * B, H),
                                     hids_b.reshape(T * B, H),
                                     params["ctx2dec_wf"], params["ctx2dec_wb"],
                                     params["ctx2dec_b"], row_tile)     # (T*B,H)
    enc_bth = jnp.transpose(hids_proj.reshape(T, B, H), (1, 0, 2))      # (B,T,H)

    # ---- decoder GRU (teacher forcing on target[:, :-1], unmasked fast path) ----
    dec_in = target[:, :-1]
    dec_emb = jnp.take(params["emb_api"], dec_in.T, axis=0)             # (L,B,E) bf16
    dec_gates = run_gates(dec_emb.reshape(L * B, E),
                          params["dec_wih"], params["dec_bih"], row_tile)
    dec_gates = dec_gates.reshape(3, L, B, H)
    dec_hid = run_dec_gru(dec_gates, init_h,
                          params["dec_whh"], params["dec_bhh"],
                          dec_time_chunk)                               # (L,B,H)
    dec_blh = jnp.transpose(dec_hid, (1, 0, 2))                         # (B,L,H)

    # ---- attention over projected encoder hiddens (src PAD masked) ----
    src_pad_mask = (src_seqs == PAD_ID).astype(jnp.float32)[:, None, :]  # (B,1,T)
    mix_blh = run_attn(dec_blh, enc_bth, src_pad_mask)                  # (B,L,H)

    # ---- combine, vocab projection + masked temperature CE (fused, tiled) ----
    N = B * L
    comb = run_dual_linear_tanh(mix_blh.reshape(N, H), dec_blh.reshape(N, H),
                                params["attn_wmix"], params["attn_wdec"],
                                params["attn_b"], row_tile)             # (N,H)
    tgt = target[:, 1:].reshape(N, 1).astype(jnp.int32)
    nll = run_vocab_ce(comb, tgt, params["out_w"], params["out_b"], temp,
                       vocab_tile, row_tile)                            # (N,1) masked
    valid = (tgt > PAD_ID).astype(jnp.float32)
    return jnp.sum(nll) / jnp.maximum(jnp.sum(valid), 1.0)              # token mean


if __name__ == "__main__":
    V, E, H = 256, 16, 32          # vocab_size, emb_dim, n_hidden
    B, T, MAXLEN = 2, 10, 8        # batch, src seq len, max_sent_len
    TEMP = 0.8

    params = init_params(jax.random.PRNGKey(0), V, E, H)

    kd = jax.random.split(jax.random.PRNGKey(0), 4)
    src_lens = jnp.array([10, 6], dtype=jnp.int32)
    src_tok = jax.random.randint(kd[0], (B, T), 1, V)
    src_seqs = jnp.where(jnp.arange(T)[None, :] < src_lens[:, None],
                         src_tok, PAD_ID).astype(jnp.int32)

    tar_lens = jnp.array([8, 5], dtype=jnp.int32)
    tgt_tok = jax.random.randint(kd[1], (B, MAXLEN), 1, V)
    target = jnp.where(jnp.arange(MAXLEN)[None, :] < tar_lens[:, None],
                       tgt_tok, PAD_ID).astype(jnp.int32)

    # enc_time_chunk=5 exercises the multi-chunk carried-state encoder path (T=10),
    # vocab_tile=128 exercises the multi-tile online-CE path (V=256 -> 2 tiles).
    fwd = jax.jit(functools.partial(rnn_seq2seq_forward, temp=TEMP,
                                    enc_time_chunk=5, vocab_tile=128))
    loss = fwd(params, src_seqs, src_lens, target, tar_lens)
    jax.block_until_ready(loss)
    assert jnp.isfinite(loss), "loss is not finite"
    print("KERNEL_OK")
</pallas_src>

<mosaic_0001>
module attributes {stable_mosaic.version = 11 : i64} {
  func.func @gate_linear_kernel(%arg0: i32, %arg1: i32, %arg2: memref<20x16xbf16, #tpu.memory_space<vmem>>, %arg3: memref<1x16x32xbf16, #tpu.memory_space<vmem>>, %arg4: memref<1x1x32xf32, #tpu.memory_space<vmem>>, %arg5: memref<1x20x32xf32, #tpu.memory_space<vmem>>) attributes {dimension_semantics = [#tpu.dimension_semantics<parallel>, #tpu.dimension_semantics<parallel>], iteration_bounds = array<i64: 1, 6>, scalar_prefetch = 0 : i64, scratch_operands = 0 : i64, tpu.core_type = #tpu.core_type<tc>, window_params = [{transform_indices = @transform_0, window_bounds = array<i64: 20, 16>}, {transform_indices = @transform_1, window_bounds = array<i64: 1, 16, 32>}, {transform_indices = @transform_2, window_bounds = array<i64: 1, 1, 32>}, {transform_indices = @transform_3, window_bounds = array<i64: 1, 20, 32>}]} {
    %c0 = arith.constant 0 : index
    %c0_0 = arith.constant 0 : index
    %0 = vector.load %arg2[%c0, %c0_0] : memref<20x16xbf16, #tpu.memory_space<vmem>>, vector<20x16xbf16>
    %c0_1 = arith.constant 0 : index
    %c0_2 = arith.constant 0 : index
    %c0_3 = arith.constant 0 : index
    %1 = vector.load %arg3[%c0_1, %c0_2, %c0_3] : memref<1x16x32xbf16, #tpu.memory_space<vmem>>, vector<1x16x32xbf16>
    %2 = vector.shape_cast %1 : vector<1x16x32xbf16> to vector<16x32xbf16>
    %cst = arith.constant dense<0.000000e+00> : vector<20x32xf32>
    %3 = tpu.matmul %0, %2, %cst {dimension_numbers = #tpu.dot_dimension_numbers<[1], [0], [0], [1], [0, 0, 1, 1], [], []>} : vector<20x16xbf16>, vector<16x32xbf16>, vector<20x32xf32> -> vector<20x32xf32>
    %c0_4 = arith.constant 0 : index
    %c0_5 = arith.constant 0 : index
    %c0_6 = arith.constant 0 : index
    %4 = vector.load %arg4[%c0_4, %c0_5, %c0_6] : memref<1x1x32xf32, #tpu.memory_space<vmem>>, vector<1x1x32xf32>
    %5 = vector.shape_cast %4 : vector<1x1x32xf32> to vector<1x32xf32>
    %6 = vector.broadcast %5 : vector<1x32xf32> to vector<20x32xf32>
    %7 = arith.addf %3, %6 : vector<20x32xf32>
    %c0_7 = arith.constant 0 : index
    %c0_8 = arith.constant 0 : index
    %c0_9 = arith.constant 0 : index
    %8 = vector.load %arg5[%c0_7, %c0_8, %c0_9] : memref<1x20x32xf32, #tpu.memory_space<vmem>>, vector<1x20x32xf32>
    %9 = vector.shape_cast %8 : vector<1x20x32xf32> to vector<20x32xf32>
    %10 = vector.shape_cast %7 : vector<20x32xf32> to vector<1x20x32xf32>
    tpu.vector_store %arg5[%c0_7, %c0_8, %c0_9], %10 {strides = array<i32>} : memref<1x20x32xf32, #tpu.memory_space<vmem>>, vector<1x20x32xf32>,
    return
  }
  func.func @transform_0(%arg0: i32, %arg1: i32) -> (i32, i32) {
    %c0_i32 = arith.constant 0 : i32
    %c0_i32_0 = arith.constant 0 : i32
    return %arg0, %c0_i32 : i32, i32
  }
  func.func @transform_1(%arg0: i32, %arg1: i32) -> (i32, i32, i32) {
    %c0_i32 = arith.constant 0 : i32
    %c0_i32_0 = arith.constant 0 : i32
    %c0_i32_1 = arith.constant 0 : i32
    return %arg1, %c0_i32, %c0_i32_0 : i32, i32, i32
  }
  func.func @transform_2(%arg0: i32, %arg1: i32) -> (i32, i32, i32) {
    %c0_i32 = arith.constant 0 : i32
    %c0_i32_0 = arith.constant 0 : i32
    %c0_i32_1 = arith.constant 0 : i32
    return %arg1, %c0_i32, %c0_i32_0 : i32, i32, i32
  }
  func.func @transform_3(%arg0: i32, %arg1: i32) -> (i32, i32, i32) {
    %c0_i32 = arith.constant 0 : i32
    %c0_i32_0 = arith.constant 0 : i32
    return %arg1, %arg0, %c0_i32 : i32, i32, i32
  }
}

module attributes {stable_mosaic.version = 11 : i64} {
  func.func @dual_linear_tanh_kernel(%arg0: i32, %arg1: memref<2x32xf32, #tpu.memory_space<vmem>>, %arg2: memref<2x32xf32, #tpu.memory_space<vmem>>, %arg3: memref<32x32xbf16, #tpu.memory_space<vmem>>, %arg4: memref<32x32xbf16, #tpu.memory_space<vmem>>, %arg5: memref<1x32xf32, #tpu.memory_space<vmem>>, %arg6: memref<2x32xf32, #tpu.memory_space<vmem>>) attributes {dimension_semantics = [#tpu.dimension_semantics<parallel>], iteration_bounds = array<i64: 1>, scalar_prefetch = 0 : i64, scratch_operands = 0 : i64, tpu.core_type = #tpu.core_type<tc>, window_params = [{transform_indices = @transform_0, window_bounds = array<i64: 2, 32>}, {transform_indices = @transform_1, window_bounds = array<i64: 2, 32>}, {pipeline_mode = #tpu.pipeline_mode<synchronous>, transform_indices = @transform_2, window_bounds = array<i64: 32, 32>}, {pipeline_mode = #tpu.pipeline_mode<synchronous>, transform_indices = @transform_3, window_bounds = array<i64: 32, 32>}, {pipeline_mode = #tpu.pipeline_mode<synchronous>, transform_indices = @transform_4, window_bounds = array<i64: 1, 32>}, {transform_indices = @transform_5, window_bounds = array<i64: 2, 32>}]} {
    %c0 = arith.constant 0 : index
    %c0_0 = arith.constant 0 : index
    %0 = vector.load %arg1[%c0, %c0_0] : memref<2x32xf32, #tpu.memory_space<vmem>>, vector<2x32xf32>
    %1 = arith.truncf %0 : vector<2x32xf32> to vector<2x32xbf16>
    %c0_1 = arith.constant 0 : index
    %c0_2 = arith.constant 0 : index
    %2 = vector.load %arg3[%c0_1, %c0_2] : memref<32x32xbf16, #tpu.memory_space<vmem>>, vector<32x32xbf16>
    %cst = arith.constant dense<0.000000e+00> : vector<2x32xf32>
    %3 = tpu.matmul %1, %2, %cst {dimension_numbers = #tpu.dot_dimension_numbers<[1], [0], [0], [1], [0, 0, 1, 1], [], []>} : vector<2x32xbf16>, vector<32x32xbf16>, vector<2x32xf32> -> vector<2x32xf32>
    %c0_3 = arith.constant 0 : index
    %c0_4 = arith.constant 0 : index
    %4 = vector.load %arg2[%c0_3, %c0_4] : memref<2x32xf32, #tpu.memory_space<vmem>>, vector<2x32xf32>
    %5 = arith.truncf %4 : vector<2x32xf32> to vector<2x32xbf16>
    %c0_5 = arith.constant 0 : index
    %c0_6 = arith.constant 0 : index
    %6 = vector.load %arg4[%c0_5, %c0_6] : memref<32x32xbf16, #tpu.memory_space<vmem>>, vector<32x32xbf16>
    %cst_7 = arith.constant dense<0.000000e+00> : vector<2x32xf32>
    %7 = tpu.matmul %5, %6, %cst_7 {dimension_numbers = #tpu.dot_dimension_numbers<[1], [0], [0], [1], [0, 0, 1, 1], [], []>} : vector<2x32xbf16>, vector<32x32xbf16>, vector<2x32xf32> -> vector<2x32xf32>
    %8 = arith.addf %3, %7 : vector<2x32xf32>
    %c0_8 = arith.constant 0 : index
    %c0_9 = arith.constant 0 : index
    %9 = vector.load %arg5[%c0_8, %c0_9] : memref<1x32xf32, #tpu.memory_space<vmem>>, vector<1x32xf32>
    %10 = vector.broadcast %9 : vector<1x32xf32> to vector<2x32xf32>
    %11 = arith.addf %8, %10 : vector<2x32xf32>
    %12 = math.tanh %11 : vector<2x32xf32>
    %c0_10 = arith.constant 0 : index
    %c0_11 = arith.constant 0 : index
    %13 = vector.load %arg6[%c0_10, %c0_11] : memref<2x32xf32, #tpu.memory_space<vmem>>, vector<2x32xf32>
    tpu.vector_store %arg6[%c0_10, %c0_11], %12 {strides = array<i32>} : memref<2x32xf32, #tpu.memory_space<vmem>>, vector<2x32xf32>,
    return
  }
  func.func @transform_0(%arg0: i32) -> (i32, i32) {
    %c0_i32 = arith.constant 0 : i32
    %c0_i32_0 = arith.constant 0 : i32
    return %arg0, %c0_i32 : i32, i32
  }
  func.func @transform_1(%arg0: i32) -> (i32, i32) {
    %c0_i32 = arith.constant 0 : i32
    %c0_i32_0 = arith.constant 0 : i32
    return %arg0, %c0_i32 : i32, i32
  }
  func.func @transform_2(%arg0: i32) -> (i32, i32) {
    %c0_i32 = arith.constant 0 : i32
    %c0_i32_0 = arith.constant 0 : i32
    %c0_i32_1 = arith.constant 0 : i32
    return %c0_i32, %c0_i32_0 : i32, i32
  }
  func.func @transform_3(%arg0: i32) -> (i32, i32) {
    %c0_i32 = arith.constant 0 : i32
    %c0_i32_0 = arith.constant 0 : i32
    %c0_i32_1 = arith.constant 0 : i32
    return %c0_i32, %c0_i32_0 : i32, i32
  }
  func.func @transform_4(%arg0: i32) -> (i32, i32) {
    %c0_i32 = arith.constant 0 : i32
    %c0_i32_0 = arith.constant 0 : i32
    %c0_i32_1 = arith.constant 0 : i32
    return %c0_i32, %c0_i32_0 : i32, i32
  }
  func.func @transform_5(%arg0: i32) -> (i32, i32) {
    %c0_i32 = arith.constant 0 : i32
    %c0_i32_0 = arith.constant 0 : i32
    return %arg0, %c0_i32 : i32, i32
  }
}

module attributes {stable_mosaic.version = 11 : i64} {
  func.func @enc_bigru_kernel(%arg0: i32, %arg1: memref<2x1xi32, #tpu.memory_space<vmem>>, %arg2: memref<1x3x5x2x32xf32, #tpu.memory_space<vmem>>, %arg3: memref<1x3x5x2x32xf32, #tpu.memory_space<vmem>>, %arg4: memref<2x3x32x32xbf16, #tpu.memory_space<vmem>>, %arg5: memref<2x3x1x32xf32, #tpu.memory_space<vmem>>, %arg6: memref<5x2x32xf32, #tpu.memory_space<vmem>>, %arg7: memref<5x2x32xf32, #tpu.memory_space<vmem>>, %arg8: memref<2x2x32xf32, #tpu.memory_space<vmem>>, %arg9: memref<2x32xf32, #tpu.memory_space<vmem>>, %arg10: memref<2x32xf32, #tpu.memory_space<vmem>>) attributes {dimension_semantics = [#tpu.dimension_semantics<arbitrary>], iteration_bounds = array<i64: 2>, scalar_prefetch = 0 : i64, scratch_operands = 2 : i64, tpu.core_type = #tpu.core_type<tc>, window_params = [{pipeline_mode = #tpu.pipeline_mode<synchronous>, transform_indices = @transform_0, window_bounds = array<i64: 2, 1>}, {transform_indices = @transform_1, window_bounds = array<i64: 1, 3, 5, 2, 32>}, {transform_indices = @transform_2, window_bounds = array<i64: 1, 3, 5, 2, 32>}, {pipeline_mode = #tpu.pipeline_mode<synchronous>, transform_indices = @transform_3, window_bounds = array<i64: 2, 3, 32, 32>}, {pipeline_mode = #tpu.pipeline_mode<synchronous>, transform_indices = @transform_4, window_bounds = array<i64: 2, 3, 1, 32>}, {transform_indices = @transform_5, window_bounds = array<i64: 5, 2, 32>}, {transform_indices = @transform_6, window_bounds = array<i64: 5, 2, 32>}, {pipeline_mode = #tpu.pipeline_mode<synchronous>, transform_indices = @transform_7, window_bounds = array<i64: 2, 2, 32>}]} {
    %c0_i32 = arith.constant 0 : i32
    %0 = arith.cmpi eq, %arg0, %c0_i32 : i32
    %1 = arith.extui %0 : i1 to i32
    %c0_i32_0 = arith.constant 0 : i32
    %2 = arith.cmpi ne, %1, %c0_i32_0 : i32
    scf.if %2 {
      %cst = arith.constant 0.000000e+00 : f32
      %40 = vector.broadcast %cst : f32 to vector<2x32xf32>
      %c0_63 = arith.constant 0 : index
      %c0_64 = arith.constant 0 : index
      %41 = vector.load %arg9[%c0_63, %c0_64] : memref<2x32xf32, #tpu.memory_space<vmem>>, vector<2x32xf32>
      tpu.vector_store %arg9[%c0_63, %c0_64], %40 {strides = array<i32>} : memref<2x32xf32, #tpu.memory_space<vmem>>, vector<2x32xf32>,
      %cst_65 = arith.constant 0.000000e+00 : f32
      %42 = vector.broadcast %cst_65 : f32 to vector<2x32xf32>
      %c0_66 = arith.constant 0 : index
      %c0_67 = arith.constant 0 : index
      %43 = vector.load %arg10[%c0_66, %c0_67] : memref<2x32xf32, #tpu.memory_space<vmem>>, vector<2x32xf32>
      tpu.vector_store %arg10[%c0_66, %c0_67], %42 {strides = array<i32>} : memref<2x32xf32, #tpu.memory_space<vmem>>, vector<2x32xf32>,
    } else {
    }
    %c0 = arith.constant 0 : index
    %c0_1 = arith.constant 0 : index
    %3 = vector.load %arg1[%c0, %c0_1] : memref<2x1xi32, #tpu.memory_space<vmem>>, vector<2x1xi32>
    %c5_i32 = arith.constant 5 : i32
    %4 = arith.muli %arg0, %c5_i32 : i32
    %c1_i32 = arith.constant 1 : i32
    %5 = arith.subi %c1_i32, %arg0 : i32
    %c5_i32_2 = arith.constant 5 : i32
    %6 = arith.muli %5, %c5_i32_2 : i32
    %c0_3 = arith.constant 0 : index
    %c0_4 = arith.constant 0 : index
    %c0_5 = arith.constant 0 : index
    %c0_6 = arith.constant 0 : index
    %7 = vector.load %arg4[%c0_3, %c0_4, %c0_5, %c0_6] : memref<2x3x32x32xbf16, #tpu.memory_space<vmem>>, vector<1x1x32x32xbf16>
    %8 = vector.shape_cast %7 : vector<1x1x32x32xbf16> to vector<32x32xbf16>
    %c0_7 = arith.constant 0 : index
    %c1 = arith.constant 1 : index
    %c0_8 = arith.constant 0 : index
    %c0_9 = arith.constant 0 : index
    %9 = vector.load %arg4[%c0_7, %c1, %c0_8, %c0_9] : memref<2x3x32x32xbf16, #tpu.memory_space<vmem>>, vector<1x1x32x32xbf16>
    %10 = vector.shape_cast %9 : vector<1x1x32x32xbf16> to vector<32x32xbf16>
    %c0_10 = arith.constant 0 : index
    %c2 = arith.constant 2 : index
    %c0_11 = arith.constant 0 : index
    %c0_12 = arith.constant 0 : index
    %11 = vector.load %arg4[%c0_10, %c2, %c0_11, %c0_12] : memref<2x3x32x32xbf16, #tpu.memory_space<vmem>>, vector<1x1x32x32xbf16>
    %12 = vector.shape_cast %11 : vector<1x1x32x32xbf16> to vector<32x32xbf16>
    %c1_13 = arith.constant 1 : index
    %c0_14 = arith.constant 0 : index
    %c0_15 = arith.constant 0 : index
    %c0_16 = arith.constant 0 : index
    %13 = vector.load %arg4[%c1_13, %c0_14, %c0_15, %c0_16] : memref<2x3x32x32xbf16, #tpu.memory_space<vmem>>, vector<1x1x32x32xbf16>
    %14 = vector.shape_cast %13 : vector<1x1x32x32xbf16> to vector<32x32xbf16>
    %c1_17 = arith.constant 1 : index
    %c1_18 = arith.constant 1 : index
    %c0_19 = arith.constant 0 : index
    %c0_20 = arith.constant 0 : index
    %15 = vector.load %arg4[%c1_17, %c1_18, %c0_19, %c0_20] : memref<2x3x32x32xbf16, #tpu.memory_space<vmem>>, vector<1x1x32x32xbf16>
    %16 = vector.shape_cast %15 : vector<1x1x32x32xbf16> to vector<32x32xbf16>
    %c1_21 = arith.constant 1 : index
    %c2_22 = arith.constant 2 : index
    %c0_23 = arith.constant 0 : index
    %c0_24 = arith.constant 0 : index
    %17 = vector.load %arg4[%c1_21, %c2_22, %c0_23, %c0_24] : memref<2x3x32x32xbf16, #tpu.memory_space<vmem>>, vector<1x1x32x32xbf16>
    %18 = vector.shape_cast %17 : vector<1x1x32x32xbf16> to vector<32x32xbf16>
    %c0_25 = arith.constant 0 : index
    %c0_26 = arith.constant 0 : index
    %c0_27 = arith.constant 0 : index
    %c0_28 = arith.constant 0 : index
    %19 = vector.load %arg5[%c0_25, %c0_26, %c0_27, %c0_28] : memref<2x3x1x32xf32, #tpu.memory_space<vmem>>, vector<1x1x1x32xf32>
    %20 = vector.shape_cast %19 : vector<1x1x1x32xf32> to vector<1x32xf32>
    %c0_29 = arith.constant 0 : index
    %c1_30 = arith.constant 1 : index
    %c0_31 = arith.constant 0 : index
    %c0_32 = arith.constant 0 : index
    %21 = vector.load %arg5[%c0_29, %c1_30, %c0_31, %c0_32] : memref<2x3x1x32xf32, #tpu.memory_space<vmem>>, vector<1x1x1x32xf32>
    %22 = vector.shape_cast %21 : vector<1x1x1x32xf32> to vector<1x32xf32>
    %c0_33 = arith.constant 0 : index
    %c2_34 = arith.constant 2 : index
    %c0_35 = arith.constant 0 : index
    %c0_36 = arith.constant 0 : index
    %23 = vector.load %arg5[%c0_33, %c2_34, %c0_35, %c0_36] : memref<2x3x1x32xf32, #tpu.memory_space<vmem>>, vector<1x1x1x32xf32>
    %24 = vector.shape_cast %23 : vector<1x1x1x32xf32> to vector<1x32xf32>
    %c1_37 = arith.constant 1 : index
    %c0_38 = arith.constant 0 : index
    %c0_39 = arith.constant 0 : index
    %c0_40 = arith.constant 0 : index
    %25 = vector.load %arg5[%c1_37, %c0_38, %c0_39, %c0_40] : memref<2x3x1x32xf32, #tpu.memory_space<vmem>>, vector<1x1x1x32xf32>
    %26 = vector.shape_cast %25 : vector<1x1x1x32xf32> to vector<1x32xf32>
    %c1_41 = arith.constant 1 : index
    %c1_42 = arith.constant 1 : index
    %c0_43 = arith.constant 0 : index
    %c0_44 = arith.constant 0 : index
    %27 = vector.load %arg5[%c1_41, %c1_42, %c0_43, %c0_44] : memref<2x3x1x32xf32, #tpu.memory_space<vmem>>, vector<1x1x1x32xf32>
    %28 = vector.shape_cast %27 : vector<1x1x1x32xf32> to vector<1x32xf32>
    %c1_45 = arith.constant 1 : index
    %c2_46 = arith.constant 2 : index
    %c0_47 = arith.constant 0 : index
    %c0_48 = arith.constant 0 : index
    %29 = vector.load %arg5[%c1_45, %c2_46, %c0_47, %c0_48] : memref<2x3x1x32xf32, #tpu.memory_space<vmem>>, vector<1x1x1x32xf32>
    %30 = vector.shape_cast %29 : vector<1x1x1x32xf32> to vector<1x32xf32>
    %c0_49 = arith.constant 0 : index
    %c0_50 = arith.constant 0 : index
    %31 = vector.load %arg9[%c0_49, %c0_50] : memref<2x32xf32, #tpu.memory_space<vmem>>, vector<2x32xf32>
    %c0_51 = arith.constant 0 : index
    %c0_52 = arith.constant 0 : index
    %32 = vector.load %arg10[%c0_51, %c0_52] : memref<2x32xf32, #tpu.memory_space<vmem>>, vector<2x32xf32>
    %c0_i32_53 = arith.constant 0 : i32
    %c5_i32_54 = arith.constant 5 : i32
    %33 = arith.addi %c0_i32_53, %c5_i32_54 : i32
    %c1_i32_55 = arith.constant 1 : i32
    %34:2 = scf.for %arg11 = %c0_i32_53 to %33 step %c1_i32_55 iter_args(%arg12 = %31, %arg13 = %32) -> (vector<2x32xf32>, vector<2x32xf32>)  : i32 {
      %40 = arith.addi %4, %arg11 : i32
      %41 = vector.broadcast %40 : i32 to vector<2x1xi32>
      %42 = arith.cmpi slt, %41, %3 : vector<2x1xi32>
      %43 = arith.extui %42 : vector<2x1xi1> to vector<2x1xi32>
      %44 = arith.sitofp %43 : vector<2x1xi32> to vector<2x1xf32>
      %c0_63 = arith.constant 0 : index
      %c0_64 = arith.constant 0 : index
      %45 = arith.index_cast %arg11 : i32 to index
      %c0_65 = arith.constant 0 : index
      %c0_66 = arith.constant 0 : index
      %46 = vector.load %arg2[%c0_63, %c0_64, %45, %c0_65, %c0_66] : memref<1x3x5x2x32xf32, #tpu.memory_space<vmem>>, vector<1x1x1x2x32xf32>
      %47 = vector.shape_cast %46 : vector<1x1x1x2x32xf32> to vector<2x32xf32>
      %c0_67 = arith.constant 0 : index
      %c1_68 = arith.constant 1 : index
      %48 = arith.index_cast %arg11 : i32 to index
      %c0_69 = arith.constant 0 : index
      %c0_70 = arith.constant 0 : index
      %49 = vector.load %arg2[%c0_67, %c1_68, %48, %c0_69, %c0_70] : memref<1x3x5x2x32xf32, #tpu.memory_space<vmem>>, vector<1x1x1x2x32xf32>
      %50 = vector.shape_cast %49 : vector<1x1x1x2x32xf32> to vector<2x32xf32>
      %c0_71 = arith.constant 0 : index
      %c2_72 = arith.constant 2 : index
      %51 = arith.index_cast %arg11 : i32 to index
      %c0_73 = arith.constant 0 : index
      %c0_74 = arith.constant 0 : index
      %52 = vector.load %arg2[%c0_71, %c2_72, %51, %c0_73, %c0_74] : memref<1x3x5x2x32xf32, #tpu.memory_space<vmem>>, vector<1x1x1x2x32xf32>
      %53 = vector.shape_cast %52 : vector<1x1x1x2x32xf32> to vector<2x32xf32>
      %54 = arith.truncf %arg12 : vector<2x32xf32> to vector<2x32xbf16>
      %cst = arith.constant dense<0.000000e+00> : vector<2x32xf32>
      %55 = tpu.matmul %54, %8, %cst {dimension_numbers = #tpu.dot_dimension_numbers<[1], [0], [0], [1], [0, 0, 1, 1], [], []>} : vector<2x32xbf16>, vector<32x32xbf16>, vector<2x32xf32> -> vector<2x32xf32>
      %56 = arith.addf %47, %55 : vector<2x32xf32>
      %57 = vector.broadcast %20 : vector<1x32xf32> to vector<2x32xf32>
      %58 = arith.addf %56, %57 : vector<2x32xf32>
      %59 = arith.negf %58 : vector<2x32xf32>
      %60 = math.exp %59 : vector<2x32xf32>
      %cst_75 = arith.constant 1.000000e+00 : f32
      %61 = vector.broadcast %cst_75 : f32 to vector<2x32xf32>
      %62 = arith.addf %61, %60 : vector<2x32xf32>
      %63 = arith.divf %61, %62 : vector<2x32xf32>
      %cst_76 = arith.constant dense<0.000000e+00> : vector<2x32xf32>
      %64 = tpu.matmul %54, %10, %cst_76 {dimension_numbers = #tpu.dot_dimension_numbers<[1], [0], [0], [1], [0, 0, 1, 1], [], []>} : vector<2x32xbf16>, vector<32x32xbf16>, vector<2x32xf32> -> vector<2x32xf32>
      %65 = arith.addf %50, %64 : vector<2x32xf32>
      %66 = vector.broadcast %22 : vector<1x32xf32> to vector<2x32xf32>
      %67 = arith.addf %65, %66 : vector<2x32xf32>
      %68 = arith.negf %67 : vector<2x32xf32>
      %69 = math.exp %68 : vector<2x32xf32>
      %cst_77 = arith.constant 1.000000e+00 : f32
      %70 = vector.broadcast %cst_77 : f32 to vector<2x32xf32>
      %71 = arith.addf %70, %69 : vector<2x32xf32>
      %72 = arith.divf %70, %71 : vector<2x32xf32>
      %cst_78 = arith.constant dense<0.000000e+00> : vector<2x32xf32>
      %73 = tpu.matmul %54, %12, %cst_78 {dimension_numbers = #tpu.dot_dimension_numbers<[1], [0], [0], [1], [0, 0, 1, 1], [], []>} : vector<2x32xbf16>, vector<32x32xbf16>, vector<2x32xf32> -> vector<2x32xf32>
      %74 = vector.broadcast %24 : vector<1x32xf32> to vector<2x32xf32>
      %75 = arith.addf %73, %74 : vector<2x32xf32>
      %76 = arith.mulf %63, %75 : vector<2x32xf32>
      %77 = arith.addf %53, %76 : vector<2x32xf32>
      %78 = math.tanh %77 : vector<2x32xf32>
      %79 = arith.subf %arg12, %78 : vector<2x32xf32>
      %80 = arith.mulf %72, %79 : vector<2x32xf32>
      %81 = arith.addf %78, %80 : vector<2x32xf32>
      %82 = arith.subf %81, %arg12 : vector<2x32xf32>
      %83 = vector.broadcast %44 : vector<2x1xf32> to vector<2x32xf32>
      %84 = arith.mulf %83, %82 : vector<2x32xf32>
      %85 = arith.addf %arg12, %84 : vector<2x32xf32>
      %86 = vector.broadcast %44 : vector<2x1xf32> to vector<2x32xf32>
      %87 = arith.mulf %86, %85 : vector<2x32xf32>
      %88 = arith.index_cast %arg11 : i32 to index
      %c0_79 = arith.constant 0 : index
      %c0_80 = arith.constant 0 : index
      %89 = vector.load %arg6[%88, %c0_79, %c0_80] : memref<5x2x32xf32, #tpu.memory_space<vmem>>, vector<1x2x32xf32>
      %90 = vector.shape_cast %89 : vector<1x2x32xf32> to vector<2x32xf32>
      %91 = vector.shape_cast %87 : vector<2x32xf32> to vector<1x2x32xf32>
      tpu.vector_store %arg6[%88, %c0_79, %c0_80], %91 {strides = array<i32>} : memref<5x2x32xf32, #tpu.memory_space<vmem>>, vector<1x2x32xf32>,
      %c4_i32 = arith.constant 4 : i32
      %92 = arith.subi %c4_i32, %arg11 : i32
      %93 = arith.addi %6, %92 : i32
      %94 = vector.broadcast %93 : i32 to vector<2x1xi32>
      %95 = arith.cmpi slt, %94, %3 : vector<2x1xi32>
      %96 = arith.extui %95 : vector<2x1xi1> to vector<2x1xi32>
      %97 = arith.sitofp %96 : vector<2x1xi32> to vector<2x1xf32>
      %c0_81 = arith.constant 0 : index
      %c0_82 = arith.constant 0 : index
      %98 = arith.index_cast %92 : i32 to index
      %c0_83 = arith.constant 0 : index
      %c0_84 = arith.constant 0 : index
      %99 = vector.load %arg3[%c0_81, %c0_82, %98, %c0_83, %c0_84] : memref<1x3x5x2x32xf32, #tpu.memory_space<vmem>>, vector<1x1x1x2x32xf32>
      %100 = vector.shape_cast %99 : vector<1x1x1x2x32xf32> to vector<2x32xf32>
      %c0_85 = arith.constant 0 : index
      %c1_86 = arith.constant 1 : index
      %101 = arith.index_cast %92 : i32 to index
      %c0_87 = arith.constant 0 : index
      %c0_88 = arith.constant 0 : index
      %102 = vector.load %arg3[%c0_85, %c1_86, %101, %c0_87, %c0_88] : memref<1x3x5x2x32xf32, #tpu.memory_space<vmem>>, vector<1x1x1x2x32xf32>
      %103 = vector.shape_cast %102 : vector<1x1x1x2x32xf32> to vector<2x32xf32>
      %c0_89 = arith.constant 0 : index
      %c2_90 = arith.constant 2 : index
      %104 = arith.index_cast %92 : i32 to index
      %c0_91 = arith.constant 0 : index
      %c0_92 = arith.constant 0 : index
      %105 = vector.load %arg3[%c0_89, %c2_90, %104, %c0_91, %c0_92] : memref<1x3x5x2x32xf32, #tpu.memory_space<vmem>>, vector<1x1x1x2x32xf32>
      %106 = vector.shape_cast %105 : vector<1x1x1x2x32xf32> to vector<2x32xf32>
      %107 = arith.truncf %arg13 : vector<2x32xf32> to vector<2x32xbf16>
      %cst_93 = arith.constant dense<0.000000e+00> : vector<2x32xf32>
      %108 = tpu.matmul %107, %14, %cst_93 {dimension_numbers = #tpu.dot_dimension_numbers<[1], [0], [0], [1], [0, 0, 1, 1], [], []>} : vector<2x32xbf16>, vector<32x32xbf16>, vector<2x32xf32> -> vector<2x32xf32>
      %109 = arith.addf %100, %108 : vector<2x32xf32>
      %110 = vector.broadcast %26 : vector<1x32xf32> to vector<2x32xf32>
      %111 = arith.addf %109, %110 : vector<2x32xf32>
      %112 = arith.negf %111 : vector<2x32xf32>
      %113 = math.exp %112 : vector<2x32xf32>
      %cst_94 = arith.constant 1.000000e+00 : f32
      %114 = vector.broadcast %cst_94 : f32 to vector<2x32xf32>
      %115 = arith.addf %114, %113 : vector<2x32xf32>
      %116 = arith.divf %114, %115 : vector<2x32xf32>
      %cst_95 = arith.constant dense<0.000000e+00> : vector<2x32xf32>
      %117 = tpu.matmul %107, %16, %cst_95 {dimension_numbers = #tpu.dot_dimension_numbers<[1], [0], [0], [1], [0, 0, 1, 1], [], []>} : vector<2x32xbf16>, vector<32x32xbf16>, vector<2x32xf32> -> vector<2x32xf32>
      %118 = arith.addf %103, %117 : vector<2x32xf32>
      %119 = vector.broadcast %28 : vector<1x32xf32> to vector<2x32xf32>
      %120 = arith.addf %118, %119 : vector<2x32xf32>
      %121 = arith.negf %120 : vector<2x32xf32>
      %122 = math.exp %121 : vector<2x32xf32>
      %cst_96 = arith.constant 1.000000e+00 : f32
      %123 = vector.broadcast %cst_96 : f32 to vector<2x32xf32>
      %124 = arith.addf %123, %122 : vector<2x32xf32>
      %125 = arith.divf %123, %124 : vector<2x32xf32>
      %cst_97 = arith.constant dense<0.000000e+00> : vector<2x32xf32>
      %126 = tpu.matmul %107, %18, %cst_97 {dimension_numbers = #tpu.dot_dimension_numbers<[1], [0], [0], [1], [0, 0, 1, 1], [], []>} : vector<2x32xbf16>, vector<32x32xbf16>, vector<2x32xf32> -> vector<2x32xf32>
      %127 = vector.broadcast %30 : vector<1x32xf32> to vector<2x32xf32>
      %128 = arith.addf %126, %127 : vector<2x32xf32>
      %129 = arith.mulf %116, %128 : vector<2x32xf32>
      %130 = arith.addf %106, %129 : vector<2x32xf32>
      %131 = math.tanh %130 : vector<2x32xf32>
      %132 = arith.subf %arg13, %131 : vector<2x32xf32>
      %133 = arith.mulf %125, %132 : vector<2x32xf32>
      %134 = arith.addf %131, %133 : vector<2x32xf32>
      %135 = arith.subf %134, %arg13 : vector<2x32xf32>
      %136 = vector.broadcast %97 : vector<2x1xf32> to vector<2x32xf32>
      %137 = arith.mulf %136, %135 : vector<2x32xf32>
      %138 = arith.addf %arg13, %137 : vector<2x32xf32>
      %139 = vector.broadcast %97 : vector<2x1xf32> to vector<2x32xf32>
      %140 = arith.mulf %139, %138 : vector<2x32xf32>
      %141 = arith.index_cast %92 : i32 to index
      %c0_98 = arith.constant 0 : index
      %c0_99 = arith.constant 0 : index
      %142 = vector.load %arg7[%141, %c0_98, %c0_99] : memref<5x2x32xf32, #tpu.memory_space<vmem>>, vector<1x2x32xf32>
      %143 = vector.shape_cast %142 : vector<1x2x32xf32> to vector<2x32xf32>
      %144 = vector.shape_cast %140 : vector<2x32xf32> to vector<1x2x32xf32>
      tpu.vector_store %arg7[%141, %c0_98, %c0_99], %144 {strides = array<i32>} : memref<5x2x32xf32, #tpu.memory_space<vmem>>, vector<1x2x32xf32>,
      scf.yield %85, %138 : vector<2x32xf32>, vector<2x32xf32>
    }
    %c5_i32_56 = arith.constant 5 : i32
    %c0_57 = arith.constant 0 : index
    %c0_58 = arith.constant 0 : index
    %35 = vector.load %arg9[%c0_57, %c0_58] : memref<2x32xf32, #tpu.memory_space<vmem>>, vector<2x32xf32>
    tpu.vector_store %arg9[%c0_57, %c0_58], %34#0 {strides = array<i32>} : memref<2x32xf32, #tpu.memory_space<vmem>>, vector<2x32xf32>,
    %c0_59 = arith.constant 0 : index
    %c0_60 = arith.constant 0 : index
    %36 = vector.load %arg10[%c0_59, %c0_60] : memref<2x32xf32, #tpu.memory_space<vmem>>, vector<2x32xf32>
    tpu.vector_store %arg10[%c0_59, %c0_60], %34#1 {strides = array<i32>} : memref<2x32xf32, #tpu.memory_space<vmem>>, vector<2x32xf32>,
    %c1_i32_61 = arith.constant 1 : i32
    %37 = arith.cmpi eq, %arg0, %c1_i32_61 : i32
    %38 = arith.extui %37 : i1 to i32
    %c0_i32_62 = arith.constant 0 : i32
    %39 = arith.cmpi ne, %38, %c0_i32_62 : i32
    scf.if %39 {
      %c0_63 = arith.constant 0 : index
      %c0_64 = arith.constant 0 : index
      %40 = vector.load %arg9[%c0_63, %c0_64] : memref<2x32xf32, #tpu.memory_space<vmem>>, vector<2x32xf32>
      %c0_65 = arith.constant 0 : index
      %c0_66 = arith.constant 0 : index
      %c0_67 = arith.constant 0 : index
      %41 = vector.load %arg8[%c0_65, %c0_66, %c0_67] : memref<2x2x32xf32, #tpu.memory_space<vmem>>, vector<1x2x32xf32>
      %42 = vector.shape_cast %41 : vector<1x2x32xf32> to vector<2x32xf32>
      %43 = vector.shape_cast %40 : vector<2x32xf32> to vector<1x2x32xf32>
      tpu.vector_store %arg8[%c0_65, %c0_66, %c0_67], %43 {strides = array<i32>} : memref<2x2x32xf32, #tpu.memory_space<vmem>>, vector<1x2x32xf32>,
      %c0_68 = arith.constant 0 : index
      %c0_69 = arith.constant 0 : index
      %44 = vector.load %arg10[%c0_68, %c0_69] : memref<2x32xf32, #tpu.memory_space<vmem>>, vector<2x32xf32>
      %c1_70 = arith.constant 1 : index
      %c0_71 = arith.constant 0 : index
      %c0_72 = arith.constant 0 : index
      %45 = vector.load %arg8[%c1_70, %c0_71, %c0_72] : memref<2x2x32xf32, #tpu.memory_space<vmem>>, vector<1x2x32xf32>
      %46 = vector.shape_cast %45 : vector<1x2x32xf32> to vector<2x32xf32>
      %47 = vector.shape_cast %44 : vector<2x32xf32> to vector<1x2x32xf32>
      tpu.vector_store %arg8[%c1_70, %c0_71, %c0_72], %47 {strides = array<i32>} : memref<2x2x32xf32, #tpu.memory_space<vmem>>, vector<1x2x32xf32>,
    } else {
    }
    return
  }
  func.func @transform_0(%arg0: i32) -> (i32, i32) {
    %c0_i32 = arith.constant 0 : i32
    %c0_i32_0 = arith.constant 0 : i32
    %c0_i32_1 = arith.constant 0 : i32
    return %c0_i32, %c0_i32_0 : i32, i32
  }
  func.func @transform_1(%arg0: i32) -> (i32, i32, i32, i32, i32) {
    %c0_i32 = arith.constant 0 : i32
    %c0_i32_0 = arith.constant 0 : i32
    %c0_i32_1 = arith.constant 0 : i32
    %c0_i32_2 = arith.constant 0 : i32
    %c0_i32_3 = arith.constant 0 : i32
    return %c0_i32, %c0_i32_0, %arg0, %c0_i32_1, %c0_i32_2 : i32, i32, i32, i32, i32
  }
  func.func @transform_2(%arg0: i32) -> (i32, i32, i32, i32, i32) {
    %c1_i32 = arith.constant 1 : i32
    %0 = arith.subi %c1_i32, %arg0 : i32
    %c1_i32_0 = arith.constant 1 : i32
    %c0_i32 = arith.constant 0 : i32
    %c0_i32_1 = arith.constant 0 : i32
    %c0_i32_2 = arith.constant 0 : i32
    %c0_i32_3 = arith.constant 0 : i32
    return %c1_i32_0, %c0_i32, %0, %c0_i32_1, %c0_i32_2 : i32, i32, i32, i32, i32
  }
  func.func @transform_3(%arg0: i32) -> (i32, i32, i32, i32) {
    %c0_i32 = arith.constant 0 : i32
    %c0_i32_0 = arith.constant 0 : i32
    %c0_i32_1 = arith.constant 0 : i32
    %c0_i32_2 = arith.constant 0 : i32
    %c0_i32_3 = arith.constant 0 : i32
    return %c0_i32, %c0_i32_0, %c0_i32_1, %c0_i32_2 : i32, i32, i32, i32
  }
  func.func @transform_4(%arg0: i32) -> (i32, i32, i32, i32) {
    %c0_i32 = arith.constant 0 : i32
    %c0_i32_0 = arith.constant 0 : i32
    %c0_i32_1 = arith.constant 0 : i32
    %c0_i32_2 = arith.constant 0 : i32
    %c0_i32_3 = arith.constant 0 : i32
    return %c0_i32, %c0_i32_0, %c0_i32_1, %c0_i32_2 : i32, i32, i32, i32
  }
  func.func @transform_5(%arg0: i32) -> (i32, i32, i32) {
    %c0_i32 = arith.constant 0 : i32
    %c0_i32_0 = arith.constant 0 : i32
    %c0_i32_1 = arith.constant 0 : i32
    return %arg0, %c0_i32, %c0_i32_0 : i32, i32, i32
  }
  func.func @transform_6(%arg0: i32) -> (i32, i32, i32) {
    %c1_i32 = arith.constant 1 : i32
    %0 = arith.subi %c1_i32, %arg0 : i32
    %c0_i32 = arith.constant 0 : i32
    %c0_i32_0 = arith.constant 0 : i32
    %c0_i32_1 = arith.constant 0 : i32
    return %0, %c0_i32, %c0_i32_0 : i32, i32, i32
  }
  func.func @transform_7(%arg0: i32) -> (i32, i32, i32) {
    %c0_i32 = arith.constant 0 : i32
    %c0_i32_0 = arith.constant 0 : i32
    %c0_i32_1 = arith.constant 0 : i32
    %c0_i32_2 = arith.constant 0 : i32
    return %c0_i32, %c0_i32_0, %c0_i32_1 : i32, i32, i32
  }
}

module attributes {stable_mosaic.version = 11 : i64} {
  func.func @dec_gru_kernel(%arg0: i32, %arg1: memref<3x7x2x32xf32, #tpu.memory_space<vmem>>, %arg2: memref<2x32xf32, #tpu.memory_space<vmem>>, %arg3: memref<3x32x32xbf16, #tpu.memory_space<vmem>>, %arg4: memref<3x1x32xf32, #tpu.memory_space<vmem>>, %arg5: memref<7x2x32xf32, #tpu.memory_space<vmem>>, %arg6: memref<2x32xf32, #tpu.memory_space<vmem>>) attributes {dimension_semantics = [#tpu.dimension_semantics<arbitrary>], iteration_bounds = array<i64: 1>, scalar_prefetch = 0 : i64, scratch_operands = 1 : i64, tpu.core_type = #tpu.core_type<tc>, window_params = [{transform_indices = @transform_0, window_bounds = array<i64: 3, 7, 2, 32>}, {pipeline_mode = #tpu.pipeline_mode<synchronous>, transform_indices = @transform_1, window_bounds = array<i64: 2, 32>}, {pipeline_mode = #tpu.pipeline_mode<synchronous>, transform_indices = @transform_2, window_bounds = array<i64: 3, 32, 32>}, {pipeline_mode = #tpu.pipeline_mode<synchronous>, transform_indices = @transform_3, window_bounds = array<i64: 3, 1, 32>}, {transform_indices = @transform_4, window_bounds = array<i64: 7, 2, 32>}]} {
    %c0_i32 = arith.constant 0 : i32
    %0 = arith.cmpi eq, %arg0, %c0_i32 : i32
    %1 = arith.extui %0 : i1 to i32
    %c0_i32_0 = arith.constant 0 : i32
    %2 = arith.cmpi ne, %1, %c0_i32_0 : i32
    scf.if %2 {
      %c0_22 = arith.constant 0 : index
      %c0_23 = arith.constant 0 : index
      %19 = vector.load %arg2[%c0_22, %c0_23] : memref<2x32xf32, #tpu.memory_space<vmem>>, vector<2x32xf32>
      %c0_24 = arith.constant 0 : index
      %c0_25 = arith.constant 0 : index
      %20 = vector.load %arg6[%c0_24, %c0_25] : memref<2x32xf32, #tpu.memory_space<vmem>>, vector<2x32xf32>
      tpu.vector_store %arg6[%c0_24, %c0_25], %19 {strides = array<i32>} : memref<2x32xf32, #tpu.memory_space<vmem>>, vector<2x32xf32>,
    } else {
    }
    %c0 = arith.constant 0 : index
    %c0_1 = arith.constant 0 : index
    %c0_2 = arith.constant 0 : index
    %3 = vector.load %arg3[%c0, %c0_1, %c0_2] : memref<3x32x32xbf16, #tpu.memory_space<vmem>>, vector<1x32x32xbf16>
    %4 = vector.shape_cast %3 : vector<1x32x32xbf16> to vector<32x32xbf16>
    %c1 = arith.constant 1 : index
    %c0_3 = arith.constant 0 : index
    %c0_4 = arith.constant 0 : index
    %5 = vector.load %arg3[%c1, %c0_3, %c0_4] : memref<3x32x32xbf16, #tpu.memory_space<vmem>>, vector<1x32x32xbf16>
    %6 = vector.shape_cast %5 : vector<1x32x32xbf16> to vector<32x32xbf16>
    %c2 = arith.constant 2 : index
    %c0_5 = arith.constant 0 : index
    %c0_6 = arith.constant 0 : index
    %7 = vector.load %arg3[%c2, %c0_5, %c0_6] : memref<3x32x32xbf16, #tpu.memory_space<vmem>>, vector<1x32x32xbf16>
    %8 = vector.shape_cast %7 : vector<1x32x32xbf16> to vector<32x32xbf16>
    %c0_7 = arith.constant 0 : index
    %c0_8 = arith.constant 0 : index
    %c0_9 = arith.constant 0 : index
    %9 = vector.load %arg4[%c0_7, %c0_8, %c0_9] : memref<3x1x32xf32, #tpu.memory_space<vmem>>, vector<1x1x32xf32>
    %10 = vector.shape_cast %9 : vector<1x1x32xf32> to vector<1x32xf32>
    %c1_10 = arith.constant 1 : index
    %c0_11 = arith.constant 0 : index
    %c0_12 = arith.constant 0 : index
    %11 = vector.load %arg4[%c1_10, %c0_11, %c0_12] : memref<3x1x32xf32, #tpu.memory_space<vmem>>, vector<1x1x32xf32>
    %12 = vector.shape_cast %11 : vector<1x1x32xf32> to vector<1x32xf32>
    %c2_13 = arith.constant 2 : index
    %c0_14 = arith.constant 0 : index
    %c0_15 = arith.constant 0 : index
    %13 = vector.load %arg4[%c2_13, %c0_14, %c0_15] : memref<3x1x32xf32, #tpu.memory_space<vmem>>, vector<1x1x32xf32>
    %14 = vector.shape_cast %13 : vector<1x1x32xf32> to vector<1x32xf32>
    %c0_16 = arith.constant 0 : index
    %c0_17 = arith.constant 0 : index
    %15 = vector.load %arg6[%c0_16, %c0_17] : memref<2x32xf32, #tpu.memory_space<vmem>>, vector<2x32xf32>
    %c0_i32_18 = arith.constant 0 : i32
    %c7_i32 = arith.constant 7 : i32
    %16 = arith.addi %c0_i32_18, %c7_i32 : i32
    %c1_i32 = arith.constant 1 : i32
    %17 = scf.for %arg7 = %c0_i32_18 to %16 step %c1_i32 iter_args(%arg8 = %15) -> (vector<2x32xf32>)  : i32 {
      %c0_22 = arith.constant 0 : index
      %19 = arith.index_cast %arg7 : i32 to index
      %c0_23 = arith.constant 0 : index
      %c0_24 = arith.constant 0 : index
      %20 = vector.load %arg1[%c0_22, %19, %c0_23, %c0_24] : memref<3x7x2x32xf32, #tpu.memory_space<vmem>>, vector<1x1x2x32xf32>
      %21 = vector.shape_cast %20 : vector<1x1x2x32xf32> to vector<2x32xf32>
      %c1_25 = arith.constant 1 : index
      %22 = arith.index_cast %arg7 : i32 to index
      %c0_26 = arith.constant 0 : index
      %c0_27 = arith.constant 0 : index
      %23 = vector.load %arg1[%c1_25, %22, %c0_26, %c0_27] : memref<3x7x2x32xf32, #tpu.memory_space<vmem>>, vector<1x1x2x32xf32>
      %24 = vector.shape_cast %23 : vector<1x1x2x32xf32> to vector<2x32xf32>
      %c2_28 = arith.constant 2 : index
      %25 = arith.index_cast %arg7 : i32 to index
      %c0_29 = arith.constant 0 : index
      %c0_30 = arith.constant 0 : index
      %26 = vector.load %arg1[%c2_28, %25, %c0_29, %c0_30] : memref<3x7x2x32xf32, #tpu.memory_space<vmem>>, vector<1x1x2x32xf32>
      %27 = vector.shape_cast %26 : vector<1x1x2x32xf32> to vector<2x32xf32>
      %28 = arith.truncf %arg8 : vector<2x32xf32> to vector<2x32xbf16>
      %cst = arith.constant dense<0.000000e+00> : vector<2x32xf32>
      %29 = tpu.matmul %28, %4, %cst {dimension_numbers = #tpu.dot_dimension_numbers<[1], [0], [0], [1], [0, 0, 1, 1], [], []>} : vector<2x32xbf16>, vector<32x32xbf16>, vector<2x32xf32> -> vector<2x32xf32>
      %30 = arith.addf %21, %29 : vector<2x32xf32>
      %31 = vector.broadcast %10 : vector<1x32xf32> to vector<2x32xf32>
      %32 = arith.addf %30, %31 : vector<2x32xf32>
      %33 = arith.negf %32 : vector<2x32xf32>
      %34 = math.exp %33 : vector<2x32xf32>
      %cst_31 = arith.constant 1.000000e+00 : f32
      %35 = vector.broadcast %cst_31 : f32 to vector<2x32xf32>
      %36 = arith.addf %35, %34 : vector<2x32xf32>
      %37 = arith.divf %35, %36 : vector<2x32xf32>
      %cst_32 = arith.constant dense<0.000000e+00> : vector<2x32xf32>
      %38 = tpu.matmul %28, %6, %cst_32 {dimension_numbers = #tpu.dot_dimension_numbers<[1], [0], [0], [1], [0, 0, 1, 1], [], []>} : vector<2x32xbf16>, vector<32x32xbf16>, vector<2x32xf32> -> vector<2x32xf32>
      %39 = arith.addf %24, %38 : vector<2x32xf32>
      %40 = vector.broadcast %12 : vector<1x32xf32> to vector<2x32xf32>
      %41 = arith.addf %39, %40 : vector<2x32xf32>
      %42 = arith.negf %41 : vector<2x32xf32>
      %43 = math.exp %42 : vector<2x32xf32>
      %cst_33 = arith.constant 1.000000e+00 : f32
      %44 = vector.broadcast %cst_33 : f32 to vector<2x32xf32>
      %45 = arith.addf %44, %43 : vector<2x32xf32>
      %46 = arith.divf %44, %45 : vector<2x32xf32>
      %cst_34 = arith.constant dense<0.000000e+00> : vector<2x32xf32>
      %47 = tpu.matmul %28, %8, %cst_34 {dimension_numbers = #tpu.dot_dimension_numbers<[1], [0], [0], [1], [0, 0, 1, 1], [], []>} : vector<2x32xbf16>, vector<32x32xbf16>, vector<2x32xf32> -> vector<2x32xf32>
      %48 = vector.broadcast %14 : vector<1x32xf32> to vector<2x32xf32>
      %49 = arith.addf %47, %48 : vector<2x32xf32>
      %50 = arith.mulf %37, %49 : vector<2x32xf32>
      %51 = arith.addf %27, %50 : vector<2x32xf32>
      %52 = math.tanh %51 : vector<2x32xf32>
      %53 = arith.subf %arg8, %52 : vector<2x32xf32>
      %54 = arith.mulf %46, %53 : vector<2x32xf32>
      %55 = arith.addf %52, %54 : vector<2x32xf32>
      %56 = arith.index_cast %arg7 : i32 to index
      %c0_35 = arith.constant 0 : index
      %c0_36 = arith.constant 0 : index
      %57 = vector.load %arg5[%56, %c0_35, %c0_36] : memref<7x2x32xf32, #tpu.memory_space<vmem>>, vector<1x2x32xf32>
      %58 = vector.shape_cast %57 : vector<1x2x32xf32> to vector<2x32xf32>
      %59 = vector.shape_cast %55 : vector<2x32xf32> to vector<1x2x32xf32>
      tpu.vector_store %arg5[%56, %c0_35, %c0_36], %59 {strides = array<i32>} : memref<7x2x32xf32, #tpu.memory_space<vmem>>, vector<1x2x32xf32>,
      scf.yield %55 : vector<2x32xf32>
    }
    %c7_i32_19 = arith.constant 7 : i32
    %c0_20 = arith.constant 0 : index
    %c0_21 = arith.constant 0 : index
    %18 = vector.load %arg6[%c0_20, %c0_21] : memref<2x32xf32, #tpu.memory_space<vmem>>, vector<2x32xf32>
    tpu.vector_store %arg6[%c0_20, %c0_21], %17 {strides = array<i32>} : memref<2x32xf32, #tpu.memory_space<vmem>>, vector<2x32xf32>,
    return
  }
  func.func @transform_0(%arg0: i32) -> (i32, i32, i32, i32) {
    %c0_i32 = arith.constant 0 : i32
    %c0_i32_0 = arith.constant 0 : i32
    %c0_i32_1 = arith.constant 0 : i32
    %c0_i32_2 = arith.constant 0 : i32
    return %c0_i32, %arg0, %c0_i32_0, %c0_i32_1 : i32, i32, i32, i32
  }
  func.func @transform_1(%arg0: i32) -> (i32, i32) {
    %c0_i32 = arith.constant 0 : i32
    %c0_i32_0 = arith.constant 0 : i32
    %c0_i32_1 = arith.constant 0 : i32
    return %c0_i32, %c0_i32_0 : i32, i32
  }
  func.func @transform_2(%arg0: i32) -> (i32, i32, i32) {
    %c0_i32 = arith.constant 0 : i32
    %c0_i32_0 = arith.constant 0 : i32
    %c0_i32_1 = arith.constant 0 : i32
    %c0_i32_2 = arith.constant 0 : i32
    return %c0_i32, %c0_i32_0, %c0_i32_1 : i32, i32, i32
  }
  func.func @transform_3(%arg0: i32) -> (i32, i32, i32) {
    %c0_i32 = arith.constant 0 : i32
    %c0_i32_0 = arith.constant 0 : i32
    %c0_i32_1 = arith.constant 0 : i32
    %c0_i32_2 = arith.constant 0 : i32
    return %c0_i32, %c0_i32_0, %c0_i32_1 : i32, i32, i32
  }
  func.func @transform_4(%arg0: i32) -> (i32, i32, i32) {
    %c0_i32 = arith.constant 0 : i32
    %c0_i32_0 = arith.constant 0 : i32
    %c0_i32_1 = arith.constant 0 : i32
    return %arg0, %c0_i32, %c0_i32_0 : i32, i32, i32
  }
}

module attributes {stable_mosaic.version = 11 : i64} {
  func.func @gate_linear_kernel(%arg0: i32, %arg1: i32, %arg2: memref<14x16xbf16, #tpu.memory_space<vmem>>, %arg3: memref<1x16x32xbf16, #tpu.memory_space<vmem>>, %arg4: memref<1x1x32xf32, #tpu.memory_space<vmem>>, %arg5: memref<1x14x32xf32, #tpu.memory_space<vmem>>) attributes {dimension_semantics = [#tpu.dimension_semantics<parallel>, #tpu.dimension_semantics<parallel>], iteration_bounds = array<i64: 1, 3>, scalar_prefetch = 0 : i64, scratch_operands = 0 : i64, tpu.core_type = #tpu.core_type<tc>, window_params = [{transform_indices = @transform_0, window_bounds = array<i64: 14, 16>}, {transform_indices = @transform_1, window_bounds = array<i64: 1, 16, 32>}, {transform_indices = @transform_2, window_bounds = array<i64: 1, 1, 32>}, {transform_indices = @transform_3, window_bounds = array<i64: 1, 14, 32>}]} {
    %c0 = arith.constant 0 : index
    %c0_0 = arith.constant 0 : index
    %0 = vector.load %arg2[%c0, %c0_0] : memref<14x16xbf16, #tpu.memory_space<vmem>>, vector<14x16xbf16>
    %c0_1 = arith.constant 0 : index
    %c0_2 = arith.constant 0 : index
    %c0_3 = arith.constant 0 : index
    %1 = vector.load %arg3[%c0_1, %c0_2, %c0_3] : memref<1x16x32xbf16, #tpu.memory_space<vmem>>, vector<1x16x32xbf16>
    %2 = vector.shape_cast %1 : vector<1x16x32xbf16> to vector<16x32xbf16>
    %cst = arith.constant dense<0.000000e+00> : vector<14x32xf32>
    %3 = tpu.matmul %0, %2, %cst {dimension_numbers = #tpu.dot_dimension_numbers<[1], [0], [0], [1], [0, 0, 1, 1], [], []>} : vector<14x16xbf16>, vector<16x32xbf16>, vector<14x32xf32> -> vector<14x32xf32>
    %c0_4 = arith.constant 0 : index
    %c0_5 = arith.constant 0 : index
    %c0_6 = arith.constant 0 : index
    %4 = vector.load %arg4[%c0_4, %c0_5, %c0_6] : memref<1x1x32xf32, #tpu.memory_space<vmem>>, vector<1x1x32xf32>
    %5 = vector.shape_cast %4 : vector<1x1x32xf32> to vector<1x32xf32>
    %6 = vector.broadcast %5 : vector<1x32xf32> to vector<14x32xf32>
    %7 = arith.addf %3, %6 : vector<14x32xf32>
    %c0_7 = arith.constant 0 : index
    %c0_8 = arith.constant 0 : index
    %c0_9 = arith.constant 0 : index
    %8 = vector.load %arg5[%c0_7, %c0_8, %c0_9] : memref<1x14x32xf32, #tpu.memory_space<vmem>>, vector<1x14x32xf32>
    %9 = vector.shape_cast %8 : vector<1x14x32xf32> to vector<14x32xf32>
    %10 = vector.shape_cast %7 : vector<14x32xf32> to vector<1x14x32xf32>
    tpu.vector_store %arg5[%c0_7, %c0_8, %c0_9], %10 {strides = array<i32>} : memref<1x14x32xf32, #tpu.memory_space<vmem>>, vector<1x14x32xf32>,
    return
  }
  func.func @transform_0(%arg0: i32, %arg1: i32) -> (i32, i32) {
    %c0_i32 = arith.constant 0 : i32
    %c0_i32_0 = arith.constant 0 : i32
    return %arg0, %c0_i32 : i32, i32
  }
  func.func @transform_1(%arg0: i32, %arg1: i32) -> (i32, i32, i32) {
    %c0_i32 = arith.constant 0 : i32
    %c0_i32_0 = arith.constant 0 : i32
    %c0_i32_1 = arith.constant 0 : i32
    return %arg1, %c0_i32, %c0_i32_0 : i32, i32, i32
  }
  func.func @transform_2(%arg0: i32, %arg1: i32) -> (i32, i32, i32) {
    %c0_i32 = arith.constant 0 : i32
    %c0_i32_0 = arith.constant 0 : i32
    %c0_i32_1 = arith.constant 0 : i32
    return %arg1, %c0_i32, %c0_i32_0 : i32, i32, i32
  }
  func.func @transform_3(%arg0: i32, %arg1: i32) -> (i32, i32, i32) {
    %c0_i32 = arith.constant 0 : i32
    %c0_i32_0 = arith.constant 0 : i32
    return %arg1, %arg0, %c0_i32 : i32, i32, i32
  }
}

module attributes {stable_mosaic.version = 11 : i64} {
  func.func @dual_linear_tanh_kernel(%arg0: i32, %arg1: memref<20x32xf32, #tpu.memory_space<vmem>>, %arg2: memref<20x32xf32, #tpu.memory_space<vmem>>, %arg3: memref<32x32xbf16, #tpu.memory_space<vmem>>, %arg4: memref<32x32xbf16, #tpu.memory_space<vmem>>, %arg5: memref<1x32xf32, #tpu.memory_space<vmem>>, %arg6: memref<20x32xf32, #tpu.memory_space<vmem>>) attributes {dimension_semantics = [#tpu.dimension_semantics<parallel>], iteration_bounds = array<i64: 1>, scalar_prefetch = 0 : i64, scratch_operands = 0 : i64, tpu.core_type = #tpu.core_type<tc>, window_params = [{transform_indices = @transform_0, window_bounds = array<i64: 20, 32>}, {transform_indices = @transform_1, window_bounds = array<i64: 20, 32>}, {pipeline_mode = #tpu.pipeline_mode<synchronous>, transform_indices = @transform_2, window_bounds = array<i64: 32, 32>}, {pipeline_mode = #tpu.pipeline_mode<synchronous>, transform_indices = @transform_3, window_bounds = array<i64: 32, 32>}, {pipeline_mode = #tpu.pipeline_mode<synchronous>, transform_indices = @transform_4, window_bounds = array<i64: 1, 32>}, {transform_indices = @transform_5, window_bounds = array<i64: 20, 32>}]} {
    %c0 = arith.constant 0 : index
    %c0_0 = arith.constant 0 : index
    %0 = vector.load %arg1[%c0, %c0_0] : memref<20x32xf32, #tpu.memory_space<vmem>>, vector<20x32xf32>
    %1 = arith.truncf %0 : vector<20x32xf32> to vector<20x32xbf16>
    %c0_1 = arith.constant 0 : index
    %c0_2 = arith.constant 0 : index
    %2 = vector.load %arg3[%c0_1, %c0_2] : memref<32x32xbf16, #tpu.memory_space<vmem>>, vector<32x32xbf16>
    %cst = arith.constant dense<0.000000e+00> : vector<20x32xf32>
    %3 = tpu.matmul %1, %2, %cst {dimension_numbers = #tpu.dot_dimension_numbers<[1], [0], [0], [1], [0, 0, 1, 1], [], []>} : vector<20x32xbf16>, vector<32x32xbf16>, vector<20x32xf32> -> vector<20x32xf32>
    %c0_3 = arith.constant 0 : index
    %c0_4 = arith.constant 0 : index
    %4 = vector.load %arg2[%c0_3, %c0_4] : memref<20x32xf32, #tpu.memory_space<vmem>>, vector<20x32xf32>
    %5 = arith.truncf %4 : vector<20x32xf32> to vector<20x32xbf16>
    %c0_5 = arith.constant 0 : index
    %c0_6 = arith.constant 0 : index
    %6 = vector.load %arg4[%c0_5, %c0_6] : memref<32x32xbf16, #tpu.memory_space<vmem>>, vector<32x32xbf16>
    %cst_7 = arith.constant dense<0.000000e+00> : vector<20x32xf32>
    %7 = tpu.matmul %5, %6, %cst_7 {dimension_numbers = #tpu.dot_dimension_numbers<[1], [0], [0], [1], [0, 0, 1, 1], [], []>} : vector<20x32xbf16>, vector<32x32xbf16>, vector<20x32xf32> -> vector<20x32xf32>
    %8 = arith.addf %3, %7 : vector<20x32xf32>
    %c0_8 = arith.constant 0 : index
    %c0_9 = arith.constant 0 : index
    %9 = vector.load %arg5[%c0_8, %c0_9] : memref<1x32xf32, #tpu.memory_space<vmem>>, vector<1x32xf32>
    %10 = vector.broadcast %9 : vector<1x32xf32> to vector<20x32xf32>
    %11 = arith.addf %8, %10 : vector<20x32xf32>
    %12 = math.tanh %11 : vector<20x32xf32>
    %c0_10 = arith.constant 0 : index
    %c0_11 = arith.constant 0 : index
    %13 = vector.load %arg6[%c0_10, %c0_11] : memref<20x32xf32, #tpu.memory_space<vmem>>, vector<20x32xf32>
    tpu.vector_store %arg6[%c0_10, %c0_11], %12 {strides = array<i32>} : memref<20x32xf32, #tpu.memory_space<vmem>>, vector<20x32xf32>,
    return
  }
  func.func @transform_0(%arg0: i32) -> (i32, i32) {
    %c0_i32 = arith.constant 0 : i32
    %c0_i32_0 = arith.constant 0 : i32
    return %arg0, %c0_i32 : i32, i32
  }
  func.func @transform_1(%arg0: i32) -> (i32, i32) {
    %c0_i32 = arith.constant 0 : i32
    %c0_i32_0 = arith.constant 0 : i32
    return %arg0, %c0_i32 : i32, i32
  }
  func.func @transform_2(%arg0: i32) -> (i32, i32) {
    %c0_i32 = arith.constant 0 : i32
    %c0_i32_0 = arith.constant 0 : i32
    %c0_i32_1 = arith.constant 0 : i32
    return %c0_i32, %c0_i32_0 : i32, i32
  }
  func.func @transform_3(%arg0: i32) -> (i32, i32) {
    %c0_i32 = arith.constant 0 : i32
    %c0_i32_0 = arith.constant 0 : i32
    %c0_i32_1 = arith.constant 0 : i32
    return %c0_i32, %c0_i32_0 : i32, i32
  }
  func.func @transform_4(%arg0: i32) -> (i32, i32) {
    %c0_i32 = arith.constant 0 : i32
    %c0_i32_0 = arith.constant 0 : i32
    %c0_i32_1 = arith.constant 0 : i32
    return %c0_i32, %c0_i32_0 : i32, i32
  }
  func.func @transform_5(%arg0: i32) -> (i32, i32) {
    %c0_i32 = arith.constant 0 : i32
    %c0_i32_0 = arith.constant 0 : i32
    return %arg0, %c0_i32 : i32, i32
  }
}

module attributes {stable_mosaic.version = 11 : i64} {
  func.func @attn_kernel(%arg0: i32, %arg1: memref<1x7x32xf32, #tpu.memory_space<vmem>>, %arg2: memref<1x10x32xf32, #tpu.memory_space<vmem>>, %arg3: memref<1x1x10xf32, #tpu.memory_space<vmem>>, %arg4: memref<1x7x32xf32, #tpu.memory_space<vmem>>) attributes {dimension_semantics = [#tpu.dimension_semantics<parallel>], iteration_bounds = array<i64: 2>, scalar_prefetch = 0 : i64, scratch_operands = 0 : i64, tpu.core_type = #tpu.core_type<tc>, window_params = [{transform_indices = @transform_0, window_bounds = array<i64: 1, 7, 32>}, {transform_indices = @transform_1, window_bounds = array<i64: 1, 10, 32>}, {transform_indices = @transform_2, window_bounds = array<i64: 1, 1, 10>}, {transform_indices = @transform_3, window_bounds = array<i64: 1, 7, 32>}]} {
    %c0 = arith.constant 0 : index
    %c0_0 = arith.constant 0 : index
    %c0_1 = arith.constant 0 : index
    %0 = vector.load %arg1[%c0, %c0_0, %c0_1] : memref<1x7x32xf32, #tpu.memory_space<vmem>>, vector<1x7x32xf32>
    %1 = vector.shape_cast %0 : vector<1x7x32xf32> to vector<7x32xf32>
    %c0_2 = arith.constant 0 : index
    %c0_3 = arith.constant 0 : index
    %c0_4 = arith.constant 0 : index
    %2 = vector.load %arg2[%c0_2, %c0_3, %c0_4] : memref<1x10x32xf32, #tpu.memory_space<vmem>>, vector<1x10x32xf32>
    %3 = vector.shape_cast %2 : vector<1x10x32xf32> to vector<10x32xf32>
    %c0_5 = arith.constant 0 : index
    %c0_6 = arith.constant 0 : index
    %c0_7 = arith.constant 0 : index
    %4 = vector.load %arg3[%c0_5, %c0_6, %c0_7] : memref<1x1x10xf32, #tpu.memory_space<vmem>>, vector<1x1x10xf32>
    %5 = vector.shape_cast %4 : vector<1x1x10xf32> to vector<1x10xf32>
    %cst = arith.constant dense<0.000000e+00> : vector<7x10xf32>
    %6 = tpu.matmul %1, %3, %cst {dimension_numbers = #tpu.dot_dimension_numbers<[1], [1], [0], [0], [0, 0, 1, 0], [], []>} : vector<7x32xf32>, vector<10x32xf32>, vector<7x10xf32> -> vector<7x10xf32>
    %7 = vector.shape_cast %5 : vector<1x10xf32> to vector<1x10xf32>
    %8 = vector.broadcast %7 : vector<1x10xf32> to vector<7x10xf32>
    %cst_8 = arith.constant 5.000000e-01 : f32
    %9 = vector.broadcast %cst_8 : f32 to vector<7x10xf32>
    %10 = arith.cmpf ogt, %8, %9 : vector<7x10xf32>
    %cst_9 = arith.constant -1.000000e+30 : f32
    %11 = vector.broadcast %cst_9 : f32 to vector<7x10xf32>
    %12 = arith.select %10, %11, %6 : vector<7x10xi1>, vector<7x10xf32>
    %cst_10 = arith.constant dense<0xFF800000> : vector<7xf32>
    %13 = vector.multi_reduction <maximumf>, %12, %cst_10 [1] : vector<7x10xf32> to vector<7xf32>
    %14 = vector.shape_cast %13 : vector<7xf32> to vector<7x1xf32>
    %15 = vector.broadcast %14 : vector<7x1xf32> to vector<7x10xf32>
    %16 = arith.subf %12, %15 : vector<7x10xf32>
    %17 = math.exp %16 : vector<7x10xf32>
    %cst_11 = arith.constant dense<0.000000e+00> : vector<7xf32>
    %18 = vector.multi_reduction <add>, %17, %cst_11 [1] : vector<7x10xf32> to vector<7xf32>
    %19 = vector.shape_cast %18 : vector<7xf32> to vector<7x1xf32>
    %20 = tpu.reciprocal %19 {approx = true} : vector<7x1xf32> -> vector<7x1xf32>
    %21 = vector.broadcast %20 : vector<7x1xf32> to vector<7x10xf32>
    %22 = arith.mulf %17, %21 : vector<7x10xf32>
    %cst_12 = arith.constant dense<0.000000e+00> : vector<7x32xf32>
    %23 = tpu.matmul %22, %3, %cst_12 {dimension_numbers = #tpu.dot_dimension_numbers<[1], [0], [0], [1], [0, 0, 1, 1], [], []>} : vector<7x10xf32>, vector<10x32xf32>, vector<7x32xf32> -> vector<7x32xf32>
    %c0_13 = arith.constant 0 : index
    %c0_14 = arith.constant 0 : index
    %c0_15 = arith.constant 0 : index
    %24 = vector.load %arg4[%c0_13, %c0_14, %c0_15] : memref<1x7x32xf32, #tpu.memory_space<vmem>>, vector<1x7x32xf32>
    %25 = vector.shape_cast %24 : vector<1x7x32xf32> to vector<7x32xf32>
    %26 = vector.shape_cast %23 : vector<7x32xf32> to vector<1x7x32xf32>
    tpu.vector_store %arg4[%c0_13, %c0_14, %c0_15], %26 {strides = array<i32>} : memref<1x7x32xf32, #tpu.memory_space<vmem>>, vector<1x7x32xf32>,
    return
  }
  func.func @transform_0(%arg0: i32) -> (i32, i32, i32) {
    %c0_i32 = arith.constant 0 : i32
    %c0_i32_0 = arith.constant 0 : i32
    %c0_i32_1 = arith.constant 0 : i32
    return %arg0, %c0_i32, %c0_i32_0 : i32, i32, i32
  }
  func.func @transform_1(%arg0: i32) -> (i32, i32, i32) {
    %c0_i32 = arith.constant 0 : i32
    %c0_i32_0 = arith.constant 0 : i32
    %c0_i32_1 = arith.constant 0 : i32
    return %arg0, %c0_i32, %c0_i32_0 : i32, i32, i32
  }
  func.func @transform_2(%arg0: i32) -> (i32, i32, i32) {
    %c0_i32 = arith.constant 0 : i32
    %c0_i32_0 = arith.constant 0 : i32
    %c0_i32_1 = arith.constant 0 : i32
    return %arg0, %c0_i32, %c0_i32_0 : i32, i32, i32
  }
  func.func @transform_3(%arg0: i32) -> (i32, i32, i32) {
    %c0_i32 = arith.constant 0 : i32
    %c0_i32_0 = arith.constant 0 : i32
    %c0_i32_1 = arith.constant 0 : i32
    return %arg0, %c0_i32, %c0_i32_0 : i32, i32, i32
  }
}

module attributes {stable_mosaic.version = 11 : i64} {
  func.func @kernel(%arg0: i32, %arg1: i32, %arg2: memref<14x32xf32, #tpu.memory_space<vmem>>, %arg3: memref<14x1xi32, #tpu.memory_space<vmem>>, %arg4: memref<32x128xbf16, #tpu.memory_space<vmem>>, %arg5: memref<1x128xf32, #tpu.memory_space<vmem>>, %arg6: memref<14x1xf32, #tpu.memory_space<vmem>>, %arg7: memref<14x1xf32, #tpu.memory_space<vmem>>, %arg8: memref<14x1xf32, #tpu.memory_space<vmem>>, %arg9: memref<14x1xf32, #tpu.memory_space<vmem>>) attributes {dimension_semantics = [#tpu.dimension_semantics<parallel>, #tpu.dimension_semantics<arbitrary>], iteration_bounds = array<i64: 1, 2>, scalar_prefetch = 0 : i64, scratch_operands = 3 : i64, tpu.core_type = #tpu.core_type<tc>, window_params = [{transform_indices = @transform_0, window_bounds = array<i64: 14, 32>}, {transform_indices = @transform_1, window_bounds = array<i64: 14, 1>}, {transform_indices = @transform_2, window_bounds = array<i64: 32, 128>}, {transform_indices = @transform_3, window_bounds = array<i64: 1, 128>}, {transform_indices = @transform_4, window_bounds = array<i64: 14, 1>}]} {
    %c0_i32 = arith.constant 0 : i32
    %0 = arith.cmpi eq, %arg1, %c0_i32 : i32
    %1 = arith.extui %0 : i1 to i32
    %c0_i32_0 = arith.constant 0 : i32
    %2 = arith.cmpi ne, %1, %c0_i32_0 : i32
    scf.if %2 {
      %cst_25 = arith.constant -1.000000e+30 : f32
      %46 = vector.broadcast %cst_25 : f32 to vector<14x1xf32>
      %c0_26 = arith.constant 0 : index
      %c0_27 = arith.constant 0 : index
      %47 = vector.load %arg7[%c0_26, %c0_27] : memref<14x1xf32, #tpu.memory_space<vmem>>, vector<14x1xf32>
      tpu.vector_store %arg7[%c0_26, %c0_27], %46 {strides = array<i32>} : memref<14x1xf32, #tpu.memory_space<vmem>>, vector<14x1xf32>,
      %cst_28 = arith.constant 0.000000e+00 : f32
      %48 = vector.broadcast %cst_28 : f32 to vector<14x1xf32>
      %c0_29 = arith.constant 0 : index
      %c0_30 = arith.constant 0 : index
      %49 = vector.load %arg8[%c0_29, %c0_30] : memref<14x1xf32, #tpu.memory_space<vmem>>, vector<14x1xf32>
      tpu.vector_store %arg8[%c0_29, %c0_30], %48 {strides = array<i32>} : memref<14x1xf32, #tpu.memory_space<vmem>>, vector<14x1xf32>,
      %cst_31 = arith.constant 0.000000e+00 : f32
      %50 = vector.broadcast %cst_31 : f32 to vector<14x1xf32>
      %c0_32 = arith.constant 0 : index
      %c0_33 = arith.constant 0 : index
      %51 = vector.load %arg9[%c0_32, %c0_33] : memref<14x1xf32, #tpu.memory_space<vmem>>, vector<14x1xf32>
      tpu.vector_store %arg9[%c0_32, %c0_33], %50 {strides = array<i32>} : memref<14x1xf32, #tpu.memory_space<vmem>>, vector<14x1xf32>,
    } else {
    }
    %c0 = arith.constant 0 : index
    %c0_1 = arith.constant 0 : index
    %3 = vector.load %arg2[%c0, %c0_1] : memref<14x32xf32, #tpu.memory_space<vmem>>, vector<14x32xf32>
    %4 = arith.truncf %3 : vector<14x32xf32> to vector<14x32xbf16>
    %c0_2 = arith.constant 0 : index
    %c0_3 = arith.constant 0 : index
    %5 = vector.load %arg4[%c0_2, %c0_3] : memref<32x128xbf16, #tpu.memory_space<vmem>>, vector<32x128xbf16>
    %cst = arith.constant dense<0.000000e+00> : vector<14x128xf32>
    %6 = tpu.matmul %4, %5, %cst {dimension_numbers = #tpu.dot_dimension_numbers<[1], [0], [0], [1], [0, 0, 1, 1], [], []>} : vector<14x32xbf16>, vector<32x128xbf16>, vector<14x128xf32> -> vector<14x128xf32>
    %c0_4 = arith.constant 0 : index
    %c0_5 = arith.constant 0 : index
    %7 = vector.load %arg5[%c0_4, %c0_5] : memref<1x128xf32, #tpu.memory_space<vmem>>, vector<1x128xf32>
    %8 = vector.broadcast %7 : vector<1x128xf32> to vector<14x128xf32>
    %9 = arith.addf %6, %8 : vector<14x128xf32>
    %cst_6 = arith.constant 1.250000e+00 : f32
    %10 = vector.broadcast %cst_6 : f32 to vector<14x128xf32>
    %11 = arith.mulf %9, %10 : vector<14x128xf32>
    %c0_7 = arith.constant 0 : index
    %c0_8 = arith.constant 0 : index
    %12 = vector.load %arg3[%c0_7, %c0_8] : memref<14x1xi32, #tpu.memory_space<vmem>>, vector<14x1xi32>
    %13 = tpu.iota {dimensions = array<i32: 1>} : vector<14x128xi32>
    %c128_i32 = arith.constant 128 : i32
    %14 = arith.muli %arg1, %c128_i32 : i32
    %15 = vector.broadcast %14 : i32 to vector<14x128xi32>
    %16 = arith.addi %13, %15 : vector<14x128xi32>
    %17 = vector.broadcast %12 : vector<14x1xi32> to vector<14x128xi32>
    %18 = arith.cmpi eq, %16, %17 : vector<14x128xi32>
    %19 = arith.extui %18 : vector<14x128xi1> to vector<14x128xi32>
    %20 = arith.sitofp %19 : vector<14x128xi32> to vector<14x128xf32>
    %c0_9 = arith.constant 0 : index
    %c0_10 = arith.constant 0 : index
    %21 = vector.load %arg9[%c0_9, %c0_10] : memref<14x1xf32, #tpu.memory_space<vmem>>, vector<14x1xf32>
    %22 = arith.mulf %20, %11 : vector<14x128xf32>
    %cst_11 = arith.constant dense<0.000000e+00> : vector<14xf32>
    %23 = vector.multi_reduction <add>, %22, %cst_11 [1] : vector<14x128xf32> to vector<14xf32>
    %24 = vector.shape_cast %23 : vector<14xf32> to vector<14x1xf32>
    %25 = arith.addf %21, %24 : vector<14x1xf32>
    %c0_12 = arith.constant 0 : index
    %c0_13 = arith.constant 0 : index
    %26 = vector.load %arg9[%c0_12, %c0_13] : memref<14x1xf32, #tpu.memory_space<vmem>>, vector<14x1xf32>
    tpu.vector_store %arg9[%c0_12, %c0_13], %25 {strides = array<i32>} : memref<14x1xf32, #tpu.memory_space<vmem>>, vector<14x1xf32>,
    %c0_14 = arith.constant 0 : index
    %c0_15 = arith.constant 0 : index
    %27 = vector.load %arg7[%c0_14, %c0_15] : memref<14x1xf32, #tpu.memory_space<vmem>>, vector<14x1xf32>
    %cst_16 = arith.constant dense<0xFF800000> : vector<14xf32>
    %28 = vector.multi_reduction <maximumf>, %11, %cst_16 [1] : vector<14x128xf32> to vector<14xf32>
    %29 = vector.shape_cast %28 : vector<14xf32> to vector<14x1xf32>
    %30 = arith.maximumf %27, %29 : vector<14x1xf32>
    %c0_17 = arith.constant 0 : index
    %c0_18 = arith.constant 0 : index
    %31 = vector.load %arg8[%c0_17, %c0_18] : memref<14x1xf32, #tpu.memory_space<vmem>>, vector<14x1xf32>
    %32 = arith.subf %27, %30 : vector<14x1xf32>
    %33 = math.exp %32 : vector<14x1xf32>
    %34 = arith.mulf %31, %33 : vector<14x1xf32>
    %35 = vector.broadcast %30 : vector<14x1xf32> to vector<14x128xf32>
    %36 = arith.subf %11, %35 : vector<14x128xf32>
    %37 = math.exp %36 : vector<14x128xf32>
    %cst_19 = arith.constant dense<0.000000e+00> : vector<14xf32>
    %38 = vector.multi_reduction <add>, %37, %cst_19 [1] : vector<14x128xf32> to vector<14xf32>
    %39 = vector.shape_cast %38 : vector<14xf32> to vector<14x1xf32>
    %40 = arith.addf %34, %39 : vector<14x1xf32>
    %c0_20 = arith.constant 0 : index
    %c0_21 = arith.constant 0 : index
    %41 = vector.load %arg8[%c0_20, %c0_21] : memref<14x1xf32, #tpu.memory_space<vmem>>, vector<14x1xf32>
    tpu.vector_store %arg8[%c0_20, %c0_21], %40 {strides = array<i32>} : memref<14x1xf32, #tpu.memory_space<vmem>>, vector<14x1xf32>,
    %c0_22 = arith.constant 0 : index
    %c0_23 = arith.constant 0 : index
    %42 = vector.load %arg7[%c0_22, %c0_23] : memref<14x1xf32, #tpu.memory_space<vmem>>, vector<14x1xf32>
    tpu.vector_store %arg7[%c0_22, %c0_23], %30 {strides = array<i32>} : memref<14x1xf32, #tpu.memory_space<vmem>>, vector<14x1xf32>,
    %c1_i32 = arith.constant 1 : i32
    %43 = arith.cmpi eq, %arg1, %c1_i32 : i32
    %44 = arith.extui %43 : i1 to i32
    %c0_i32_24 = arith.constant 0 : i32
    %45 = arith.cmpi ne, %44, %c0_i32_24 : i32
    scf.if %45 {
      %c0_25 = arith.constant 0 : index
      %c0_26 = arith.constant 0 : index
      %46 = vector.load %arg3[%c0_25, %c0_26] : memref<14x1xi32, #tpu.memory_space<vmem>>, vector<14x1xi32>
      %c0_i32_27 = arith.constant 0 : i32
      %47 = vector.broadcast %c0_i32_27 : i32 to vector<14x1xi32>
      %48 = arith.cmpi sgt, %46, %47 : vector<14x1xi32>
      %49 = arith.extui %48 : vector<14x1xi1> to vector<14x1xi32>
      %50 = arith.sitofp %49 : vector<14x1xi32> to vector<14x1xf32>
      %c0_28 = arith.constant 0 : index
      %c0_29 = arith.constant 0 : index
      %51 = vector.load %arg7[%c0_28, %c0_29] : memref<14x1xf32, #tpu.memory_space<vmem>>, vector<14x1xf32>
      %c0_30 = arith.constant 0 : index
      %c0_31 = arith.constant 0 : index
      %52 = vector.load %arg8[%c0_30, %c0_31] : memref<14x1xf32, #tpu.memory_space<vmem>>, vector<14x1xf32>
      %53 = math.log %52 : vector<14x1xf32>
      %54 = arith.addf %51, %53 : vector<14x1xf32>
      %c0_32 = arith.constant 0 : index
      %c0_33 = arith.constant 0 : index
      %55 = vector.load %arg9[%c0_32, %c0_33] : memref<14x1xf32, #tpu.memory_space<vmem>>, vector<14x1xf32>
      %56 = arith.subf %54, %55 : vector<14x1xf32>
      %57 = arith.mulf %56, %50 : vector<14x1xf32>
      %c0_34 = arith.constant 0 : index
      %c0_35 = arith.constant 0 : index
      %58 = vector.load %arg6[%c0_34, %c0_35] : memref<14x1xf32, #tpu.memory_space<vmem>>, vector<14x1xf32>
      tpu.vector_store %arg6[%c0_34, %c0_35], %57 {strides = array<i32>} : memref<14x1xf32, #tpu.memory_space<vmem>>, vector<14x1xf32>,
    } else {
    }
    return
  }
  func.func @transform_0(%arg0: i32, %arg1: i32) -> (i32, i32) {
    %c0_i32 = arith.constant 0 : i32
    %c0_i32_0 = arith.constant 0 : i32
    return %arg0, %c0_i32 : i32, i32
  }
  func.func @transform_1(%arg0: i32, %arg1: i32) -> (i32, i32) {
    %c0_i32 = arith.constant 0 : i32
    %c0_i32_0 = arith.constant 0 : i32
    return %arg0, %c0_i32 : i32, i32
  }
  func.func @transform_2(%arg0: i32, %arg1: i32) -> (i32, i32) {
    %c0_i32 = arith.constant 0 : i32
    %c0_i32_0 = arith.constant 0 : i32
    return %c0_i32, %arg1 : i32, i32
  }
  func.func @transform_3(%arg0: i32, %arg1: i32) -> (i32, i32) {
    %c0_i32 = arith.constant 0 : i32
    %c0_i32_0 = arith.constant 0 : i32
    return %c0_i32, %arg1 : i32, i32
  }
  func.func @transform_4(%arg0: i32, %arg1: i32) -> (i32, i32) {
    %c0_i32 = arith.constant 0 : i32
    %c0_i32_0 = arith.constant 0 : i32
    return %arg0, %c0_i32 : i32, i32
  }
}

module attributes {stable_mosaic.version = 11 : i64} {
  func.func @dual_linear_tanh_kernel(%arg0: i32, %arg1: memref<14x32xf32, #tpu.memory_space<vmem>>, %arg2: memref<14x32xf32, #tpu.memory_space<vmem>>, %arg3: memref<32x32xbf16, #tpu.memory_space<vmem>>, %arg4: memref<32x32xbf16, #tpu.memory_space<vmem>>, %arg5: memref<1x32xf32, #tpu.memory_space<vmem>>, %arg6: memref<14x32xf32, #tpu.memory_space<vmem>>) attributes {dimension_semantics = [#tpu.dimension_semantics<parallel>], iteration_bounds = array<i64: 1>, scalar_prefetch = 0 : i64, scratch_operands = 0 : i64, tpu.core_type = #tpu.core_type<tc>, window_params = [{transform_indices = @transform_0, window_bounds = array<i64: 14, 32>}, {transform_indices = @transform_1, window_bounds = array<i64: 14, 32>}, {pipeline_mode = #tpu.pipeline_mode<synchronous>, transform_indices = @transform_2, window_bounds = array<i64: 32, 32>}, {pipeline_mode = #tpu.pipeline_mode<synchronous>, transform_indices = @transform_3, window_bounds = array<i64: 32, 32>}, {pipeline_mode = #tpu.pipeline_mode<synchronous>, transform_indices = @transform_4, window_bounds = array<i64: 1, 32>}, {transform_indices = @transform_5, window_bounds = array<i64: 14, 32>}]} {
    %c0 = arith.constant 0 : index
    %c0_0 = arith.constant 0 : index
    %0 = vector.load %arg1[%c0, %c0_0] : memref<14x32xf32, #tpu.memory_space<vmem>>, vector<14x32xf32>
    %1 = arith.truncf %0 : vector<14x32xf32> to vector<14x32xbf16>
    %c0_1 = arith.constant 0 : index
    %c0_2 = arith.constant 0 : index
    %2 = vector.load %arg3[%c0_1, %c0_2] : memref<32x32xbf16, #tpu.memory_space<vmem>>, vector<32x32xbf16>
    %cst = arith.constant dense<0.000000e+00> : vector<14x32xf32>
    %3 = tpu.matmul %1, %2, %cst {dimension_numbers = #tpu.dot_dimension_numbers<[1], [0], [0], [1], [0, 0, 1, 1], [], []>} : vector<14x32xbf16>, vector<32x32xbf16>, vector<14x32xf32> -> vector<14x32xf32>
    %c0_3 = arith.constant 0 : index
    %c0_4 = arith.constant 0 : index
    %4 = vector.load %arg2[%c0_3, %c0_4] : memref<14x32xf32, #tpu.memory_space<vmem>>, vector<14x32xf32>
    %5 = arith.truncf %4 : vector<14x32xf32> to vector<14x32xbf16>
    %c0_5 = arith.constant 0 : index
    %c0_6 = arith.constant 0 : index
    %6 = vector.load %arg4[%c0_5, %c0_6] : memref<32x32xbf16, #tpu.memory_space<vmem>>, vector<32x32xbf16>
    %cst_7 = arith.constant dense<0.000000e+00> : vector<14x32xf32>
    %7 = tpu.matmul %5, %6, %cst_7 {dimension_numbers = #tpu.dot_dimension_numbers<[1], [0], [0], [1], [0, 0, 1, 1], [], []>} : vector<14x32xbf16>, vector<32x32xbf16>, vector<14x32xf32> -> vector<14x32xf32>
    %8 = arith.addf %3, %7 : vector<14x32xf32>
    %c0_8 = arith.constant 0 : index
    %c0_9 = arith.constant 0 : index
    %9 = vector.load %arg5[%c0_8, %c0_9] : memref<1x32xf32, #tpu.memory_space<vmem>>, vector<1x32xf32>
    %10 = vector.broadcast %9 : vector<1x32xf32> to vector<14x32xf32>
    %11 = arith.addf %8, %10 : vector<14x32xf32>
    %12 = math.tanh %11 : vector<14x32xf32>
    %c0_10 = arith.constant 0 : index
    %c0_11 = arith.constant 0 : index
    %13 = vector.load %arg6[%c0_10, %c0_11] : memref<14x32xf32, #tpu.memory_space<vmem>>, vector<14x32xf32>
    tpu.vector_store %arg6[%c0_10, %c0_11], %12 {strides = array<i32>} : memref<14x32xf32, #tpu.memory_space<vmem>>, vector<14x32xf32>,
    return
  }
  func.func @transform_0(%arg0: i32) -> (i32, i32) {
    %c0_i32 = arith.constant 0 : i32
    %c0_i32_0 = arith.constant 0 : i32
    return %arg0, %c0_i32 : i32, i32
  }
  func.func @transform_1(%arg0: i32) -> (i32, i32) {
    %c0_i32 = arith.constant 0 : i32
    %c0_i32_0 = arith.constant 0 : i32
    return %arg0, %c0_i32 : i32, i32
  }
  func.func @transform_2(%arg0: i32) -> (i32, i32) {
    %c0_i32 = arith.constant 0 : i32
    %c0_i32_0 = arith.constant 0 : i32
    %c0_i32_1 = arith.constant 0 : i32
    return %c0_i32, %c0_i32_0 : i32, i32
  }
  func.func @transform_3(%arg0: i32) -> (i32, i32) {
    %c0_i32 = arith.constant 0 : i32
    %c0_i32_0 = arith.constant 0 : i32
    %c0_i32_1 = arith.constant 0 : i32
    return %c0_i32, %c0_i32_0 : i32, i32
  }
  func.func @transform_4(%arg0: i32) -> (i32, i32) {
    %c0_i32 = arith.constant 0 : i32
    %c0_i32_0 = arith.constant 0 : i32
    %c0_i32_1 = arith.constant 0 : i32
    return %c0_i32, %c0_i32_0 : i32, i32
  }
  func.func @transform_5(%arg0: i32) -> (i32, i32) {
    %c0_i32 = arith.constant 0 : i32
    %c0_i32_0 = arith.constant 0 : i32
    return %arg0, %c0_i32 : i32, i32
  }
}

</mosaic_0001>

<bundles_post_ra>
// kernel: rnn_seq2seq_forward.9
= control target key start
LH: loop header
LB: loop body
LE: loop exit
PB: predicated region body
PF: predicated region fallthrough
CT: control target
= control target key end

     0   :  { %s484_s12 = smov 0   ;;  %s486_s13 = smov 0   ;;  %s526_s0 = inlined_call_operand.vmem [shape: bf16[20,16], index: 0, kind: input, shape index: {}]   ;;  %s527_s1 = inlined_call_operand.vmem [shape: bf16[6,16,32], index: 1, kind: input, shape index: {}]   ;;  %s528_s2 = inlined_call_operand.vmem [shape: f32[6,1,32], index: 2, kind: input, shape index: {}]   ;;  %s529_s3 = inlined_call_operand.vmem [shape: f32[6,20,32], index: 3, kind: output, shape index: {}]  }
   0x1   :  { %s488_s14 = smov 0  }
   0x2 LB: > { %s22_s15 = sadd.s32 1, %s458_s13  ;;  %p394_p0 = scmp.ge.s32.totalorder %s462_s14, 1  ;;  %s462_s14 = sphi %s488_s14, %s13_s14   ;;  %s458_s13 = sphi %s486_s13, %s531_s13   ;;  %s454_s12 = sphi %s484_s12, %s530_s12  }
   0x3   : > { %p23_p1 = scmp.ge.s32.totalorder %s22_s15, 6  ;;  %p170_p2 = scmp.lt.s32.totalorder %s462_s14, 7 }
   0x5   : > { %s533_s15 = smov (%p23_p1, %s22_s15), 0  ;;  %p171_p3 = pnand %p394_p0, %p170_p2 }
   0x6   : > { %p212_p4 = scmp.lt.s32.totalorder (!%p171_p3), %s454_s12, 5 }
   0x7   : > { %174 = sbr.rel (%p171_p3) target bundleno = 156 (0x9c), region = 32 }
   0xc   : > { %v233_v0 = vld [vmem:[%s526_s0 + $0x8] sm:$0x3]  ;;  %s535_s12 = smov (!%p212_p4, %s454_s12), 5  ;;  %v411_v3 = vld [vmem:[%s526_s0] sm:$0xff]  ;;  %vm254_vm0 = vcmask 130048   ;;  %vm279_vm1 = vcmask 261120  }
   0xd   : > { %v245_v1 = vunpack.c.l.b16 %v233_v0  ;;  %s410_s18 = sshll.u32 %s535_s12, 3  ;;  %s219_s21 = scalar_lea.vmem %s528_s2, %s535_s12  ;;  %vm282_vm2 = vcmask 257024  }
   0xe   : > { %s216_s24 = scalar_lea.vmem %s527_s1, %s410_s18  ;;  %s414_s27 = smul.u32 24, %s535_s12  ;;  %v439_v5 = vld [vmem:[%s219_s21] ss:$0 sm:$0xff] }
   0xf   : > { %v412_v2 = vld [vmem:[%s216_s24] sm:$0xff]  ;;  %v247_v4 = vpack.c.b16 %v245_v1, %v245_v1 }
  0x10   : > { %268 = vmatpush.bf16.msra.mxu0 %v412_v2  ;;  %413 = vmatpush.bf16.msra.mxu1 %v412_v2  ;;  %s228_s30 = scalar_lea.vmem %s529_s3, %s414_s27 }
  0x13   : > { %406 = vmatmul.msk.bf16.vlgmr.msra.gmra.mxu0 %vm254_vm0, %v411_v3  ;;  %407 = vmatmul.msk.bf16.vlgmr.msra.gmra.mxu1 %vm254_vm0, %v247_v4 }
  0x90   : > { %v270_v6 = vpop.f32.mrf.mxu0  ;;  %v275_v7 = vpop.f32.mrf.mxu1 }
  0x91   : > { %v271_v8 = vadd.f32 %v439_v5, %v270_v6  ;;  %v276_v9 = vadd.f32 %v439_v5, %v275_v7 }
  0x93   : > { %280 = vst.msk [vmem:[%s228_s30] sm:$0xff] %vm279_vm1, %v271_v8 }
  0x94   : > { %283 = vst.msk [vmem:[%s228_s30 + $0x10] sm:$0xf] %vm282_vm2, %v276_v9 }
  0x98   : > { %v272_v10 = vpop.f32.mrf.mxu0  ;;  %v277_v11 = vpop.f32.mrf.mxu1 }
  0x99   : > { %v273_v12 = vadd.f32 %v439_v5, %v272_v10 }
  0x9b   : > { %281 = vst.msk [vmem:[%s228_s30 + $0x8] sm:$0xff] %vm279_vm1, %v273_v12 }
  0x9c PF: > { %s13_s14 = sadd.s32 1, %s462_s14   ;;  %s530_s12 = smov %s458_s13 }
  0x9d   : > { %p10_p5 = scmp.ge.s32.totalorder %s13_s14, 8   ;;  %s531_s13 = smov %s533_s15 }
  0x9f   :  { %12 = sbr.rel (!%p10_p5) target bundleno = 2 (0x2), region = 68 }

// kernel: rnn_seq2seq_forward.11
= control target key start
LH: loop header
LB: loop body
LE: loop exit
PB: predicated region body
PF: predicated region fallthrough
CT: control target
= control target key end

     0   :  { %vm45_vm0 = vcmask 261120   ;;  %vm96_vm1 = vcmask 254976   ;;  %s181_s3 = inlined_call_operand.vmem [shape: bf16[32,32], index: 3, kind: input, shape index: {}]   ;;  %s182_s2 = inlined_call_operand.vmem [shape: bf16[32,32], index: 2, kind: input, shape index: {}]   ;;  %s183_s1 = inlined_call_operand.vmem [shape: f32[2,32], index: 1, kind: input, shape index: {}]   ;;  %s184_s0 = inlined_call_operand.vmem [shape: f32[2,32], index: 0, kind: input, shape index: {}]   ;;  %s185_s4 = inlined_call_operand.vmem [shape: f32[1,32], index: 4, kind: input, shape index: {}]   ;;  %s186_s5 = inlined_call_operand.vmem [shape: f32[2,32], index: 5, kind: output, shape index: {}]  }
   0x1   :  { %v123_v0 = vld [vmem:[%s181_s3 + $0x8] sm:$0xff]  ;;  %v122_v2 = vld [vmem:[%s181_s3] sm:$0xff] }
   0x2   :  { %v121_v1 = vld [vmem:[%s182_s2 + $0x8] sm:$0xff]  ;;  %55 = vmatpush.bf16.msra.mxu0 %v123_v0  ;;  %v120_v3 = vld [vmem:[%s182_s2] sm:$0xff] }
   0x3   :  { %83 = vmatpush.bf16.msra.mxu1 %v121_v1  ;;  %v27_v4 = vld [vmem:[%s183_s1] sm:$0x3] }
   0x4   :  { %v21_v5 = vld [vmem:[%s184_s0] sm:$0x3]  ;;  %v28_v6 = vpack.c.bf16 %v27_v4, %v27_v4 }
   0x5   :  { %v22_v7 = vpack.c.bf16 %v21_v5, %v21_v5  ;;  %v124_v8 = vld [vmem:[%s185_s4] ss:$0 sm:$0xff] }
   0x6   :  { %56 = vmatpush.bf16.msra.mxu0 %v122_v2 }
   0x7   :  { %84 = vmatpush.bf16.msra.mxu1 %v120_v3 }
   0x9   :  { %110 = vmatmul.msk.bf16.vlgmr.msra.gmra.mxu0 %vm45_vm0, %v28_v6 }
   0xa   :  { %119 = vmatmul.msk.bf16.vlgmr.msra.gmra.mxu1 %vm45_vm0, %v22_v7 }
  0x86   :  { %v58_v9 = vpop.f32.mrf.mxu0 }
  0x87   :  { %v86_v10 = vpop.f32.mrf.mxu1 }
  0x88   :  { %v87_v11 = vadd.f32 %v86_v10, %v58_v9 }
  0x8a   :  { %v94_v12 = vadd.f32 %v124_v8, %v87_v11 }
  0x8c   :  { %125 = vtanh.f32 %v94_v12 }
  0x8e   :  { %v60_v13 = vpop.f32.mrf.mxu0 }
  0x8f   :  { %v88_v14 = vpop.f32.mrf.mxu1 }
  0x92   :  { %v126_v15 = vpop.eup %125 }
  0x93   :  { %97 = vst.msk [vmem:[%s186_s5] sm:$0x3] %vm96_vm1, %v126_v15 }

// kernel: rnn_seq2seq_forward.10
= control target key start
LH: loop header
LB: loop body
LE: loop exit
PB: predicated region body
PF: predicated region fallthrough
CT: control target
= control target key end

     0   :  { %s1419_s24 = smov 0   ;;  %s1421_s25 = smov 0   ;;  %s1819_s0 = inlined_call_operand.vmem [shape: s32[2,1], index: 0, kind: input, shape index: {}]   ;;  %s1820_s1 = inlined_call_operand.vmem [shape: f32[2,3,10,2,32], index: 1, kind: input, shape index: {}, may-alias: {1,2}]   ;;  %s1821_s2 = inlined_call_operand.vmem [shape: f32[2,3,10,2,32], index: 2, kind: input, shape index: {}, may-alias: {1,2}]   ;;  %s1822_s3 = inlined_call_operand.vmem [shape: bf16[2,3,32,32], index: 3, kind: input, shape index: {}]   ;;  %s1823_s4 = inlined_call_operand.vmem [shape: f32[2,3,1,32], index: 4, kind: input, shape index: {}]   ;;  %s1824_s5 = inlined_call_operand.vmem [shape: f32[10,2,32], index: 5, kind: output, shape index: {0}]   ;;  %s1825_s6 = inlined_call_operand.vmem [shape: f32[10,2,32], index: 6, kind: output, shape index: {1}]   ;;  %s1826_s7 = inlined_call_operand.vmem [shape: f32[2,2,32], index: 7, kind: output, shape index: {2}]  }
   0x1   :  { %s1423_s26 = smov 0   ;;  %s1425_s27 = smov 0  }
   0x2   :  { %s1427_s28 = smov 0  }
   0x3 LB: > { %s1445_s29 = sadd.s32 4294967295, %s1362_s28   ;;  %s1448_s30 = sadd.s32 1, %s1362_s28   ;;  %s1362_s28 = sphi %s1427_s28, %s1835_s28   ;;  %s1358_s27 = sphi %s1425_s27, %s1834_s27   ;;  %s1354_s26 = sphi %s1423_s26, %s1833_s26   ;;  %s1350_s25 = sphi %s1421_s25, %s1832_s25   ;;  %s1346_s24 = sphi %s1419_s24, %s1831_s24  }
   0x4   : > { %s43_s8 = ssub.s32 %s1362_s28, %s1448_s30  ;;  %s46_s9 = sadd.s32 1, %s1358_s27 }
   0x5   : > { %p44_p0 = scmp.eq.s32.totalorder %s43_s8, 0  ;;  %p53_p1 = scmp.ne.s32.totalorder %s1358_s27, %s1354_s26 }
   0x6   : > { %p54_p2 = scmp.eq.s32.totalorder %s1362_s28, 0  ;;  %s69_s10 = ssub.s32 1, %s1362_s28 }
   0x7   : > { %s1458_s11 = scalar_select %p44_p0, %s1358_s27, %s46_s9  }
   0x8   : > { %p55_p3 = por %p54_p2, %p53_p1  ;;  %s70_s12 = ssub.s32 1, %s1448_s30 }
   0x9   : > { %s71_s13 = ssub.s32 %s69_s10, %s70_s12  ;;  %s74_s14 = sadd.s32 1, %s1350_s25 }
   0xa   : > { %p72_p4 = scmp.eq.s32.totalorder %s71_s13, 0  ;;  %p81_p5 = scmp.ne.s32.totalorder %s1350_s25, %s1346_s24 }
   0xb   : > { %p1081_p7 = scmp.ge.s32.totalorder %s1362_s28, 2 }
   0xc   : > { %s1467_s15 = scalar_select %p72_p4, %s1350_s25, %s74_s14  }
   0xd   : > { %p1469_p6 = por %p81_p5, %p54_p2  ;;  %233 = sbr.rel (%p1081_p7) target bundleno = 40 (0x28), region = 28 }
  0x12   : > { %236 = sbr.rel (!%p55_p3) target bundleno = 29 (0x1d), region = 32  ;;  %s238_s17 = sand.u32 (%p55_p3), 1, %s1358_s27  }
  0x13   : > { %s1202_s18 = smul.u32 (%p55_p3), 10, %s1362_s28 }
  0x14   : > { %s1215_s19 = smul.u32 (%p55_p3), 30, %s238_s17 }
  0x15   : > { %s243_s22 = scalar_lea.vmem (%p55_p3), %s1820_s1, %s1202_s18 }
  0x16   : > { %v260_v0 = vld [vmem:[%s243_s22] sm:$0xff] (%p55_p3)   ;;  %v268_v1 = vld [vmem:[%s243_s22 + $0x8] sm:$0x3] (%p55_p3)  ;;  %v270_v2 = vld [vmem:[%s243_s22 + $0x14] sm:$0xff] (%p55_p3)   ;;  %s240_s23 = scalar_lea.vmem (%p55_p3), [#allocation4], %s1215_s19 }
  0x17   : > { %261 = vst [vmem:[%s240_s23] sm:$0xff] %v260_v0   ;;  %v278_v3 = vld [vmem:[%s243_s22 + $0x1c] sm:$0x3]  ;;  %v280_v4 = vld [vmem:[%s243_s22 + $0x28] sm:$0xff]   ;;  %v288_v5 = vld [vmem:[%s243_s22 + $0x30] sm:$0x3] }
  0x18   : > { %269 = vst [vmem:[%s240_s23 + $0x8] sm:$0x3] %v268_v1 }
  0x19   : > { %271 = vst [vmem:[%s240_s23 + $0xa] sm:$0xff] %v270_v2  }
  0x1a   : > { %279 = vst [vmem:[%s240_s23 + $0x12] sm:$0x3] %v278_v3 }
  0x1b   : > { %281 = vst [vmem:[%s240_s23 + $0x14] sm:$0xff] %v280_v4  }
  0x1c   : > { %289 = vst [vmem:[%s240_s23 + $0x1c] sm:$0x3] %v288_v5 }
  0x1d PF: > { %343 = sbr.rel (!%p1469_p6) target bundleno = 40 (0x28), region = 73  ;;  %s345_s8 = sand.u32 (%p1469_p6), 1, %s1350_s25  }
  0x1e   : > { %s1083_s9 = smul.u32 (%p1469_p6), 10, %s69_s10 }
  0x1f   : > { %s1216_s12 = smul.u32 (%p1469_p6), 30, %s345_s8 }
  0x20   : > { %s978_s17 = scalar_lea.vmem (%p1469_p6), %s1821_s2, %s1083_s9 }
  0x21   : > { %v1084_v6 = vld [vmem:[%s978_s17 + $0x3c] sm:$0xff] (%p1469_p6)   ;;  %v1088_v7 = vld [vmem:[%s978_s17 + $0x44] sm:$0x3] (%p1469_p6)  ;;  %v1089_v8 = vld [vmem:[%s978_s17 + $0x50] sm:$0xff] (%p1469_p6)   ;;  %s347_s18 = scalar_lea.vmem (%p1469_p6), [#allocation5], %s1216_s12 }
  0x22   : > { %370 = vst [vmem:[%s347_s18] sm:$0xff] %v1084_v6   ;;  %v1093_v9 = vld [vmem:[%s978_s17 + $0x58] sm:$0x3]  ;;  %v1094_v10 = vld [vmem:[%s978_s17 + $0x64] sm:$0xff]   ;;  %v1098_v11 = vld [vmem:[%s978_s17 + $0x6c] sm:$0x3] }
  0x23   : > { %378 = vst [vmem:[%s347_s18 + $0x8] sm:$0x3] %v1088_v7 }
  0x24   : > { %380 = vst [vmem:[%s347_s18 + $0xa] sm:$0xff] %v1089_v8  }
  0x25   : > { %388 = vst [vmem:[%s347_s18 + $0x12] sm:$0x3] %v1093_v9 }
  0x26   : > { %390 = vst [vmem:[%s347_s18 + $0x14] sm:$0xff] %v1094_v10  }
  0x27   : > { %398 = vst [vmem:[%s347_s18 + $0x1c] sm:$0x3] %v1098_v11 }
  0x28 PF: > { %p1099_p8 = scmp.ge.s32.totalorder %s1362_s28, 1  ;;  %p451_p9 = scmp.lt.s32.totalorder %s1362_s28, 3 }
  0x2a   : > { %p452_p10 = pnand %p1099_p8, %p451_p9 }
  0x2b   : > { %s458_s10 = sand.u32 (!%p452_p10), 1, %s1354_s26   ;;  %s465_s16 = sand.u32 (!%p452_p10), 1, %s1346_s24  }
  0x2c   : > { %455 = sbr.rel (%p452_p10) target bundleno = 280 (0x118), region = 114  ;;  %s515_s20 = ssub.s32 (!%p452_p10), 1, %s1445_s29 }
  0x2d   : > { %s1491_s19 = smul.u32 (!%p452_p10), 30, %s458_s10  ;;  %p1102_p13 = scmp.ne.s32.totalorder (!%p452_p10), %s1445_s29, 0 }
  0x2e   : > { %s1494_s21 = smul.u32 (!%p452_p10), 30, %s465_s16 }
  0x2f   : > { %s1497_s22 = smul.u32 (!%p452_p10), 5, %s1445_s29  ;;  %s460_s10 = scalar_lea.vmem (!%p452_p10), [#allocation4], %s1491_s19 }
  0x30   : > { %s1499_s28 = smul.u32 (!%p452_p10), 5, %s515_s20 }
  0x31   : > { %p510_p11 = scmp.lt.s32.totalorder %s1497_s22, 9 }
  0x32   : > { %p517_p12 = scmp.lt.s32.totalorder %s1499_s28, 9 }
  0x33   : > { %s511_s23 = scalar_select %p510_p11, %s1497_s22, 9 }
  0x34   : > { %s518_s26 = scalar_select %p517_p12, %s1499_s28, 9 }
  0x35   : > { %s1100_s24 = sshll.u32 %s511_s23, 1  ;;  %527 = sbr.rel (%p1102_p13) target bundleno = 61 (0x3d), region = 126 }
  0x36   : > { %s1508_s12 = scalar_lea.vmem %s1824_s5, %s1100_s24  ;;  %s1101_s13 = sshll.u32 %s518_s26, 1 }
  0x37   : > { %s1513_s18 = scalar_lea.vmem %s1825_s6, %s1101_s13 }
  0x3a   : > { %vm528_vm0 = vcmask 254976   ;;  %v1376_v12 = vmov 0.0  }
  0x3b   : > { %529 = vst.msk [vmem:[#allocation2] sm:$0x3] %vm528_vm0, %v1376_v12 }
  0x3c   : > { %530 = vst.msk [vmem:[#allocation3] sm:$0x3] %vm528_vm0, %v1376_v12 }
  0x3d PF: > { %v1521_v13 = vld [vmem:[%s1819_s0] sm:$0x3]  ;;  %v1531_v15 = vld [vmem:[%s1822_s3] sm:$0xf0]  ;;  %v1536_v16 = vld [vmem:[%s1822_s3 + $0x8] sm:$0xf] }
  0x3e   : > { %v1526_v14 = vld [vmem:[%s1822_s3] sm:$0xf]  ;;  %v1541_v17 = vld [vmem:[%s1822_s3 + $0x8] sm:$0xf0]  ;;  %v1546_v18 = vld [vmem:[%s1822_s3 + $0x10] sm:$0xf] }
  0x3f   : > { %v1551_v19 = vld [vmem:[%s1822_s3 + $0x10] sm:$0xf0]  ;;  %v1556_v20 = vld [vmem:[%s1822_s3 + $0x18] sm:$0xf]  ;;  %v1561_v21 = vld [vmem:[%s1822_s3 + $0x18] sm:$0xf0] }
  0x40   : > { %v1566_v22 = vld [vmem:[%s1822_s3 + $0x20] sm:$0xf]  ;;  %v1571_v23 = vld [vmem:[%s1822_s3 + $0x20] sm:$0xf0]  ;;  %v1576_v24 = vld [vmem:[%s1822_s3 + $0x28] sm:$0xf] }
  0x41   : > { %v1581_v25 = vld [vmem:[%s1822_s3 + $0x28] sm:$0xf0]  ;;  %v1586_v26 = vld [vmem:[%s1822_s3 + $0x30] sm:$0xf]  ;;  %v1591_v27 = vld [vmem:[%s1822_s3 + $0x30] sm:$0xf0] }
  0x42   : > { %v1596_v28 = vld [vmem:[%s1822_s3 + $0x38] sm:$0xf]  ;;  %v1601_v29 = vld [vmem:[%s1822_s3 + $0x38] sm:$0xf0]  ;;  %v1606_v30 = vld [vmem:[%s1822_s3 + $0x40] sm:$0xf] }
  0x43   : > { %v1611_v31 = vld [vmem:[%s1822_s3 + $0x40] sm:$0xf0]  ;;  %v1616_v32 = vld [vmem:[%s1822_s3 + $0x48] sm:$0xf]  ;;  %v1621_v33 = vld [vmem:[%s1822_s3 + $0x48] sm:$0xf0] }
  0x44   : > { %v1626_v34 = vld [vmem:[%s1822_s3 + $0x50] sm:$0xf]  ;;  %v1631_v35 = vld [vmem:[%s1822_s3 + $0x50] sm:$0xf0]  ;;  %v1636_v36 = vld [vmem:[%s1822_s3 + $0x58] sm:$0xf] }
  0x45   : > { %v1641_v37 = vld [vmem:[%s1822_s3 + $0x58] sm:$0xf0]  ;;  %v1646_v38 = vld [vmem:[%s1823_s4] sm:$0x1]  ;;  %v1651_v39 = vld [vmem:[%s1823_s4 + $0x1] sm:$0x1] }
  0x46   : > { %v1656_v40 = vld [vmem:[%s1823_s4 + $0x2] sm:$0x1]  ;;  %v1661_v41 = vld [vmem:[%s1823_s4 + $0x3] sm:$0x1]  ;;  %v1666_v42 = vld [vmem:[%s1823_s4 + $0x4] sm:$0x1] }
  0x47   : > { %v1671_v43 = vld [vmem:[%s1823_s4 + $0x5] sm:$0x1]  ;;  %v575_v44 = vld [vmem:[#allocation2] sm:$0x3]   ;;  %v576_v45 = vld [vmem:[#allocation3] sm:$0x3]  }
  0x48   : > { %s1677_s26 = smov 0  }
  0x49 LB: >> { %v1141_v46 = vor.u32 %v1541_v17, %v1536_v16  ;;  %v1176_v47 = vor.u32 %v1601_v29, %v1596_v28  ;;  %v1151_v48 = vor.u32 %v1561_v21, %v1556_v20  ;;  %v1137_v49 = vor.u32 %v1531_v15, %v1526_v14  ;;  %s585_s24 = sadd.s32 %s1374_s26, %s1497_s22  ;;  %s748_s8 = ssub.s32 4, %s1374_s26  ;;  %s1374_s26 = sphi %s1677_s26, %s582_s26   ;;  %v1370_v44 = vphi %v575_v44, %v1830_v44   ;;  %v1366_v45 = vphi %v576_v45, %v1829_v45  }
  0x4a   : >> { %v1172_v50 = vor.u32 %v1591_v27, %v1586_v26  ;;  %v1147_v51 = vor.u32 %v1551_v19, %v1546_v18  ;;  %v1186_v52 = vor.u32 %v1621_v33, %v1616_v32  ;;  %v1161_v53 = vor.u32 %v1581_v25, %v1576_v24  ;;  %s749_s9 = sadd.s32 %s748_s8, %s1499_s28  ;;  %s1129_s13 = sshll.u32 %s1374_s26, 1 }
  0x4b   : >> { %622 = vmatpush.bf16.msra.mxu0 %v1141_v46  ;;  %785 = vmatpush.bf16.msra.mxu3 %v1176_v47  ;;  %v599_v54 = vpack.c.bf16 %v1370_v44, %v1370_v44  ;;  %v1196_v55 = vor.u32 %v1641_v37, %v1636_v36  ;;  %v763_v56 = vpack.c.bf16 %v1366_v45, %v1366_v45  ;;  %v1377_v57 = vmov 0   ;;  %s1735_s14 = scalar_lea.vmem %s460_s10, %s1129_s13 [#allocation4]  ;;  %s1740_s16 = sshll.u32 %s748_s8, 1 }
  0x4c   : >> { %671 = vmatpush.bf16.msra.mxu1 %v1151_v48  ;;  %723 = vmatpush.bf16.msra.mxu2 %v1161_v53  ;;  %v586_v58 = vstv %s585_s24  ;;  %v750_v59 = vstv %s749_s9  ;;  %vm612_vm1 = vcmask 261120   ;;  %v1157_v60 = vor.u32 %v1571_v23, %v1566_v22  ;;  %v592_v3 = vld [vmem:[%s1735_s14] sm:$0x3]  ;;  %v1131_v5 = vld [vmem:[%s1735_s14 + $0xa] sm:$0x3]  ;;  %s1828_s17 = scalar_lea.vmem [#allocation5], %s1494_s21  ;;  %s745_s23 = scalar_lea.vmem %s1508_s12, %s1129_s13 }
  0x4d   : >> { %1286 = vset.pattern.permute.xlu0 %v1377_v57  ;;  %vm587_vm2 = vcmp.lt.s32.totalorder %v586_v58, %v1521_v13  ;;  %vm751_vm3 = vcmp.lt.s32.totalorder %v750_v59, %v1521_v13  ;;  %v1182_v61 = vor.u32 %v1611_v31, %v1606_v30  ;;  %v1378_v62 = vmov 0.0   ;;  %s1748_s20 = scalar_lea.vmem %s1828_s17, %s1740_s16 [#allocation5]  ;;  %s908_s24 = scalar_lea.vmem %s1513_s18, %s1740_s16 }
  0x4e   : >> { %v1128_v63 = vsel %vm587_vm2, 1.0, %v1378_v62  ;;  %v1163_v0 = vsel %vm751_vm3, 1.0, %v1378_v62  ;;  %v1192_v1 = vor.u32 %v1631_v35, %v1626_v34  ;;  %v631_v4 = vperm.slane %v1646_v38, 0  ;;  %v756_v46 = vld [vmem:[%s1748_s20] sm:$0x3]  ;;  %s582_s26 = sadd.s32 1, %s1374_s26  }
  0x4f   : >> { %623 = vmatpush.bf16.msra.mxu0 %v1137_v49  ;;  %786 = vmatpush.bf16.msra.mxu3 %v1172_v50  ;;  %v1287_v2 = vpack.i.bf16 %v1163_v0, %v1128_v63  ;;  %v680_v7 = vperm.slane %v1651_v39, 0  ;;  %v794_v48 = vperm.slane %v1661_v41, 0  ;;  %v843_v63 = vperm.slane %v1666_v42, 0  ;;  %p579_p0 = scmp.ge.s32.totalorder %s582_s26, 5  }
  0x50   : >> { %672 = vmatpush.bf16.msra.mxu1 %v1147_v51  ;;  %724 = vmatpush.bf16.msra.mxu2 %v1157_v60  ;;  %p1198_p1 = scmp.ne.s32.totalorder (%p579_p0), %s1445_s29, 1 }
  0x51   : >> { %1288 = vperm.xlu0 %1286, %v1287_v2  }
  0x52   : >> { %1142 = vmatmul.msk.bf16.vlgmr.msra.gmra.mxu0 %vm612_vm1, %v599_v54  ;;  %1177 = vmatmul.msk.bf16.vlgmr.msra.gmra.mxu3 %vm612_vm1, %v763_v56 }
  0x53   : >> { %834 = vmatpush.bf16.msrb.mxu0 %v1186_v52  ;;  %1152 = vmatmul.msk.bf16.vlgmr.msra.gmra.mxu1 %vm612_vm1, %v599_v54 }
  0x54   : >> { %886 = vmatpush.bf16.msrb.mxu1 %v1196_v55  ;;  %1162 = vmatmul.msk.bf16.vlgmr.msra.gmra.mxu2 %vm612_vm1, %v599_v54 }
  0x57   : >> { %835 = vmatpush.bf16.msrb.mxu0 %v1182_v61  ;;  %v1166_v61 = vld [vmem:[%s1748_s20 + $0xa] sm:$0x3] }
  0x58   : >> { %887 = vmatpush.bf16.msrb.mxu1 %v1192_v1 }
  0x62   : >> { %1187 = vmatmul.msk.bf16.vlgmr.msrb.gmra.mxu0 %vm612_vm1, %v763_v56 }
  0x63   : >> { %1197 = vmatmul.msk.bf16.vlgmr.msrb.gmra.mxu1 %vm612_vm1, %v763_v56 }
  0xcf   : >> { %v625_v6 = vpop.f32.mrf.mxu0 }
  0xd0   : >> { %v629_v8 = vadd.f32 %v625_v6, %v592_v3  ;;  %v674_v9 = vpop.f32.mrf.mxu1 }
  0xd1   : >> { %v678_v10 = vadd.f32 %v1131_v5, %v674_v9 }
  0xd2   : >> { %v633_v11 = vadd.f32 %v631_v4, %v629_v8 }
  0xd3   : >> { %v682_v12 = vadd.f32 %v680_v7, %v678_v10 }
  0xd4   : >> { %v1143_v47 = vmul.f32 -1.442695, %v633_v11 }
  0xd5   : >> { %v1153_v49 = vmul.f32 -1.442695, %v682_v12  ;;  %v788_v50 = vpop.f32.mrf.mxu3 }
  0xd6   : >> { %1292 = vpow2.f32 %v1143_v47  ;;  %v792_v51 = vadd.f32 %v788_v50, %v756_v46  ;;  %v703_v46 = vperm.slane %v1656_v40, 0 }
  0xd7   : >> { %1294 = vpow2.f32 %v1153_v49  ;;  %v627_v52 = vpop.f32.mrf.mxu0  ;;  %v726_v55 = vpop.f32.mrf.mxu2 }
  0xd8   : >> { %v796_v53 = vadd.f32 %v794_v48, %v792_v51  ;;  %v676_v54 = vpop.f32.mrf.mxu1 }
  0xda   : >> { %v1178_v56 = vmul.f32 -1.442695, %v796_v53 }
  0xdc   : >> { %v1293_v57 = vpop.eup %1292  ;;  %1296 = vpow2.f32 %v1178_v56  ;;  %v727_v56 = vadd.f32 %v726_v55, %v703_v46 }
  0xdd   : >> { %v1295_v58 = vpop.eup %1294  ;;  %v637_v59 = vadd.f32 1.0, %v1293_v57  ;;  %v790_v60 = vpop.f32.mrf.mxu3 }
  0xde   : >> { %v1753_v62 = vadd.f32 1.0, %v1295_v58 }
  0xdf   : >> { %1298 = vrcp.f32 %v637_v59  ;;  %v837_v0 = vpop.f32.mrf.mxu0  ;;  %v728_v3 = vpop.f32.mrf.mxu2  ;;  %v649_v49 = vand.u32 2147483648, %v637_v59  ;;  %v647_v51 = vand.u32 2147483647, %v637_v59  ;;  %vm643_vm5 = vweird.f32 %v637_v59 }
  0xe0   : >> { %1300 = vrcp.f32 %v1753_v62  ;;  %v841_v1 = vadd.f32 %v1166_v61, %v837_v0  ;;  %v889_v2 = vpop.f32.mrf.mxu1  ;;  %v1133_v3 = vld [vmem:[%s1735_s14 + $0x14] sm:$0x3]  ;;  %vm692_vm11 = vweird.f32 %v1753_v62 }
  0xe1   : >> { %v650_v61 = vor.u32 1.1754944e-38, %v649_v49  ;;  %vm648_vm7 = vcmp.eq.f32.partialorder %v647_v51, 8.507059e+37 }
  0xe2   : >> { %v1297_v4 = vpop.eup %1296  ;;  %v845_v5 = vadd.f32 %v843_v63, %v841_v1  ;;  %v866_v1 = vperm.slane %v1671_v43, 0 }
  0xe3   : >> { %v800_v6 = vadd.f32 1.0, %v1297_v4 }
  0xe4   : >> { %v1188_v7 = vmul.f32 -1.442695, %v845_v5  ;;  %v890_v46 = vadd.f32 %v889_v2, %v866_v1  ;;  %v1289_v1 = vpop.permute.xlu0 %1288 }
  0xe5   : >> { %v1299_v8 = vpop.eup %1298  ;;  %1302 = vrcp.f32 %v800_v6  ;;  %v812_v5 = vand.u32 2147483648, %v800_v6  ;;  %vm806_vm9 = vweird.f32 %v800_v6 }
  0xe6   : >> { %v1757_v9 = vpop.eup %1300  ;;  %1304 = vpow2.f32 %v1188_v7  ;;  %v639_v10 = vmul.f32 %v1299_v8, %v637_v59  ;;  %vm644_vm4 = vweird.f32 %v1299_v8  ;;  %v810_v59 = vand.u32 2147483647, %v800_v6 }
  0xe7   : >> { %v839_v11 = vpop.f32.mrf.mxu0  ;;  %v688_v48 = vmul.f32 %v1757_v9, %v1753_v62  ;;  %vm645_vm6 = vmor %vm643_vm5, %vm644_vm4  ;;  %vm693_vm12 = vweird.f32 %v1757_v9  ;;  %vm746_vm4 = vcmask 254976  }
  0xe8   : >> { %v640_v12 = vsub.f32 1.0, %v639_v10  ;;  %v891_v47 = vpop.f32.mrf.mxu1  ;;  %vm811_vm13 = vcmp.eq.f32.partialorder %v810_v59, 8.507059e+37  ;;  %vm694_vm14 = vmor %vm692_vm11, %vm693_vm12 }
  0xe9   : >> { %v689_v58 = vsub.f32 1.0, %v688_v48  ;;  %v698_v48 = vand.u32 2147483648, %v1753_v62 }
  0xea   : >> { %v641_v50 = vmul.f32 %v1299_v8, %v640_v12 }
  0xeb   : >> { %v1303_v52 = vpop.eup %1302  ;;  %v690_v55 = vmul.f32 %v1757_v9, %v689_v58  ;;  %v699_v58 = vor.u32 1.1754944e-38, %v698_v48 }
  0xec   : >> { %v1305_v53 = vpop.eup %1304  ;;  %v642_v54 = vadd.f32 %v1299_v8, %v641_v50  ;;  %v802_v57 = vmul.f32 %v1303_v52, %v800_v6  ;;  %vm807_vm8 = vweird.f32 %v1303_v52  ;;  %v1168_v50 = vld [vmem:[%s1748_s20 + $0x14] sm:$0x3] }
  0xed   : >> { %v849_v60 = vadd.f32 1.0, %v1305_v53  ;;  %vm808_vm10 = vmor %vm806_vm9, %vm807_vm8  ;;  %v691_v53 = vadd.f32 %v1757_v9, %v690_v55 }
  0xee   : >> { %v646_v63 = vsel %vm645_vm6, %v1299_v8, %v642_v54  ;;  %v803_v0 = vsub.f32 1.0, %v802_v57  ;;  %v813_v8 = vor.u32 1.1754944e-38, %v812_v5  ;;  %v696_v54 = vand.u32 2147483647, %v1753_v62 }
  0xef   : >> { %1306 = vrcp.f32 %v849_v60  ;;  %v651_v4 = vsel %vm648_vm7, %v650_v61, %v646_v63  ;;  %v695_v61 = vsel %vm694_vm14, %v1757_v9, %v691_v53  ;;  %v861_v5 = vand.u32 2147483648, %v849_v60 }
  0xf0   : >> { %v730_v7 = vmul.f32 %v727_v56, %v651_v4  ;;  %v804_v10 = vmul.f32 %v1303_v52, %v803_v0  ;;  %vm697_vm15 = vcmp.eq.f32.partialorder %v696_v54, 8.507059e+37  ;;  %vm855_vm1 = vweird.f32 %v849_v60 }
  0xf2   : >> { %v731_v11 = vadd.f32 %v1133_v3, %v730_v7  ;;  %v805_v12 = vadd.f32 %v1303_v52, %v804_v10  ;;  %v700_v3 = vsel %vm697_vm15, %v699_v58, %v695_v61  ;;  %v859_v7 = vand.u32 2147483647, %v849_v60 }
  0xf3   : >> { %v1290_v10 = vunpack.i.l.bf16 %v1289_v1 }
  0xf4   : >> { %1308 = vtanh.f32 %v731_v11  ;;  %v809_v47 = vsel %vm808_vm10, %v1303_v52, %v805_v12  ;;  %v862_v11 = vor.u32 1.1754944e-38, %v861_v5  ;;  %vm860_vm3 = vcmp.eq.f32.partialorder %v859_v7, 8.507059e+37 }
  0xf5   : >> { %v1307_v49 = vpop.eup %1306  ;;  %v814_v51 = vsel %vm811_vm13, %v813_v8, %v809_v47 }
  0xf6   : >> { %v851_v6 = vmul.f32 %v1307_v49, %v849_v60  ;;  %v893_v2 = vmul.f32 %v890_v46, %v814_v51  ;;  %vm856_vm0 = vweird.f32 %v1307_v49 }
  0xf7   : >> { %vm857_vm2 = vmor %vm855_vm1, %vm856_vm0 }
  0xf8   : >> { %v852_v56 = vsub.f32 1.0, %v851_v6  ;;  %v894_v57 = vadd.f32 %v1168_v50, %v893_v2  ;;  %v1291_v50 = vunpack.i.h.bf16 %v1289_v1 }
  0xfa   : >> { %v1309_v52 = vpop.eup %1308  ;;  %1310 = vtanh.f32 %v894_v57  ;;  %v853_v63 = vmul.f32 %v1307_v49, %v852_v56 }
  0xfb   : >> { %v733_v0 = vsub.f32 %v1370_v44, %v1309_v52 }
  0xfc   : >> { %v854_v4 = vadd.f32 %v1307_v49, %v853_v63 }
  0xfd   : >> { %v734_v62 = vmul.f32 %v733_v0, %v700_v3 }
  0xfe   : >> { %v858_v9 = vsel %vm857_vm2, %v1307_v49, %v854_v4 }
  0xff   : >> { %v735_v59 = vadd.f32 %v1309_v52, %v734_v62  ;;  %v863_v8 = vsel %vm860_vm3, %v862_v11, %v858_v9 }
 0x100   : >> { %v1311_v55 = vpop.eup %1310 }
 0x101   : >> { %v736_v12 = vsub.f32 %v735_v59, %v1370_v44  ;;  %v896_v46 = vsub.f32 %v1366_v45, %v1311_v55 }
 0x103   : >> { %v742_v47 = vmul.f32 %v1290_v10, %v736_v12  ;;  %v897_v48 = vmul.f32 %v896_v46, %v863_v8 }
 0x105   : >> { %v743_v60 = vadd.f32 %v1370_v44, %v742_v47   ;;  %v898_v51 = vadd.f32 %v1311_v55, %v897_v48 }
 0x107   : >> { %v744_v49 = vmul.f32 %v1290_v10, %v743_v60  ;;  %v899_v53 = vsub.f32 %v898_v51, %v1366_v45  ;;  %v1830_v44 = vmov %v743_v60  ;;  %911 = vst.msk [vmem:[#allocation2] sm:$0x3] (%p579_p0), %vm746_vm4, %v743_v60 }
 0x109   : >> { %747 = vst.msk [vmem:[%s745_s23] sm:$0x3] %vm746_vm4, %v744_v49  ;;  %v905_v54 = vmul.f32 %v1291_v50, %v899_v53 }
 0x10b   : >> { %v906_v6 = vadd.f32 %v1366_v45, %v905_v54   ;;  %581 = sbr.rel (!%p579_p0) target bundleno = 73 (0x49), region = 219 }
 0x10d   : >> { %v907_v2 = vmul.f32 %v1291_v50, %v906_v6  ;;  %v1829_v45 = vmov %v906_v6  ;;  %912 = vst.msk [vmem:[#allocation3] sm:$0x3] (%p579_p0), %vm746_vm4, %v906_v6 }
 0x10f   : >> { %909 = vst.msk [vmem:[%s908_s24] sm:$0x3] %vm746_vm4, %v907_v2 }
 0x110   : > { %916 = sbr.rel (%p1198_p1) target bundleno = 280 (0x118), region = 137 }
 0x115   : > { %v917_v44 = vld [vmem:[#allocation2] sm:$0x3]  ;;  %v919_v56 = vld [vmem:[#allocation3] sm:$0x3] }
 0x116   : > { %918 = vst.msk [vmem:[%s1826_s7] sm:$0x3] %vm746_vm4, %v917_v44 }
 0x117   : > { %1199 = vst.msk [vmem:[%s1826_s7 + $0x2] sm:$0x3] %vm746_vm4, %v919_v56 }
 0x118 PF: > { %p15_p2 = scmp.ge.s32.totalorder %s1448_s30, 4   ;;  %s1831_s24 = smov %s1350_s25 }
 0x119   : > { %s1832_s25 = smov %s1467_s15  ;;  %s1833_s26 = smov %s1358_s27 }
 0x11a   : > { %s1834_s27 = smov %s1458_s11  ;;  %s1835_s28 = smov %s1448_s30 }
 0x11b   :  { %17 = sbr.rel (!%p15_p2) target bundleno = 3 (0x3), region = 230 }

// kernel: rnn_seq2seq_forward.13
= control target key start
LH: loop header
LB: loop body
LE: loop exit
PB: predicated region body
PF: predicated region fallthrough
CT: control target
= control target key end

     0   :  { %s471_s12 = smov 0   ;;  %s473_s13 = smov 0   ;;  %s513_s0 = inlined_call_operand.vmem [shape: bf16[14,16], index: 0, kind: input, shape index: {}]   ;;  %s514_s1 = inlined_call_operand.vmem [shape: bf16[3,16,32], index: 1, kind: input, shape index: {}]   ;;  %s515_s2 = inlined_call_operand.vmem [shape: f32[3,1,32], index: 2, kind: input, shape index: {}]   ;;  %s516_s3 = inlined_call_operand.vmem [shape: f32[3,14,32], index: 3, kind: output, shape index: {}]  }
   0x1   :  { %s475_s14 = smov 0  }
   0x2 LB: > { %s22_s15 = sadd.s32 1, %s445_s13  ;;  %p382_p0 = scmp.ge.s32.totalorder %s449_s14, 1  ;;  %s449_s14 = sphi %s475_s14, %s13_s14   ;;  %s445_s13 = sphi %s473_s13, %s518_s13   ;;  %s441_s12 = sphi %s471_s12, %s517_s12  }
   0x3   : > { %p23_p1 = scmp.ge.s32.totalorder %s22_s15, 3  ;;  %p170_p2 = scmp.lt.s32.totalorder %s449_s14, 4 }
   0x5   : > { %s520_s15 = smov (%p23_p1, %s22_s15), 0  ;;  %p171_p3 = pnand %p382_p0, %p170_p2 }
   0x6   : > { %p212_p4 = scmp.lt.s32.totalorder (!%p171_p3), %s441_s12, 2 }
   0x7   : > { %174 = sbr.rel (%p171_p3) target bundleno = 156 (0x9c), region = 32 }
   0xc   : > { %s522_s12 = smov (!%p212_p4, %s441_s12), 2  ;;  %v389_v0 = vld [vmem:[%s513_s0] sm:$0xf]  ;;  %v400_v1 = vld [vmem:[%s513_s0] sm:$0x70]  ;;  %vm250_vm0 = vcmask 130048  }
   0xd   : > { %s398_s16 = sshll.u32 %s522_s12, 3  ;;  %s219_s23 = scalar_lea.vmem %s515_s2, %s522_s12  ;;  %v390_v3 = vor.u32 %v400_v1, %v389_v0  ;;  %vm268_vm1 = vcmask 261120   ;;  %vm270_vm2 = vcmask 259072  }
   0xe   : > { %s216_s26 = scalar_lea.vmem %s514_s1, %s398_s16  ;;  %s399_s27 = sshll.u32 %s522_s12, 4  ;;  %v426_v4 = vld [vmem:[%s219_s23] ss:$0 sm:$0xff] }
   0xf   : > { %v401_v2 = vld [vmem:[%s216_s26] sm:$0xff]  ;;  %s228_s30 = scalar_lea.vmem %s516_s3, %s399_s27 }
  0x10   : > { %261 = vmatpush.bf16.msra.mxu0 %v401_v2 }
  0x13   : > { %395 = vmatmul.msk.bf16.vlgmr.msra.gmra.mxu0 %vm250_vm0, %v390_v3 }
  0x90   : > { %v263_v5 = vpop.f32.mrf.mxu0 }
  0x91   : > { %v264_v6 = vadd.f32 %v426_v4, %v263_v5 }
  0x93   : > { %269 = vst.msk [vmem:[%s228_s30] sm:$0xff] %vm268_vm1, %v264_v6 }
  0x98   : > { %v265_v7 = vpop.f32.mrf.mxu0 }
  0x99   : > { %v266_v8 = vadd.f32 %v426_v4, %v265_v7 }
  0x9b   : > { %271 = vst.msk [vmem:[%s228_s30 + $0x8] sm:$0x3f] %vm270_vm2, %v266_v8 }
  0x9c PF: > { %s13_s14 = sadd.s32 1, %s449_s14   ;;  %s517_s12 = smov %s445_s13 }
  0x9d   : > { %p10_p5 = scmp.ge.s32.totalorder %s13_s14, 5   ;;  %s518_s13 = smov %s520_s15 }
  0x9f   :  { %12 = sbr.rel (!%p10_p5) target bundleno = 2 (0x2), region = 68 }

// kernel: rnn_seq2seq_forward.12
= control target key start
LH: loop header
LB: loop body
LE: loop exit
PB: predicated region body
PF: predicated region fallthrough
CT: control target
= control target key end

     0   :  { %vm51_vm0 = vcmask 261120   ;;  %vm124_vm1 = vcmask 257024   ;;  %s243_s3 = inlined_call_operand.vmem [shape: bf16[32,32], index: 3, kind: input, shape index: {}]   ;;  %s244_s2 = inlined_call_operand.vmem [shape: bf16[32,32], index: 2, kind: input, shape index: {}]   ;;  %s245_s1 = inlined_call_operand.vmem [shape: f32[20,32], index: 1, kind: input, shape index: {}]   ;;  %s246_s0 = inlined_call_operand.vmem [shape: f32[20,32], index: 0, kind: input, shape index: {}]   ;;  %s247_s4 = inlined_call_operand.vmem [shape: f32[1,32], index: 4, kind: input, shape index: {}]   ;;  %s248_s5 = inlined_call_operand.vmem [shape: f32[20,32], index: 5, kind: output, shape index: {}]  }
   0x1   :  { %v153_v0 = vld [vmem:[%s243_s3 + $0x8] sm:$0xff]  ;;  %v152_v2 = vld [vmem:[%s243_s3] sm:$0xff]  ;;  %v32_v6 = vld [vmem:[%s245_s1 + $0x10] sm:$0xf] }
   0x2   :  { %v151_v1 = vld [vmem:[%s244_s2 + $0x8] sm:$0xff]  ;;  %v150_v3 = vld [vmem:[%s244_s2] sm:$0xff]  ;;  %64 = vmatpush.bf16.msra.mxu0 %v153_v0  ;;  %154 = vmatpush.bf16.msra.mxu2 %v153_v0  ;;  %v23_v9 = vld [vmem:[%s246_s0 + $0x10] sm:$0xf]  ;;  %v34_v11 = vpack.c.bf16 %v32_v6, %v32_v6 }
   0x3   :  { %v30_v4 = vld [vmem:[%s245_s1] sm:$0xff]  ;;  %v31_v5 = vld [vmem:[%s245_s1 + $0x8] sm:$0xff]  ;;  %100 = vmatpush.bf16.msra.mxu1 %v151_v1  ;;  %156 = vmatpush.bf16.msra.mxu3 %v151_v1  ;;  %v25_v13 = vpack.c.bf16 %v23_v9, %v23_v9 }
   0x4   :  { %v21_v7 = vld [vmem:[%s246_s0] sm:$0xff]  ;;  %v22_v8 = vld [vmem:[%s246_s0 + $0x8] sm:$0xff]  ;;  %v33_v10 = vpack.c.bf16 %v31_v5, %v30_v4 }
   0x5   :  { %v24_v12 = vpack.c.bf16 %v22_v8, %v21_v7  ;;  %v158_v15 = vld [vmem:[%s247_s4] ss:$0 sm:$0xff] }
   0x6   :  { %65 = vmatpush.bf16.msra.mxu0 %v152_v2  ;;  %155 = vmatpush.bf16.msra.mxu2 %v152_v2 }
   0x7   :  { %101 = vmatpush.bf16.msra.mxu1 %v150_v3  ;;  %157 = vmatpush.bf16.msra.mxu3 %v150_v3 }
   0x9   :  { %138 = vmatmul.msk.bf16.vlgmr.msra.gmra.mxu0 %vm51_vm0, %v33_v10  ;;  %139 = vmatmul.msk.bf16.vlgmr.msra.gmra.mxu2 %vm51_vm0, %v34_v11 }
   0xa   :  { %148 = vmatmul.msk.bf16.vlgmr.msra.gmra.mxu1 %vm51_vm0, %v24_v12  ;;  %149 = vmatmul.msk.bf16.vlgmr.msra.gmra.mxu3 %vm51_vm0, %v25_v13 }
  0x86   :  { %v67_v14 = vpop.f32.mrf.mxu0 }
  0x87   :  { %v103_v16 = vpop.f32.mrf.mxu1 }
  0x88   :  { %v104_v17 = vadd.f32 %v103_v16, %v67_v14 }
  0x8a   :  { %v116_v18 = vadd.f32 %v158_v15, %v104_v17 }
  0x8c   :  { %159 = vtanh.f32 %v116_v18  ;;  %v72_v19 = vpop.f32.mrf.mxu2 }
  0x8d   :  { %v108_v20 = vpop.f32.mrf.mxu3 }
  0x8e   :  { %v109_v21 = vadd.f32 %v108_v20, %v72_v19  ;;  %v69_v22 = vpop.f32.mrf.mxu0 }
  0x8f   :  { %v105_v23 = vpop.f32.mrf.mxu1 }
  0x90   :  { %v118_v24 = vadd.f32 %v158_v15, %v109_v21  ;;  %v106_v25 = vadd.f32 %v105_v23, %v69_v22 }
  0x92   :  { %v160_v26 = vpop.eup %159  ;;  %161 = vtanh.f32 %v118_v24  ;;  %v117_v27 = vadd.f32 %v158_v15, %v106_v25 }
  0x93   :  { %122 = vst.msk [vmem:[%s248_s5] sm:$0xff] %vm51_vm0, %v160_v26 }
  0x94   :  { %163 = vtanh.f32 %v117_v27  ;;  %v74_v28 = vpop.f32.mrf.mxu2 }
  0x95   :  { %v110_v29 = vpop.f32.mrf.mxu3 }
  0x98   :  { %v162_v30 = vpop.eup %161 }
  0x99   :  { %125 = vst.msk [vmem:[%s248_s5 + $0x10] sm:$0xf] %vm124_vm1, %v162_v30 }
  0x9a   :  { %v164_v31 = vpop.eup %163 }
  0x9b   :  { %123 = vst.msk [vmem:[%s248_s5 + $0x8] sm:$0xff] %vm51_vm0, %v164_v31 }

// kernel: rnn_seq2seq_forward.14
= control target key start
LH: loop header
LB: loop body
LE: loop exit
PB: predicated region body
PF: predicated region fallthrough
CT: control target
= control target key end

     0   :  { %vm23_vm0 = vcmask 254976   ;;  %s472_s0 = inlined_call_operand.vmem [shape: f32[3,7,2,32], index: 0, kind: input, shape index: {}]   ;;  %s473_s1 = inlined_call_operand.vmem [shape: f32[2,32], index: 1, kind: input, shape index: {}]   ;;  %s474_s2 = inlined_call_operand.vmem [shape: bf16[3,32,32], index: 2, kind: input, shape index: {}]   ;;  %s475_s4 = inlined_call_operand.vmem [shape: f32[7,2,32], index: 4, kind: output, shape index: {}]   ;;  %s476_s3 = inlined_call_operand.vmem [shape: f32[3,1,32], index: 3, kind: input, shape index: {}]  }
   0x1   :  { %v22_v0 = vld [vmem:[%s473_s1] sm:$0x3]  ;;  %v353_v2 = vld [vmem:[%s474_s2] sm:$0xf0]  ;;  %v359_v3 = vld [vmem:[%s474_s2 + $0x8] sm:$0xf] }
   0x2   :  { %v348_v1 = vld [vmem:[%s474_s2] sm:$0xf]  ;;  %24 = vst.msk [vmem:[#allocation2] sm:$0x3] %vm23_vm0, %v22_v0  ;;  %v364_v4 = vld [vmem:[%s474_s2 + $0x8] sm:$0xf0] }
   0x3   :  { %v369_v5 = vld [vmem:[%s474_s2 + $0x10] sm:$0xf]  ;;  %v374_v6 = vld [vmem:[%s474_s2 + $0x10] sm:$0xf0]  ;;  %v379_v7 = vld [vmem:[%s474_s2 + $0x18] sm:$0xf] }
   0x4   :  { %v384_v8 = vld [vmem:[%s474_s2 + $0x18] sm:$0xf0]  ;;  %v389_v9 = vld [vmem:[%s474_s2 + $0x20] sm:$0xf]  ;;  %v394_v10 = vld [vmem:[%s474_s2 + $0x20] sm:$0xf0] }
   0x5   :  { %v399_v11 = vld [vmem:[%s474_s2 + $0x28] sm:$0xf]  ;;  %v404_v12 = vld [vmem:[%s474_s2 + $0x28] sm:$0xf0]  ;;  %v409_v13 = vld [vmem:[%s476_s3] sm:$0x1] }
   0x6   :  { %v414_v14 = vld [vmem:[%s476_s3 + $0x1] sm:$0x1]  ;;  %v419_v15 = vld [vmem:[%s476_s3 + $0x2] sm:$0x1]  ;;  %s423_s2 = smov 0  }
   0x9   :  { %v44_v16 = vld [vmem:[#allocation2] sm:$0x3]  }
   0xa LB: > { %v247_v17 = vor.u32 %v364_v4, %v359_v3  ;;  %v257_v18 = vor.u32 %v384_v8, %v379_v7  ;;  %v267_v19 = vor.u32 %v404_v12, %v399_v11  ;;  %v243_v20 = vor.u32 %v353_v2, %v348_v1  ;;  %s235_s3 = sshll.u32 %s315_s2, 1  ;;  %s50_s2 = sadd.s32 1, %s315_s2   ;;  %s315_s2 = sphi %s423_s2, %s50_s2   ;;  %v311_v16 = vphi %v44_v16, %v477_v16  }
   0xb   : > { %v253_v21 = vor.u32 %v374_v6, %v369_v5  ;;  %v263_v22 = vor.u32 %v394_v10, %v389_v9  ;;  %v61_v23 = vpack.c.bf16 %v311_v16, %v311_v16  ;;  %vm74_vm1 = vcmask 261120   ;;  %s451_s22 = scalar_lea.vmem %s472_s0, %s235_s3  ;;  %s198_s1 = scalar_lea.vmem %s475_s4, %s235_s3 }
   0xc   : > { %84 = vmatpush.bf16.msra.mxu0 %v247_v17  ;;  %133 = vmatpush.bf16.msra.mxu1 %v257_v18  ;;  %v54_v24 = vld [vmem:[%s451_s22] sm:$0x3]  ;;  %v237_v25 = vld [vmem:[%s451_s22 + $0xe] sm:$0x3]  ;;  %v93_v26 = vperm.slane %v409_v13, 0  ;;  %v142_v27 = vperm.slane %v414_v14, 0 }
   0xd   : > { %185 = vmatpush.bf16.msra.mxu2 %v267_v19  ;;  %v165_v48 = vperm.slane %v419_v15, 0  ;;  %v239_v58 = vld [vmem:[%s451_s22 + $0x1c] sm:$0x3]  ;;  %p47_p0 = scmp.ge.s32.totalorder %s50_s2, 7  }
  0x10   : > { %85 = vmatpush.bf16.msra.mxu0 %v243_v20  ;;  %134 = vmatpush.bf16.msra.mxu1 %v253_v21 }
  0x11   : > { %186 = vmatpush.bf16.msra.mxu2 %v263_v22 }
  0x13   : > { %248 = vmatmul.msk.bf16.vlgmr.msra.gmra.mxu0 %vm74_vm1, %v61_v23  ;;  %258 = vmatmul.msk.bf16.vlgmr.msra.gmra.mxu1 %vm74_vm1, %v61_v23 }
  0x14   : > { %268 = vmatmul.msk.bf16.vlgmr.msra.gmra.mxu2 %vm74_vm1, %v61_v23 }
  0x90   : > { %v87_v28 = vpop.f32.mrf.mxu0  ;;  %v136_v29 = vpop.f32.mrf.mxu1 }
  0x91   : > { %v91_v30 = vadd.f32 %v87_v28, %v54_v24  ;;  %v140_v31 = vadd.f32 %v237_v25, %v136_v29 }
  0x93   : > { %v95_v32 = vadd.f32 %v93_v26, %v91_v30  ;;  %v144_v33 = vadd.f32 %v142_v27, %v140_v31 }
  0x95   : > { %v249_v34 = vmul.f32 -1.442695, %v95_v32  ;;  %v259_v35 = vmul.f32 -1.442695, %v144_v33 }
  0x97   : > { %291 = vpow2.f32 %v249_v34  ;;  %v188_v36 = vpop.f32.mrf.mxu2 }
  0x98   : > { %293 = vpow2.f32 %v259_v35  ;;  %v89_v37 = vpop.f32.mrf.mxu0  ;;  %v138_v38 = vpop.f32.mrf.mxu1  ;;  %v189_v54 = vadd.f32 %v188_v36, %v165_v48 }
  0x9d   : > { %v292_v39 = vpop.eup %291 }
  0x9e   : > { %v294_v40 = vpop.eup %293  ;;  %v99_v41 = vadd.f32 1.0, %v292_v39 }
  0x9f   : > { %v148_v42 = vadd.f32 1.0, %v294_v40  ;;  %v190_v43 = vpop.f32.mrf.mxu2 }
  0xa0   : > { %295 = vrcp.f32 %v99_v41  ;;  %v111_v50 = vand.u32 2147483648, %v99_v41  ;;  %v109_v52 = vand.u32 2147483647, %v99_v41  ;;  %vm105_vm3 = vweird.f32 %v99_v41 }
  0xa1   : > { %297 = vrcp.f32 %v148_v42  ;;  %vm154_vm6 = vweird.f32 %v148_v42  ;;  %v160_v63 = vand.u32 2147483648, %v148_v42  ;;  %v158_v17 = vand.u32 2147483647, %v148_v42 }
  0xa2   : > { %v112_v56 = vor.u32 1.1754944e-38, %v111_v50  ;;  %vm110_vm5 = vcmp.eq.f32.partialorder %v109_v52, 8.507059e+37 }
  0xa3   : > { %v161_v18 = vor.u32 1.1754944e-38, %v160_v63  ;;  %vm159_vm9 = vcmp.eq.f32.partialorder %v158_v17, 8.507059e+37 }
  0xa6   : > { %v296_v44 = vpop.eup %295 }
  0xa7   : > { %v298_v45 = vpop.eup %297  ;;  %v101_v46 = vmul.f32 %v296_v44, %v99_v41  ;;  %vm106_vm2 = vweird.f32 %v296_v44 }
  0xa8   : > { %v150_v49 = vmul.f32 %v298_v45, %v148_v42  ;;  %vm107_vm4 = vmor %vm105_vm3, %vm106_vm2  ;;  %vm155_vm7 = vweird.f32 %v298_v45 }
  0xa9   : > { %v102_v47 = vsub.f32 1.0, %v101_v46  ;;  %vm156_vm8 = vmor %vm154_vm6, %vm155_vm7 }
  0xaa   : > { %v151_v55 = vsub.f32 1.0, %v150_v49 }
  0xab   : > { %v103_v51 = vmul.f32 %v296_v44, %v102_v47 }
  0xac   : > { %v152_v61 = vmul.f32 %v298_v45, %v151_v55 }
  0xad   : > { %v104_v53 = vadd.f32 %v296_v44, %v103_v51 }
  0xae   : > { %v153_v0 = vadd.f32 %v298_v45, %v152_v61 }
  0xaf   : > { %v108_v57 = vsel %vm107_vm4, %v296_v44, %v104_v53 }
  0xb0   : > { %v113_v59 = vsel %vm110_vm5, %v112_v56, %v108_v57  ;;  %v157_v19 = vsel %vm156_vm8, %v298_v45, %v153_v0 }
  0xb1   : > { %v192_v60 = vmul.f32 %v189_v54, %v113_v59  ;;  %v162_v22 = vsel %vm159_vm9, %v161_v18, %v157_v19 }
  0xb3   : > { %v193_v62 = vadd.f32 %v239_v58, %v192_v60 }
  0xb5   : > { %299 = vtanh.f32 %v193_v62 }
  0xbb   : > { %v300_v20 = vpop.eup %299 }
  0xbc   : > { %v195_v21 = vsub.f32 %v311_v16, %v300_v20 }
  0xbe   : > { %v196_v23 = vmul.f32 %v195_v21, %v162_v22  ;;  %49 = sbr.rel (!%p47_p0) target bundleno = 10 (0xa), region = 55 }
  0xc0   : > { %v197_v24 = vadd.f32 %v300_v20, %v196_v23  }
  0xc2   : > { %200 = vst.msk [vmem:[%s198_s1] sm:$0x3] %vm23_vm0, %v197_v24  ;;  %v477_v16 = vmov %v197_v24 }
  0xc3   :  { %202 = vst.msk [vmem:[#allocation2] sm:$0x3] %vm23_vm0, %v197_v24 }

// kernel: rnn_seq2seq_forward.15
= control target key start
LH: loop header
LB: loop body
LE: loop exit
PB: predicated region body
PF: predicated region fallthrough
CT: control target
= control target key end

     0   :  { %s412_s12 = smov 0   ;;  %s444_s0 = inlined_call_operand.vmem [shape: f32[2,7,32], index: 0, kind: input, shape index: {}]   ;;  %s445_s1 = inlined_call_operand.vmem [shape: f32[2,10,32], index: 1, kind: input, shape index: {}]   ;;  %s446_s2 = inlined_call_operand.vmem [shape: f32[2,1,10], index: 2, kind: input, shape index: {}]   ;;  %s447_s3 = inlined_call_operand.vmem [shape: f32[2,7,32], index: 3, kind: output, shape index: {}]  }
   0x1 LB: > { %s354_s13 = sadd.s32 4294967295, %s390_s12   ;;  %p358_p0 = scmp.ge.s32.totalorder %s390_s12, 1  ;;  %s390_s12 = sphi %s412_s12, %s13_s12  }
   0x2   : > { %p154_p1 = scmp.lt.s32.totalorder %s390_s12, 3 }
   0x4   : > { %p155_p2 = pnand %p358_p0, %p154_p1 }
   0x5   : > { %p184_p3 = scmp.lt.s32.totalorder (!%p155_p2), %s354_s13, 1 }
   0x6   : > { %158 = sbr.rel (%p155_p2) target bundleno = 530 (0x212), region = 32 }
   0xb   : > { %s449_s13 = smov (!%p184_p3, %s354_s13), 1  ;;  %vm204_vm0 = vcmask 261120   ;;  %vm239_vm2 = vcmask 79872   ;;  %vm255_vm3 = vcmask 1041408   ;;  %vm251_vm4 = vcmask 80896  }
   0xc   : > { %s370_s14 = sshll.u32 %s449_s13, 4  ;;  %s359_s18 = sshll.u32 %s449_s13, 3  ;;  %vm278_vm5 = vcmask 260096  }
   0xd   : > { %s192_s17 = scalar_lea.vmem %s445_s1, %s370_s14  ;;  %s195_s21 = scalar_lea.vmem %s446_s2, %s449_s13 }
   0xe   : > { %v202_v0 = vld [vmem:[%s192_s17 + $0x8] sm:$0x3]  ;;  %v201_v1 = vld [vmem:[%s192_s17] sm:$0xff]  ;;  %s187_s24 = scalar_lea.vmem %s444_s0, %s359_s18  ;;  %s199_s27 = scalar_lea.vmem %s447_s3, %s359_s18 }
   0xf   : > { %363 = vmatpush.xpose.msk.msra.mxu0 %vm204_vm0, %v202_v0  ;;  %v200_v2 = vld [vmem:[%s187_s24] sm:$0x7f]  ;;  %366 = vmatpush.msk.msra.mxu1 %vm255_vm3, %v202_v0 }
  0x10   : > { %v379_v3 = vld [vmem:[%s195_s21] ss:$0 sm:$0xff] }
  0x11   : > { %vm237_vm1 = vcmp.gt.f32.partialorder %v379_v3, 0.5  ;;  %273 = vmatpush.msra.mxu1 %v201_v1 }
  0x13   : > { %364 = vmatpush.xpose.msk.msra.mxu0 %vm204_vm0, %v201_v1 }
  0x16   : > { %365 = vmatmul.msk.f32.vlgmr.msra.gmra.mxu0 %vm204_vm0, %v200_v2 }
  0x93   : > { %v231_v4 = vpop.f32.mrf.mxu0 }
  0x94   : > { %v238_v5 = vsel %vm237_vm1, -1e+30, %v231_v4 }
  0x95   : > { %v240_v6 = vsel %vm239_vm2, %v238_v5, -inf }
  0x96   : > { %241 = vmax.xlane.f32.xlu0 %v240_v6 }
 0x109   : > { %v242_v7 = vpop.xlane.xlu0 %241 }
 0x10a   : > { %v243_v8 = vsub.f32 %v238_v5, %v242_v7 }
 0x10c   : > { %v244_v9 = vmul.f32 1.442695, %v243_v8 }
 0x10e   : > { %380 = vpow2.f32 %v244_v9 }
 0x114   : > { %v381_v10 = vpop.eup %380 }
 0x115   : > { %v246_v11 = vsel %vm239_vm2, %v381_v10, 0.0 }
 0x116   : > { %247 = vadd.xlane.f32.xlu0 %v246_v11 }
 0x189   : > { %v248_v12 = vpop.xlane.xlu0 %247 }
 0x18a   : > { %382 = vrcp.f32 %v248_v12 }
 0x190   : > { %v383_v13 = vpop.eup %382 }
 0x191   : > { %v250_v14 = vmul.f32 %v383_v13, %v381_v10 }
 0x193   : > { %367 = vmatmul.msk.f32.vlgmr.msra.gmra.mxu1 %vm251_vm4, %v250_v14 }
 0x210   : > { %v275_v15 = vpop.f32.mrf.mxu1 }
 0x211   : > { %279 = vst.msk [vmem:[%s199_s27] sm:$0x7f] %vm278_vm5, %v275_v15 }
 0x212 PF: > { %s13_s12 = sadd.s32 1, %s390_s12  }
 0x213   : > { %p10_p4 = scmp.ge.s32.totalorder %s13_s12, 4  }
 0x215   :  { %12 = sbr.rel (!%p10_p4) target bundleno = 1 (0x1), region = 68 }

// kernel: rnn_seq2seq_forward.16
= control target key start
LH: loop header
LB: loop body
LE: loop exit
PB: predicated region body
PF: predicated region fallthrough
CT: control target
= control target key end

     0   :  { %vm47_vm0 = vcmask 261120   ;;  %vm103_vm1 = vcmask 259072   ;;  %s202_s3 = inlined_call_operand.vmem [shape: bf16[32,32], index: 3, kind: input, shape index: {}]   ;;  %s203_s2 = inlined_call_operand.vmem [shape: bf16[32,32], index: 2, kind: input, shape index: {}]   ;;  %s204_s1 = inlined_call_operand.vmem [shape: f32[14,32], index: 1, kind: input, shape index: {}]   ;;  %s205_s0 = inlined_call_operand.vmem [shape: f32[14,32], index: 0, kind: input, shape index: {}]   ;;  %s206_s4 = inlined_call_operand.vmem [shape: f32[1,32], index: 4, kind: input, shape index: {}]   ;;  %s207_s5 = inlined_call_operand.vmem [shape: f32[14,32], index: 5, kind: output, shape index: {}]  }
   0x1   :  { %v130_v0 = vld [vmem:[%s202_s3 + $0x8] sm:$0xff]  ;;  %v129_v2 = vld [vmem:[%s202_s3] sm:$0xff] }
   0x2   :  { %v128_v1 = vld [vmem:[%s203_s2 + $0x8] sm:$0xff]  ;;  %v127_v3 = vld [vmem:[%s203_s2] sm:$0xff]  ;;  %57 = vmatpush.bf16.msra.mxu0 %v130_v0 }
   0x3   :  { %v28_v4 = vld [vmem:[%s204_s1] sm:$0xff]  ;;  %86 = vmatpush.bf16.msra.mxu1 %v128_v1  ;;  %v29_v5 = vld [vmem:[%s204_s1 + $0x8] sm:$0x3f] }
   0x4   :  { %v21_v6 = vld [vmem:[%s205_s0] sm:$0xff]  ;;  %v22_v7 = vld [vmem:[%s205_s0 + $0x8] sm:$0x3f]  ;;  %v30_v8 = vpack.c.bf16 %v29_v5, %v28_v4 }
   0x5   :  { %v23_v9 = vpack.c.bf16 %v22_v7, %v21_v6  ;;  %v131_v10 = vld [vmem:[%s206_s4] ss:$0 sm:$0xff] }
   0x6   :  { %58 = vmatpush.bf16.msra.mxu0 %v129_v2 }
   0x7   :  { %87 = vmatpush.bf16.msra.mxu1 %v127_v3 }
   0x9   :  { %117 = vmatmul.msk.bf16.vlgmr.msra.gmra.mxu0 %vm47_vm0, %v30_v8 }
   0xa   :  { %126 = vmatmul.msk.bf16.vlgmr.msra.gmra.mxu1 %vm47_vm0, %v23_v9 }
  0x86   :  { %v60_v11 = vpop.f32.mrf.mxu0 }
  0x87   :  { %v89_v12 = vpop.f32.mrf.mxu1 }
  0x88   :  { %v90_v13 = vadd.f32 %v89_v12, %v60_v11 }
  0x8a   :  { %v98_v14 = vadd.f32 %v131_v10, %v90_v13 }
  0x8c   :  { %132 = vtanh.f32 %v98_v14 }
  0x8e   :  { %v62_v15 = vpop.f32.mrf.mxu0 }
  0x8f   :  { %v91_v16 = vpop.f32.mrf.mxu1 }
  0x90   :  { %v92_v17 = vadd.f32 %v91_v16, %v62_v15 }
  0x92   :  { %v133_v18 = vpop.eup %132  ;;  %v99_v19 = vadd.f32 %v131_v10, %v92_v17 }
  0x93   :  { %102 = vst.msk [vmem:[%s207_s5] sm:$0xff] %vm47_vm0, %v133_v18 }
  0x94   :  { %134 = vtanh.f32 %v99_v19 }
  0x9a   :  { %v135_v20 = vpop.eup %134 }
  0x9b   :  { %104 = vst.msk [vmem:[%s207_s5 + $0x8] sm:$0x3f] %vm103_vm1, %v135_v20 }

// kernel: rnn_seq2seq_forward.17
= control target key start
LH: loop header
LB: loop body
LE: loop exit
PB: predicated region body
PF: predicated region fallthrough
CT: control target
= control target key end

     0   :  { %s760_s15 = smov 0   ;;  %s762_s16 = smov 0   ;;  %s872_s0 = inlined_call_operand.vmem [shape: f32[14,32], index: 0, kind: input, shape index: {}]   ;;  %s873_s1 = inlined_call_operand.vmem [shape: s32[14,1], index: 1, kind: input, shape index: {}]   ;;  %s874_s2 = inlined_call_operand.vmem [shape: bf16[32,256], index: 2, kind: input, shape index: {}]   ;;  %s875_s3 = inlined_call_operand.vmem [shape: f32[1,256], index: 3, kind: input, shape index: {}]   ;;  %s876_s4 = inlined_call_operand.vmem [shape: f32[14,1], index: 4, kind: output, shape index: {}]  }
   0x1   :  { %s764_s17 = smov 0   ;;  %s766_s18 = smov 0  }
   0x2   :  { %s768_s19 = smov 0  }
   0x3 LB: > { %s23_s20 = sadd.s32 1, %s724_s18  ;;  %p92_p1 = scmp.ne.s32.totalorder %s716_s16, %s712_s15  ;;  %s728_s19 = sphi %s768_s19, %s14_s19   ;;  %s724_s18 = sphi %s766_s18, %s880_s18   ;;  %s720_s17 = sphi %s764_s17, %s879_s17   ;;  %s716_s16 = sphi %s762_s16, %s878_s16   ;;  %s712_s15 = sphi %s760_s15, %s877_s15  }
   0x4   : > { %p24_p0 = scmp.ge.s32.totalorder %s23_s20, 2  ;;  %p93_p2 = scmp.eq.s32.totalorder %s728_s19, 0 }
   0x5   : > { %s85_s22 = sadd.s32 1, %s716_s16  ;;  %p602_p5 = scmp.ge.s32.totalorder %s728_s19, 2 }
   0x6   : > { %s882_s20 = smov (%p24_p0, %s23_s20), 0  ;;  %p94_p3 = por %p93_p2, %p92_p1 }
   0x7   : > { %s82_s21 = ssub.s32 %s724_s18, %s882_s20  ;;  %188 = sbr.rel (%p602_p5) target bundleno = 20 (0x14), region = 24 }
   0x8   : > { %p83_p4 = scmp.eq.s32.totalorder %s82_s21, 0 }
   0xa   : > { %s795_s23 = scalar_select %p83_p4, %s716_s16, %s85_s22  }
   0xc   : > { %191 = sbr.rel (!%p94_p3) target bundleno = 20 (0x14), region = 28  ;;  %s193_s24 = sand.u32 (%p94_p3), 1, %s716_s16  }
   0xd   : > { %s604_s25 = sshll.u32 (%p94_p3), %s724_s18, 2  ;;  %s603_s26 = sshll.u32 (%p94_p3), %s193_s24, 4 }
   0xe   : > { %s197_s29 = scalar_lea.vmem (%p94_p3), %s874_s2, %s604_s25  ;;  %s195_s30 = scalar_lea.vmem (%p94_p3), [#allocation5], %s603_s26 }
   0xf   : > { %v214_v0 = vld [vmem:[%s197_s29] sm:$0xf] (%p94_p3)  ;;  %v216_v1 = vld [vmem:[%s197_s29 + $0x8] sm:$0xf] (%p94_p3)  ;;  %v218_v2 = vld [vmem:[%s197_s29 + $0x10] sm:$0xf] (%p94_p3) }
  0x10   : > { %215 = vst [vmem:[%s195_s30] sm:$0xf] (%p94_p3), %v214_v0  ;;  %v220_v3 = vld [vmem:[%s197_s29 + $0x18] sm:$0xf] (%p94_p3) }
  0x11   : > { %217 = vst [vmem:[%s195_s30 + $0x4] sm:$0xf] %v216_v1 }
  0x12   : > { %219 = vst [vmem:[%s195_s30 + $0x8] sm:$0xf] %v218_v2 }
  0x13   : > { %221 = vst [vmem:[%s195_s30 + $0xc] sm:$0xf] %v220_v3 }
  0x14 PF: > { %p605_p6 = scmp.ge.s32.totalorder %s728_s19, 1  ;;  %p258_p7 = scmp.lt.s32.totalorder %s728_s19, 3 }
  0x16   : > { %p259_p8 = pnand %p605_p6, %p258_p7 }
  0x17   : > { %s265_s5 = sand.u32 (!%p259_p8), 1, %s712_s15   ;;  %p315_p9 = scmp.lt.s32.totalorder (!%p259_p8), %s720_s17, 1 }
  0x18   : > { %262 = sbr.rel (%p259_p8) target bundleno = 585 (0x249), region = 73  ;;  %s606_s6 = sshll.u32 (!%p259_p8), %s265_s5, 4 }
  0x19   : > { %s267_s11 = scalar_lea.vmem (!%p259_p8), [#allocation5], %s606_s6  ;;  %p607_p10 = scmp.ne.s32.totalorder (!%p259_p8), %s720_s17, 0 }
  0x1d   : > { %s808_s7 = scalar_select %p315_p9, %s720_s17, 1 }
  0x1e   : > { %328 = sbr.rel (%p607_p10) target bundleno = 42 (0x2a), region = 81 }
  0x1f   : > { %s317_s10 = scalar_lea.vmem %s875_s3, %s808_s7 }
  0x23   : > { %vm329_vm0 = vcmask 7168   ;;  %vm331_vm1 = vcmask 5120   ;;  %v730_v4 = vmov -1e+30   ;;  %v731_v5 = vmov 0.0  }
  0x24   : > { %330 = vst.msk [vmem:[#allocation2] sm:$0xff] %vm329_vm0, %v730_v4 }
  0x25   : > { %332 = vst.msk [vmem:[#allocation2 + $0x8] sm:$0x3f] %vm331_vm1, %v730_v4 }
  0x26   : > { %333 = vst.msk [vmem:[#allocation3] sm:$0xff] %vm329_vm0, %v731_v5 }
  0x27   : > { %334 = vst.msk [vmem:[#allocation3 + $0x8] sm:$0x3f] %vm331_vm1, %v731_v5 }
  0x28   : > { %335 = vst.msk [vmem:[#allocation4] sm:$0xff] %vm329_vm0, %v731_v5 }
  0x29   : > { %336 = vst.msk [vmem:[#allocation4 + $0x8] sm:$0x3f] %vm331_vm1, %v731_v5 }
  0x2a PF: > { %v628_v6 = vld [vmem:[%s267_s11 + $0x8] sm:$0xff]  ;;  %v627_v7 = vld [vmem:[%s267_s11] sm:$0xff]  ;;  %v732_v8 = vmov 0   ;;  %vm360_vm2 = vcmask 261120   ;;  %v382_v14 = vlaneseq  ;;  %s617_s26 = sshll.u32 %s720_s17, 7  ;;  %v733_v19 = vmov 0.0  }
  0x2b   : > { %675 = vset.pattern.permute.xlu2 %v732_v8  ;;  %v381_v9 = vld [vmem:[%s873_s1 + $0x8] sm:$0x3f]  ;;  %674 = vset.pattern.permute.xlu1 %v732_v8  ;;  %v337_v10 = vld [vmem:[%s872_s0] sm:$0xff]  ;;  %v385_v16 = vstv %s617_s26  ;;  %vm405_vm4 = vcmask 1045504   ;;  %vm413_vm6 = vcmask 5120   ;;  %vm411_vm7 = vcmask 7168  }
  0x2c   : > { %370 = vmatpush.bf16.msra.mxu0 %v628_v6  ;;  %v338_v11 = vld [vmem:[%s872_s0 + $0x8] sm:$0x3f]  ;;  %391 = vperm.xlu2 %675, %v381_v9   ;;  %v380_v13 = vld [vmem:[%s873_s1] sm:$0xff]  ;;  %v383_v15 = vand.u32 127, %v382_v14  ;;  %p620_p11 = scmp.ne.s32.totalorder %s720_s17, 1 }
  0x2d   : > { %676 = vset.pattern.permute.xlu0 %v732_v8  ;;  %v339_v12 = vpack.c.bf16 %v338_v11, %v337_v10  ;;  %v677_v22 = vld [vmem:[%s317_s10] ss:$0 sm:$0xff]  ;;  %v416_v32 = vld [vmem:[#allocation2 + $0x8] sm:$0x3f]  ;;  %v424_v1 = vld [vmem:[#allocation3] sm:$0xff] }
  0x2e   : > { %v386_v17 = vadd.s32 %v385_v16, %v383_v15  ;;  %v415_v36 = vld [vmem:[#allocation2] sm:$0xff]  ;;  %v425_v60 = vld [vmem:[#allocation3 + $0x8] sm:$0x3f] }
  0x2f   : > { %v399_v40 = vld [vmem:[#allocation4] sm:$0xff] }
  0x30   : > { %371 = vmatpush.bf16.msra.mxu0 %v627_v7  ;;  %v400_v54 = vld [vmem:[#allocation4 + $0x8] sm:$0x3f] }
  0x33   : > { %616 = vmatmul.msk.bf16.vlgmr.msra.gmra.mxu0 %vm360_vm2, %v339_v12 }
  0x34   : > { %388 = vperm.xlu2 %675, %v380_v13  }
  0x86   : > { %v392_v18 = vpop.permute.xlu2 %391 }
  0x87   : > { %vm394_vm3 = vcmp.eq.s32.totalorder %v386_v17, %v392_v18 }
  0x88   : > { %v619_v20 = vsel %vm394_vm3, 1.0, %v733_v19 }
  0x8e   : > { %v389_v28 = vpop.permute.xlu2 %388 }
  0x8f   : > { %vm393_vm5 = vcmp.eq.s32.totalorder %v386_v17, %v389_v28 }
  0x90   : > { %v618_v30 = vsel %vm393_vm5, 1.0, %v733_v19 }
  0xb0   : > { %v373_v21 = vpop.f32.mrf.mxu0 }
  0xb1   : > { %v374_v27 = vadd.f32 %v677_v22, %v373_v21 }
  0xb3   : > { %v378_v29 = vmul.f32 1.25, %v374_v27 }
  0xb5   : > { %v401_v31 = vmul.f32 %v618_v30, %v378_v29 }
  0xb8   : > { %v375_v23 = vpop.f32.mrf.mxu0 }
  0xb9   : > { %v376_v24 = vadd.f32 %v677_v22, %v375_v23 }
  0xbb   : > { %v379_v25 = vmul.f32 1.25, %v376_v24 }
  0xbd   : > { %v419_v26 = vsel %vm405_vm4, %v379_v25, -inf  ;;  %v402_v43 = vmul.f32 %v619_v20, %v379_v25 }
  0xbe   : > { %420 = vmax.xlane.f32.xlu0 %v419_v26 }
  0xbf   : > { %v406_v44 = vsel %vm405_vm4, %v402_v43, 0.0 }
  0xc6   : > { %417 = vmax.xlane.f32.xlu0 %v378_v29 }
  0xce   : > { %403 = vadd.xlane.f32.xlu0 %v401_v31 }
 0x131   : > { %v421_v33 = vpop.xlane.xlu0 %420 }
 0x132   : > { %v423_v34 = vmax.f32 %v416_v32, %v421_v33 }
 0x134   : > { %v427_v35 = vsub.f32 %v416_v32, %v423_v34  ;;  %460 = vst.msk [vmem:[#allocation2 + $0x8] sm:$0x3f] %vm413_vm6, %v423_v34  ;;  %441 = vperm.xlu1 %674, %v423_v34  }
 0x136   : > { %v430_v57 = vmul.f32 1.442695, %v427_v35 }
 0x139   : > { %v418_v37 = vpop.xlane.xlu0 %417 }
 0x13a   : > { %v422_v38 = vmax.f32 %v415_v36, %v418_v37 }
 0x13c   : > { %v426_v39 = vsub.f32 %v415_v36, %v422_v38  ;;  %459 = vst.msk [vmem:[#allocation2] sm:$0xff] %vm411_vm7, %v422_v38  ;;  %436 = vperm.xlu1 %674, %v422_v38  }
 0x13e   : > { %v428_v58 = vmul.f32 1.442695, %v426_v39 }
 0x141   : > { %v404_v41 = vpop.xlane.xlu0 %403 }
 0x142   : > { %v409_v42 = vadd.f32 %v404_v41, %v399_v40 }
 0x144   : > { %412 = vst.msk [vmem:[#allocation4] sm:$0xff] %vm411_vm7, %v409_v42 }
 0x166   : > { %407 = vadd.xlane.f32.xlu1 %v406_v44 }
 0x1a6   : > { %v442_v45 = vpop.permute.xlu1 %441 }
 0x1a7   : > { %v445_v46 = vsub.f32 %v379_v25, %v442_v45 }
 0x1a9   : > { %v448_v47 = vmul.f32 1.442695, %v445_v46 }
 0x1ab   : > { %678 = vpow2.f32 %v448_v47 }
 0x1ae   : > { %v437_v48 = vpop.permute.xlu1 %436 }
 0x1af   : > { %v444_v49 = vsub.f32 %v378_v29, %v437_v48 }
 0x1b1   : > { %v679_v50 = vpop.eup %678  ;;  %v446_v51 = vmul.f32 1.442695, %v444_v49 }
 0x1b2   : > { %v452_v52 = vsel %vm405_vm4, %v679_v50, 0.0 }
 0x1b3   : > { %680 = vpow2.f32 %v446_v51  ;;  %453 = vadd.xlane.f32.xlu0 %v452_v52 }
 0x1b4   : > { %682 = vpow2.f32 %v430_v57 }
 0x1b5   : > { %684 = vpow2.f32 %v428_v58 }
 0x1b9   : > { %v681_v53 = vpop.eup %680 }
 0x1ba   : > { %450 = vadd.xlane.f32.xlu2 %v681_v53  ;;  %v683_v59 = vpop.eup %682 }
 0x1bb   : > { %v433_v61 = vmul.f32 %v683_v59, %v425_v60  ;;  %v685_v0 = vpop.eup %684 }
 0x1bc   : > { %v432_v2 = vmul.f32 %v685_v0, %v424_v1 }
 0x1d9   : > { %v408_v55 = vpop.xlane.xlu1 %407 }
 0x1da   : > { %v410_v56 = vadd.f32 %v408_v55, %v400_v54 }
 0x1dc   : > { %414 = vst.msk [vmem:[#allocation4 + $0x8] sm:$0x3f] %vm413_vm6, %v410_v56 }
 0x226   : > { %v454_v62 = vpop.xlane.xlu0 %453 }
 0x227   : > { %v456_v63 = vadd.f32 %v454_v62, %v433_v61 }
 0x229   : > { %458 = vst.msk [vmem:[#allocation3 + $0x8] sm:$0x3f] %vm413_vm6, %v456_v63 }
 0x22c   : > { %464 = sbr.rel (%p620_p11) target bundleno = 585 (0x249), region = 85 }
 0x22d   : > { %v451_v3 = vpop.xlane.xlu2 %450 }
 0x22e   : > { %v455_v4 = vadd.f32 %v451_v3, %v432_v2 }
 0x230   : > { %457 = vst.msk [vmem:[#allocation3] sm:$0xff] %vm411_vm7, %v455_v4 }
 0x231   : > { %v476_v6 = vld [vmem:[#allocation3 + $0x8] sm:$0x3f]  ;;  %v465_v7 = vld [vmem:[%s873_s1] sm:$0xff]  ;;  %v466_v10 = vld [vmem:[%s873_s1 + $0x8] sm:$0x3f]  ;;  %v734_v17 = vmov 0.0  }
 0x232   : > { %v473_v9 = vld [vmem:[#allocation2] sm:$0xff]  ;;  %vm467_vm8 = vcmp.gt.s32.totalorder %v465_v7, 0  ;;  %v474_v14 = vld [vmem:[#allocation2 + $0x8] sm:$0x3f]  ;;  %vm468_vm9 = vcmp.gt.s32.totalorder %v466_v10, 0 }
 0x233   : > { %v483_v13 = vld [vmem:[#allocation4] sm:$0xff]  ;;  %v621_v18 = vsel %vm467_vm8, 1.0, %v734_v17  ;;  %v484_v19 = vld [vmem:[#allocation4 + $0x8] sm:$0x3f]  ;;  %v622_v22 = vsel %vm468_vm9, 1.0, %v734_v17 }
 0x237   : > { %v475_v5 = vld [vmem:[#allocation3] sm:$0xff] }
 0x238   : > { %686 = vlog2.f32 %v475_v5 }
 0x239   : > { %688 = vlog2.f32 %v476_v6 }
 0x23e   : > { %v687_v8 = vpop.eup %686 }
 0x23f   : > { %v478_v11 = vmul.f32 0.6931472, %v687_v8  ;;  %v689_v12 = vpop.eup %688 }
 0x240   : > { %v480_v16 = vmul.f32 0.6931472, %v689_v12 }
 0x241   : > { %v481_v15 = vadd.f32 %v478_v11, %v473_v9 }
 0x242   : > { %v482_v21 = vadd.f32 %v480_v16, %v474_v14 }
 0x243   : > { %v485_v20 = vsub.f32 %v481_v15, %v483_v13 }
 0x244   : > { %v486_v24 = vsub.f32 %v482_v21, %v484_v19 }
 0x245   : > { %v487_v23 = vmul.f32 %v621_v18, %v485_v20 }
 0x246   : > { %v488_v25 = vmul.f32 %v622_v22, %v486_v24 }
 0x247   : > { %489 = vst.msk [vmem:[%s876_s4] sm:$0xff] %vm411_vm7, %v487_v23 }
 0x248   : > { %490 = vst.msk [vmem:[%s876_s4 + $0x8] sm:$0x3f] %vm413_vm6, %v488_v25 }
 0x249 PF: > { %s14_s19 = sadd.s32 1, %s728_s19   ;;  %s877_s15 = smov %s716_s16 }
 0x24a   : > { %p11_p12 = scmp.ge.s32.totalorder %s14_s19, 4   ;;  %s878_s16 = smov %s795_s23 }
 0x24b   : > { %s879_s17 = smov %s724_s18  ;;  %s880_s18 = smov %s882_s20 }
 0x24c   :  { %13 = sbr.rel (!%p11_p12) target bundleno = 3 (0x3), region = 129 }

</bundles_post_ra>
